<compile_context>
chip_gen: v5e
topology: v5e:2x2
jax: 0.10.0
libtpu: 0.0.40
codegen_flags: <defaults>
</compile_context>

<pallas_src>
import functools

import jax
import jax.numpy as jnp
from jax import lax
from jax.experimental import pallas as pl
from jax.experimental.pallas import tpu as pltpu

STFT_MEAN = 0.2
THRESHOLD = 0.1          # sigma-delta neuron threshold
QUANT_STEP = 1.0 / 64.0  # input quantizer step
N_FREQ = 257
N_HIDDEN = 512

C0P = 384                # 257 padded to 3*128 lanes (lane-dense, tile-aligned on v5e/v6e/v7x)
SHIFT = 3                # accumulated delay_shift frames (input + 2 hidden blocks)
SUB_BLOCK = 128          # pipeline sub-block rows (matmul M stays >= 128)
MAX_TCHUNK = 1024        # time rows kept resident in VMEM per grid step (v7x-safe)


def _quant_relu(v, stft_mean, q_step):
    """Input block pre-activation: quantize(x - mean, 1/64) then ReLU (fused into scan load)."""
    q = jnp.round((v - stft_mean) * (1.0 / q_step)) * q_step
    return jnp.maximum(q, 0.0)


def _fused_scan(jobs, n_tiles, threshold):
    """Run up to three interleaved sigma-delta scans over `n_tiles` 8-row tiles.

    Each job is (load_fn, store_fn, xhat_ref, width):
      load_fn(base)        -> (8, width) f32 pre-activation tile (ReLU already applied)
      store_fn(base, tile)    stores the reconstructed (8, width) f32 tile (cast inside)
      xhat_ref (1, width) f32 reconstruction state, read before / written after the loop.
    The chains of different jobs are independent, so interleaving them in one loop body
    lets the scheduler hide each chain's dependence latency behind the others.
    """
    iotas = {}
    for _, _, _, width in jobs:
        if width not in iotas:
            iotas[width] = lax.broadcasted_iota(jnp.int32, (8, width), 0)

    def body(s, carry):
        base = pl.multiple_of(s * 8, 8)
        tiles = [load(base) for load, _, _, _ in jobs]      # read-only sources
        outs = list(tiles)                                   # reconstructed tiles (built up)
        xhs = list(carry)
        for i in range(8):                                   # static unroll, row-level interleave
            for jn, (_, _, _, width) in enumerate(jobs):
                row = tiles[jn][i:i + 1, :]                  # independent of the xhat chain
                xh = jnp.where(jnp.abs(row - xhs[jn]) >= threshold, row, xhs[jn])
                outs[jn] = jnp.where(iotas[width] == i, xh, outs[jn])
                xhs[jn] = xh
        for jn, (_, store, _, _) in enumerate(jobs):
            store(base, outs[jn])                            # one aligned (8, C) store per job
        return tuple(xhs)

    init = tuple(xh_ref[...] for _, _, xh_ref, _ in jobs)
    final = lax.fori_loop(0, n_tiles, body, init)
    for (_, _, xh_ref, _), xh in zip(jobs, final):
        xh_ref[...] = xh


def _fused_kernel(*refs, separate_mul, n_blocks, sb, threshold, q_step, stft_mean, shift):
    if separate_mul:
        (noisy_ref, mul_ref, w1_ref, w2_ref, w3_ref, out_ref,
         a0, a1, a2, s1, s2, xh0, xh1, xh2, tail) = refs
    else:
        (noisy_ref, w1_ref, w2_ref, w3_ref, out_ref,
         a0, a1, a2, s1, s2, xh0, xh1, xh2, tail) = refs
        mul_ref = noisy_ref

    n_tiles = sb // 8

    # Reset carried state at the first time-chunk of each batch element.
    @pl.when(pl.program_id(1) == 0)
    def _():
        xh0[...] = jnp.zeros_like(xh0)
        xh1[...] = jnp.zeros_like(xh1)
        xh2[...] = jnp.zeros_like(xh2)
        tail[...] = jnp.zeros_like(tail)

    # --- per-layer scan jobs (sources / destinations for one sub-block) -------------
    def job0(k):                      # input block: quantize+ReLU folded into the load
        off = k * sb
        def load(base):
            return _quant_relu(noisy_ref[pl.ds(off + base, 8), :], stft_mean, q_step)
        def store(base, tile):
            a0[pl.ds(off + base, 8), :] = tile.astype(a0.dtype)
        return (load, store, xh0, C0P)

    def job1(k):                      # hidden layer 1: ReLU folded into the load of z1
        off = k * sb
        def load(base):
            return jnp.maximum(s1[pl.ds(base, 8), :], 0.0)
        def store(base, tile):
            a1[pl.ds(off + base, 8), :] = tile.astype(a1.dtype)
        return (load, store, xh1, N_HIDDEN)

    def job2(k):                      # hidden layer 2
        off = k * sb
        def load(base):
            return jnp.maximum(s2[pl.ds(base, 8), :], 0.0)
        def store(base, tile):
            a2[pl.ds(off + base, 8), :] = tile.astype(a2.dtype)
        return (load, store, xh2, N_HIDDEN)

    # --- block-skewed pipeline over sub-blocks --------------------------------------
    # Step b:  scan0(block b) | matmul1+scan1(block b-1) | matmul2+scan2(block b-2)
    #          then matmul3 + shifted masked output for block b-2.
    for step in range(n_blocks + 2):
        k0 = step
        k1 = step - 1
        k2 = step - 2

        if 0 <= k1 < n_blocks:
            s1[...] = jnp.dot(a0[pl.ds(k1 * sb, sb), :], w1_ref[...],
                              preferred_element_type=jnp.float32)
        if 0 <= k2 < n_blocks:
            s2[...] = jnp.dot(a1[pl.ds(k2 * sb, sb), :], w2_ref[...],
                              preferred_element_type=jnp.float32)

        jobs = []
        if k0 < n_blocks:
            jobs.append(job0(k0))
        if 0 <= k1 < n_blocks:
            jobs.append(job1(k1))
        if 0 <= k2 < n_blocks:
            jobs.append(job2(k2))
        _fused_scan(jobs, n_tiles, threshold)

        # Output synapse, accumulated 3-frame delay_shift (value-side), mask application.
        if 0 <= k2 < n_blocks:
            off = k2 * sb
            z3 = jnp.dot(a2[pl.ds(off, sb), :], w3_ref[...],
                         preferred_element_type=jnp.float32)          # (sb, C0P) f32
            # Shift on the value side: rows [0, shift) come from the carried 3-row tail,
            # rows [shift, sb) are this block's z3[0 : sb-shift]; the store stays a single
            # aligned, unmasked (sb, C0P) store.
            shifted = jnp.concatenate([tail[...], z3[:sb - shift, :]], axis=0)
            out_ref[pl.ds(off, sb), :] = (
                mul_ref[pl.ds(off, sb), :] * jnp.maximum(shifted + 1.0, 0.0))
            tail[...] = z3[sb - shift:, :]                            # carry last 3 z3 rows


def _fused_forward(noisy_pad, w1p, w2p, w3p, noisy_mul_pad, tchunk, sb):
    b, t_pad, _ = noisy_pad.shape
    n_tc = t_pad // tchunk
    n_blocks = tchunk // sb
    separate_mul = noisy_mul_pad is not None

    kern = functools.partial(
        _fused_kernel, separate_mul=separate_mul, n_blocks=n_blocks, sb=sb,
        threshold=THRESHOLD, q_step=QUANT_STEP, stft_mean=STFT_MEAN, shift=SHIFT)

    data_spec = pl.BlockSpec((None, tchunk, C0P), lambda bb, tt: (bb, tt, 0))
    in_specs = [data_spec]
    inputs = [noisy_pad]
    if separate_mul:
        # TODO(synk): out_delay != 0 streams a second shifted copy of noisy; an index-offset
        # read with a small carried tail would halve that HBM traffic (out_delay defaults 0).
        in_specs.append(data_spec)
        inputs.append(noisy_mul_pad)
    in_specs += [
        pl.BlockSpec((C0P, N_HIDDEN), lambda bb, tt: (0, 0)),       # W1 resident
        pl.BlockSpec((N_HIDDEN, N_HIDDEN), lambda bb, tt: (0, 0)),  # W2 resident
        pl.BlockSpec((N_HIDDEN, C0P), lambda bb, tt: (0, 0)),       # W3 resident
    ]
    inputs += [w1p, w2p, w3p]

    return pl.pallas_call(
        kern,
        out_shape=jax.ShapeDtypeStruct((b, t_pad, C0P), jnp.float32),
        grid=(b, n_tc),
        in_specs=in_specs,
        out_specs=data_spec,
        scratch_shapes=[
            pltpu.VMEM((tchunk, C0P), jnp.bfloat16),       # a0: reconstructed input acts
            pltpu.VMEM((tchunk, N_HIDDEN), jnp.bfloat16),  # a1: reconstructed hidden-1 acts
            pltpu.VMEM((tchunk, N_HIDDEN), jnp.bfloat16),  # a2: reconstructed hidden-2 acts
            pltpu.VMEM((sb, N_HIDDEN), jnp.float32),       # s1: z1 block staging (pre-scan)
            pltpu.VMEM((sb, N_HIDDEN), jnp.float32),       # s2: z2 block staging (pre-scan)
            pltpu.VMEM((1, C0P), jnp.float32),             # xhat layer 0
            pltpu.VMEM((1, N_HIDDEN), jnp.float32),        # xhat layer 1
            pltpu.VMEM((1, N_HIDDEN), jnp.float32),        # xhat layer 2
            pltpu.VMEM((SHIFT, C0P), jnp.float32),         # 3-row z3 tail carry
        ],
        compiler_params=pltpu.CompilerParams(
            dimension_semantics=("parallel", "arbitrary"),
            vmem_limit_bytes=48 * 1024 * 1024,
        ),
    )(*inputs)


def _shift_time(x_btc, n):
    """slayer.axon.delay semantics: shift along time, zero-pad at the front."""
    if n == 0:
        return x_btc
    t = x_btc.shape[1]
    return jnp.pad(x_btc, ((0, 0), (n, 0), (0, 0)))[:, :t, :]


def init_params(key):
    """Deterministic synthetic weights (no checkpoint): Dense 257->512->512->257, no bias."""
    k1, k2, k3 = jax.random.split(key, 3)

    def dense(k, fan_in, fan_out):
        bound = 1.0 / jnp.sqrt(jnp.float32(fan_in))
        return jax.random.uniform(k, (fan_in, fan_out), jnp.float32, -bound, bound)

    # TODO(synk): slayer's synapse 8-bit weight-quantization pre_hook_fx is omitted.
    return {"w1": dense(k1, N_FREQ, N_HIDDEN),
            "w2": dense(k2, N_HIDDEN, N_HIDDEN),
            "w3": dense(k3, N_HIDDEN, N_FREQ)}


@functools.partial(jax.jit, static_argnames=("out_delay",))
def network_forward(noisy_nct, params, out_delay=0):
    """noisy_nct: (B, 257, T) float32 STFT magnitudes. Returns (B, 257, T)."""
    b, c, t = noisy_nct.shape

    # NCT -> NTC, pad channels 257->384 (lane-dense) and time to a chunk multiple.
    x = jnp.transpose(noisy_nct, (0, 2, 1)).astype(jnp.float32)

    t_pad8 = ((t + 7) // 8) * 8
    if t_pad8 <= SUB_BLOCK:
        tchunk = t_pad8                       # single sub-block per chunk
        sb = t_pad8
    else:
        n_chunks = -(-t_pad8 // MAX_TCHUNK)
        per = -(-t_pad8 // n_chunks)
        tchunk = ((per + SUB_BLOCK - 1) // SUB_BLOCK) * SUB_BLOCK
        sb = SUB_BLOCK
    n_tc = -(-t_pad8 // tchunk)
    t_pad = n_tc * tchunk
    x = jnp.pad(x, ((0, 0), (0, t_pad - t), (0, C0P - c)))

    # Zero-pad weights to the padded channel width; bf16 operands for the MXU.
    w1p = jnp.pad(params["w1"], ((0, C0P - N_FREQ), (0, 0))).astype(jnp.bfloat16)
    w2p = params["w2"].astype(jnp.bfloat16)
    w3p = jnp.pad(params["w3"], ((0, 0), (0, C0P - N_FREQ))).astype(jnp.bfloat16)

    # TODO(synk): learned per-channel axonal delays (slayer.axon.Delay) are taken at their
    # zero init; only the fixed 1-frame delay_shift per block (3 frames total) is applied.
    mul = _shift_time(x, out_delay) if out_delay != 0 else None
    y = _fused_forward(x, w1p, w2p, w3p, mul, tchunk, sb)

    return jnp.transpose(y[:, :t, :N_FREQ], (0, 2, 1))  # back to NCT


if __name__ == "__main__":
    key = jax.random.PRNGKey(0)
    k_params, k_noisy = jax.random.split(key)
    params = init_params(k_params)

    batch, n_time = 2, 8
    # Synthetic non-negative "STFT magnitude" input, (B, 257, T) in NCT layout.
    noisy = jax.random.uniform(k_noisy, (batch, N_FREQ, n_time), jnp.float32, 0.0, 2.0)

    out = network_forward(noisy, params)
    out = jax.block_until_ready(out)

    assert out.shape == (batch, N_FREQ, n_time)
    assert out.dtype == jnp.float32
    assert bool(jnp.all(jnp.isfinite(out)))
    print("KERNEL_OK")
</pallas_src>

<mosaic_0001>
module attributes {stable_mosaic.version = 11 : i64} {
  func.func @_fused_kernel(%arg0: i32, %arg1: i32, %arg2: memref<1x8x384xf32, #tpu.memory_space<vmem>>, %arg3: memref<384x512xbf16, #tpu.memory_space<vmem>>, %arg4: memref<512x512xbf16, #tpu.memory_space<vmem>>, %arg5: memref<512x384xbf16, #tpu.memory_space<vmem>>, %arg6: memref<1x8x384xf32, #tpu.memory_space<vmem>>, %arg7: memref<8x384xbf16, #tpu.memory_space<vmem>>, %arg8: memref<8x512xbf16, #tpu.memory_space<vmem>>, %arg9: memref<8x512xbf16, #tpu.memory_space<vmem>>, %arg10: memref<8x512xf32, #tpu.memory_space<vmem>>, %arg11: memref<8x512xf32, #tpu.memory_space<vmem>>, %arg12: memref<1x384xf32, #tpu.memory_space<vmem>>, %arg13: memref<1x512xf32, #tpu.memory_space<vmem>>, %arg14: memref<1x512xf32, #tpu.memory_space<vmem>>, %arg15: memref<3x384xf32, #tpu.memory_space<vmem>>) attributes {dimension_semantics = [#tpu.dimension_semantics<parallel>, #tpu.dimension_semantics<arbitrary>], iteration_bounds = array<i64: 2, 1>, scalar_prefetch = 0 : i64, scratch_operands = 9 : i64, tpu.core_type = #tpu.core_type<tc>, window_params = [{transform_indices = @transform_0, window_bounds = array<i64: 1, 8, 384>}, {pipeline_mode = #tpu.pipeline_mode<synchronous>, transform_indices = @transform_1, window_bounds = array<i64: 384, 512>}, {pipeline_mode = #tpu.pipeline_mode<synchronous>, transform_indices = @transform_2, window_bounds = array<i64: 512, 512>}, {pipeline_mode = #tpu.pipeline_mode<synchronous>, transform_indices = @transform_3, window_bounds = array<i64: 512, 384>}, {transform_indices = @transform_4, window_bounds = array<i64: 1, 8, 384>}]} {
    %c0_i32 = arith.constant 0 : i32
    %0 = arith.cmpi eq, %arg1, %c0_i32 : i32
    %1 = arith.extui %0 : i1 to i32
    %c0_i32_0 = arith.constant 0 : i32
    %2 = arith.cmpi ne, %1, %c0_i32_0 : i32
    scf.if %2 {
      %cst_108 = arith.constant 0.000000e+00 : f32
      %341 = vector.broadcast %cst_108 : f32 to vector<1x384xf32>
      %c0_109 = arith.constant 0 : index
      %c0_110 = arith.constant 0 : index
      %342 = vector.load %arg12[%c0_109, %c0_110] : memref<1x384xf32, #tpu.memory_space<vmem>>, vector<1x384xf32>
      tpu.vector_store %arg12[%c0_109, %c0_110], %341 {strides = array<i32>} : memref<1x384xf32, #tpu.memory_space<vmem>>, vector<1x384xf32>,
      %cst_111 = arith.constant 0.000000e+00 : f32
      %343 = vector.broadcast %cst_111 : f32 to vector<1x512xf32>
      %c0_112 = arith.constant 0 : index
      %c0_113 = arith.constant 0 : index
      %344 = vector.load %arg13[%c0_112, %c0_113] : memref<1x512xf32, #tpu.memory_space<vmem>>, vector<1x512xf32>
      tpu.vector_store %arg13[%c0_112, %c0_113], %343 {strides = array<i32>} : memref<1x512xf32, #tpu.memory_space<vmem>>, vector<1x512xf32>,
      %cst_114 = arith.constant 0.000000e+00 : f32
      %345 = vector.broadcast %cst_114 : f32 to vector<1x512xf32>
      %c0_115 = arith.constant 0 : index
      %c0_116 = arith.constant 0 : index
      %346 = vector.load %arg14[%c0_115, %c0_116] : memref<1x512xf32, #tpu.memory_space<vmem>>, vector<1x512xf32>
      tpu.vector_store %arg14[%c0_115, %c0_116], %345 {strides = array<i32>} : memref<1x512xf32, #tpu.memory_space<vmem>>, vector<1x512xf32>,
      %cst_117 = arith.constant 0.000000e+00 : f32
      %347 = vector.broadcast %cst_117 : f32 to vector<3x384xf32>
      %c0_118 = arith.constant 0 : index
      %c0_119 = arith.constant 0 : index
      %348 = vector.load %arg15[%c0_118, %c0_119] : memref<3x384xf32, #tpu.memory_space<vmem>>, vector<3x384xf32>
      tpu.vector_store %arg15[%c0_118, %c0_119], %347 {strides = array<i32>} : memref<3x384xf32, #tpu.memory_space<vmem>>, vector<3x384xf32>,
    } else {
    }
    %3 = tpu.iota {dimensions = array<i32: 0>} : vector<8x384xi32>
    %c0 = arith.constant 0 : index
    %c0_1 = arith.constant 0 : index
    %4 = vector.load %arg12[%c0, %c0_1] : memref<1x384xf32, #tpu.memory_space<vmem>>, vector<1x384xf32>
    %c0_i32_2 = arith.constant 0 : i32
    %c8_i32 = arith.constant 8 : i32
    %5 = arith.muli %c0_i32_2, %c8_i32 : i32
    %6 = tpu.assume_multiple %5, 8 : i32
    %c0_i32_3 = arith.constant 0 : i32
    %7 = arith.addi %c0_i32_3, %6 : i32
    %c0_4 = arith.constant 0 : index
    %8 = arith.index_cast %7 : i32 to index
    %c0_5 = arith.constant 0 : index
    %9 = vector.load %arg2[%c0_4, %8, %c0_5] : memref<1x8x384xf32, #tpu.memory_space<vmem>>, vector<1x8x384xf32>
    %10 = vector.shape_cast %9 : vector<1x8x384xf32> to vector<8x384xf32>
    %cst = arith.constant 2.000000e-01 : f32
    %11 = vector.broadcast %cst : f32 to vector<8x384xf32>
    %12 = arith.subf %10, %11 : vector<8x384xf32>
    %cst_6 = arith.constant 6.400000e+01 : f32
    %13 = vector.broadcast %cst_6 : f32 to vector<8x384xf32>
    %14 = arith.mulf %12, %13 : vector<8x384xf32>
    %15 = math.roundeven %14 : vector<8x384xf32>
    %cst_7 = arith.constant 1.562500e-02 : f32
    %16 = vector.broadcast %cst_7 : f32 to vector<8x384xf32>
    %17 = arith.mulf %15, %16 : vector<8x384xf32>
    %cst_8 = arith.constant 0.000000e+00 : f32
    %18 = vector.broadcast %cst_8 : f32 to vector<8x384xf32>
    %19 = arith.maximumf %17, %18 : vector<8x384xf32>
    %20 = vector.extract_strided_slice %19 {offsets = [0, 0], sizes = [1, 384], strides = [1, 1]} : vector<8x384xf32> to vector<1x384xf32>
    %21 = arith.subf %20, %4 : vector<1x384xf32>
    %22 = math.absf %21 : vector<1x384xf32>
    %cst_9 = arith.constant 1.000000e-01 : f32
    %23 = vector.broadcast %cst_9 : f32 to vector<1x384xf32>
    %24 = arith.cmpf oge, %22, %23 : vector<1x384xf32>
    %25 = arith.select %24, %20, %4 : vector<1x384xi1>, vector<1x384xf32>
    %c0_i32_10 = arith.constant 0 : i32
    %26 = vector.broadcast %c0_i32_10 : i32 to vector<8x384xi32>
    %27 = arith.cmpi eq, %3, %26 : vector<8x384xi32>
    %28 = vector.shape_cast %25 : vector<1x384xf32> to vector<1x384xf32>
    %29 = vector.broadcast %28 : vector<1x384xf32> to vector<8x384xf32>
    %30 = arith.select %27, %29, %19 : vector<8x384xi1>, vector<8x384xf32>
    %31 = vector.extract_strided_slice %19 {offsets = [1, 0], sizes = [1, 384], strides = [1, 1]} : vector<8x384xf32> to vector<1x384xf32>
    %32 = arith.subf %31, %25 : vector<1x384xf32>
    %33 = math.absf %32 : vector<1x384xf32>
    %cst_11 = arith.constant 1.000000e-01 : f32
    %34 = vector.broadcast %cst_11 : f32 to vector<1x384xf32>
    %35 = arith.cmpf oge, %33, %34 : vector<1x384xf32>
    %36 = arith.select %35, %31, %25 : vector<1x384xi1>, vector<1x384xf32>
    %c1_i32 = arith.constant 1 : i32
    %37 = vector.broadcast %c1_i32 : i32 to vector<8x384xi32>
    %38 = arith.cmpi eq, %3, %37 : vector<8x384xi32>
    %39 = vector.shape_cast %36 : vector<1x384xf32> to vector<1x384xf32>
    %40 = vector.broadcast %39 : vector<1x384xf32> to vector<8x384xf32>
    %41 = arith.select %38, %40, %30 : vector<8x384xi1>, vector<8x384xf32>
    %42 = vector.extract_strided_slice %19 {offsets = [2, 0], sizes = [1, 384], strides = [1, 1]} : vector<8x384xf32> to vector<1x384xf32>
    %43 = arith.subf %42, %36 : vector<1x384xf32>
    %44 = math.absf %43 : vector<1x384xf32>
    %cst_12 = arith.constant 1.000000e-01 : f32
    %45 = vector.broadcast %cst_12 : f32 to vector<1x384xf32>
    %46 = arith.cmpf oge, %44, %45 : vector<1x384xf32>
    %47 = arith.select %46, %42, %36 : vector<1x384xi1>, vector<1x384xf32>
    %c2_i32 = arith.constant 2 : i32
    %48 = vector.broadcast %c2_i32 : i32 to vector<8x384xi32>
    %49 = arith.cmpi eq, %3, %48 : vector<8x384xi32>
    %50 = vector.shape_cast %47 : vector<1x384xf32> to vector<1x384xf32>
    %51 = vector.broadcast %50 : vector<1x384xf32> to vector<8x384xf32>
    %52 = arith.select %49, %51, %41 : vector<8x384xi1>, vector<8x384xf32>
    %53 = vector.extract_strided_slice %19 {offsets = [3, 0], sizes = [1, 384], strides = [1, 1]} : vector<8x384xf32> to vector<1x384xf32>
    %54 = arith.subf %53, %47 : vector<1x384xf32>
    %55 = math.absf %54 : vector<1x384xf32>
    %cst_13 = arith.constant 1.000000e-01 : f32
    %56 = vector.broadcast %cst_13 : f32 to vector<1x384xf32>
    %57 = arith.cmpf oge, %55, %56 : vector<1x384xf32>
    %58 = arith.select %57, %53, %47 : vector<1x384xi1>, vector<1x384xf32>
    %c3_i32 = arith.constant 3 : i32
    %59 = vector.broadcast %c3_i32 : i32 to vector<8x384xi32>
    %60 = arith.cmpi eq, %3, %59 : vector<8x384xi32>
    %61 = vector.shape_cast %58 : vector<1x384xf32> to vector<1x384xf32>
    %62 = vector.broadcast %61 : vector<1x384xf32> to vector<8x384xf32>
    %63 = arith.select %60, %62, %52 : vector<8x384xi1>, vector<8x384xf32>
    %64 = vector.extract_strided_slice %19 {offsets = [4, 0], sizes = [1, 384], strides = [1, 1]} : vector<8x384xf32> to vector<1x384xf32>
    %65 = arith.subf %64, %58 : vector<1x384xf32>
    %66 = math.absf %65 : vector<1x384xf32>
    %cst_14 = arith.constant 1.000000e-01 : f32
    %67 = vector.broadcast %cst_14 : f32 to vector<1x384xf32>
    %68 = arith.cmpf oge, %66, %67 : vector<1x384xf32>
    %69 = arith.select %68, %64, %58 : vector<1x384xi1>, vector<1x384xf32>
    %c4_i32 = arith.constant 4 : i32
    %70 = vector.broadcast %c4_i32 : i32 to vector<8x384xi32>
    %71 = arith.cmpi eq, %3, %70 : vector<8x384xi32>
    %72 = vector.shape_cast %69 : vector<1x384xf32> to vector<1x384xf32>
    %73 = vector.broadcast %72 : vector<1x384xf32> to vector<8x384xf32>
    %74 = arith.select %71, %73, %63 : vector<8x384xi1>, vector<8x384xf32>
    %75 = vector.extract_strided_slice %19 {offsets = [5, 0], sizes = [1, 384], strides = [1, 1]} : vector<8x384xf32> to vector<1x384xf32>
    %76 = arith.subf %75, %69 : vector<1x384xf32>
    %77 = math.absf %76 : vector<1x384xf32>
    %cst_15 = arith.constant 1.000000e-01 : f32
    %78 = vector.broadcast %cst_15 : f32 to vector<1x384xf32>
    %79 = arith.cmpf oge, %77, %78 : vector<1x384xf32>
    %80 = arith.select %79, %75, %69 : vector<1x384xi1>, vector<1x384xf32>
    %c5_i32 = arith.constant 5 : i32
    %81 = vector.broadcast %c5_i32 : i32 to vector<8x384xi32>
    %82 = arith.cmpi eq, %3, %81 : vector<8x384xi32>
    %83 = vector.shape_cast %80 : vector<1x384xf32> to vector<1x384xf32>
    %84 = vector.broadcast %83 : vector<1x384xf32> to vector<8x384xf32>
    %85 = arith.select %82, %84, %74 : vector<8x384xi1>, vector<8x384xf32>
    %86 = vector.extract_strided_slice %19 {offsets = [6, 0], sizes = [1, 384], strides = [1, 1]} : vector<8x384xf32> to vector<1x384xf32>
    %87 = arith.subf %86, %80 : vector<1x384xf32>
    %88 = math.absf %87 : vector<1x384xf32>
    %cst_16 = arith.constant 1.000000e-01 : f32
    %89 = vector.broadcast %cst_16 : f32 to vector<1x384xf32>
    %90 = arith.cmpf oge, %88, %89 : vector<1x384xf32>
    %91 = arith.select %90, %86, %80 : vector<1x384xi1>, vector<1x384xf32>
    %c6_i32 = arith.constant 6 : i32
    %92 = vector.broadcast %c6_i32 : i32 to vector<8x384xi32>
    %93 = arith.cmpi eq, %3, %92 : vector<8x384xi32>
    %94 = vector.shape_cast %91 : vector<1x384xf32> to vector<1x384xf32>
    %95 = vector.broadcast %94 : vector<1x384xf32> to vector<8x384xf32>
    %96 = arith.select %93, %95, %85 : vector<8x384xi1>, vector<8x384xf32>
    %97 = vector.extract_strided_slice %19 {offsets = [7, 0], sizes = [1, 384], strides = [1, 1]} : vector<8x384xf32> to vector<1x384xf32>
    %98 = arith.subf %97, %91 : vector<1x384xf32>
    %99 = math.absf %98 : vector<1x384xf32>
    %cst_17 = arith.constant 1.000000e-01 : f32
    %100 = vector.broadcast %cst_17 : f32 to vector<1x384xf32>
    %101 = arith.cmpf oge, %99, %100 : vector<1x384xf32>
    %102 = arith.select %101, %97, %91 : vector<1x384xi1>, vector<1x384xf32>
    %c7_i32 = arith.constant 7 : i32
    %103 = vector.broadcast %c7_i32 : i32 to vector<8x384xi32>
    %104 = arith.cmpi eq, %3, %103 : vector<8x384xi32>
    %105 = vector.shape_cast %102 : vector<1x384xf32> to vector<1x384xf32>
    %106 = vector.broadcast %105 : vector<1x384xf32> to vector<8x384xf32>
    %107 = arith.select %104, %106, %96 : vector<8x384xi1>, vector<8x384xf32>
    %108 = arith.truncf %107 : vector<8x384xf32> to vector<8x384xbf16>
    %c0_i32_18 = arith.constant 0 : i32
    %109 = arith.addi %c0_i32_18, %6 : i32
    %110 = arith.index_cast %109 : i32 to index
    %c0_19 = arith.constant 0 : index
    %111 = vector.load %arg7[%110, %c0_19] : memref<8x384xbf16, #tpu.memory_space<vmem>>, vector<8x384xbf16>
    tpu.vector_store %arg7[%110, %c0_19], %108 {strides = array<i32>} : memref<8x384xbf16, #tpu.memory_space<vmem>>, vector<8x384xbf16>,
    %c1_i32_20 = arith.constant 1 : i32
    %c0_21 = arith.constant 0 : index
    %c0_22 = arith.constant 0 : index
    %112 = vector.load %arg12[%c0_21, %c0_22] : memref<1x384xf32, #tpu.memory_space<vmem>>, vector<1x384xf32>
    tpu.vector_store %arg12[%c0_21, %c0_22], %102 {strides = array<i32>} : memref<1x384xf32, #tpu.memory_space<vmem>>, vector<1x384xf32>,
    %c0_23 = arith.constant 0 : index
    %c0_24 = arith.constant 0 : index
    %113 = vector.load %arg7[%c0_23, %c0_24] : memref<8x384xbf16, #tpu.memory_space<vmem>>, vector<8x384xbf16>
    %c0_25 = arith.constant 0 : index
    %c0_26 = arith.constant 0 : index
    %114 = vector.load %arg3[%c0_25, %c0_26] : memref<384x512xbf16, #tpu.memory_space<vmem>>, vector<384x512xbf16>
    %cst_27 = arith.constant dense<0.000000e+00> : vector<8x512xf32>
    %115 = tpu.matmul %113, %114, %cst_27 {dimension_numbers = #tpu.dot_dimension_numbers<[1], [0], [0], [1], [0, 0, 1, 1], [], []>} : vector<8x384xbf16>, vector<384x512xbf16>, vector<8x512xf32> -> vector<8x512xf32>
    %c0_28 = arith.constant 0 : index
    %c0_29 = arith.constant 0 : index
    %116 = vector.load %arg10[%c0_28, %c0_29] : memref<8x512xf32, #tpu.memory_space<vmem>>, vector<8x512xf32>
    tpu.vector_store %arg10[%c0_28, %c0_29], %115 {strides = array<i32>} : memref<8x512xf32, #tpu.memory_space<vmem>>, vector<8x512xf32>,
    %117 = tpu.iota {dimensions = array<i32: 0>} : vector<8x512xi32>
    %c0_30 = arith.constant 0 : index
    %c0_31 = arith.constant 0 : index
    %118 = vector.load %arg13[%c0_30, %c0_31] : memref<1x512xf32, #tpu.memory_space<vmem>>, vector<1x512xf32>
    %c0_i32_32 = arith.constant 0 : i32
    %c8_i32_33 = arith.constant 8 : i32
    %119 = arith.muli %c0_i32_32, %c8_i32_33 : i32
    %120 = tpu.assume_multiple %119, 8 : i32
    %121 = arith.index_cast %120 : i32 to index
    %c0_34 = arith.constant 0 : index
    %122 = vector.load %arg10[%121, %c0_34] : memref<8x512xf32, #tpu.memory_space<vmem>>, vector<8x512xf32>
    %cst_35 = arith.constant 0.000000e+00 : f32
    %123 = vector.broadcast %cst_35 : f32 to vector<8x512xf32>
    %124 = arith.maximumf %122, %123 : vector<8x512xf32>
    %125 = vector.extract_strided_slice %124 {offsets = [0, 0], sizes = [1, 512], strides = [1, 1]} : vector<8x512xf32> to vector<1x512xf32>
    %126 = arith.subf %125, %118 : vector<1x512xf32>
    %127 = math.absf %126 : vector<1x512xf32>
    %cst_36 = arith.constant 1.000000e-01 : f32
    %128 = vector.broadcast %cst_36 : f32 to vector<1x512xf32>
    %129 = arith.cmpf oge, %127, %128 : vector<1x512xf32>
    %130 = arith.select %129, %125, %118 : vector<1x512xi1>, vector<1x512xf32>
    %c0_i32_37 = arith.constant 0 : i32
    %131 = vector.broadcast %c0_i32_37 : i32 to vector<8x512xi32>
    %132 = arith.cmpi eq, %117, %131 : vector<8x512xi32>
    %133 = vector.shape_cast %130 : vector<1x512xf32> to vector<1x512xf32>
    %134 = vector.broadcast %133 : vector<1x512xf32> to vector<8x512xf32>
    %135 = arith.select %132, %134, %124 : vector<8x512xi1>, vector<8x512xf32>
    %136 = vector.extract_strided_slice %124 {offsets = [1, 0], sizes = [1, 512], strides = [1, 1]} : vector<8x512xf32> to vector<1x512xf32>
    %137 = arith.subf %136, %130 : vector<1x512xf32>
    %138 = math.absf %137 : vector<1x512xf32>
    %cst_38 = arith.constant 1.000000e-01 : f32
    %139 = vector.broadcast %cst_38 : f32 to vector<1x512xf32>
    %140 = arith.cmpf oge, %138, %139 : vector<1x512xf32>
    %141 = arith.select %140, %136, %130 : vector<1x512xi1>, vector<1x512xf32>
    %c1_i32_39 = arith.constant 1 : i32
    %142 = vector.broadcast %c1_i32_39 : i32 to vector<8x512xi32>
    %143 = arith.cmpi eq, %117, %142 : vector<8x512xi32>
    %144 = vector.shape_cast %141 : vector<1x512xf32> to vector<1x512xf32>
    %145 = vector.broadcast %144 : vector<1x512xf32> to vector<8x512xf32>
    %146 = arith.select %143, %145, %135 : vector<8x512xi1>, vector<8x512xf32>
    %147 = vector.extract_strided_slice %124 {offsets = [2, 0], sizes = [1, 512], strides = [1, 1]} : vector<8x512xf32> to vector<1x512xf32>
    %148 = arith.subf %147, %141 : vector<1x512xf32>
    %149 = math.absf %148 : vector<1x512xf32>
    %cst_40 = arith.constant 1.000000e-01 : f32
    %150 = vector.broadcast %cst_40 : f32 to vector<1x512xf32>
    %151 = arith.cmpf oge, %149, %150 : vector<1x512xf32>
    %152 = arith.select %151, %147, %141 : vector<1x512xi1>, vector<1x512xf32>
    %c2_i32_41 = arith.constant 2 : i32
    %153 = vector.broadcast %c2_i32_41 : i32 to vector<8x512xi32>
    %154 = arith.cmpi eq, %117, %153 : vector<8x512xi32>
    %155 = vector.shape_cast %152 : vector<1x512xf32> to vector<1x512xf32>
    %156 = vector.broadcast %155 : vector<1x512xf32> to vector<8x512xf32>
    %157 = arith.select %154, %156, %146 : vector<8x512xi1>, vector<8x512xf32>
    %158 = vector.extract_strided_slice %124 {offsets = [3, 0], sizes = [1, 512], strides = [1, 1]} : vector<8x512xf32> to vector<1x512xf32>
    %159 = arith.subf %158, %152 : vector<1x512xf32>
    %160 = math.absf %159 : vector<1x512xf32>
    %cst_42 = arith.constant 1.000000e-01 : f32
    %161 = vector.broadcast %cst_42 : f32 to vector<1x512xf32>
    %162 = arith.cmpf oge, %160, %161 : vector<1x512xf32>
    %163 = arith.select %162, %158, %152 : vector<1x512xi1>, vector<1x512xf32>
    %c3_i32_43 = arith.constant 3 : i32
    %164 = vector.broadcast %c3_i32_43 : i32 to vector<8x512xi32>
    %165 = arith.cmpi eq, %117, %164 : vector<8x512xi32>
    %166 = vector.shape_cast %163 : vector<1x512xf32> to vector<1x512xf32>
    %167 = vector.broadcast %166 : vector<1x512xf32> to vector<8x512xf32>
    %168 = arith.select %165, %167, %157 : vector<8x512xi1>, vector<8x512xf32>
    %169 = vector.extract_strided_slice %124 {offsets = [4, 0], sizes = [1, 512], strides = [1, 1]} : vector<8x512xf32> to vector<1x512xf32>
    %170 = arith.subf %169, %163 : vector<1x512xf32>
    %171 = math.absf %170 : vector<1x512xf32>
    %cst_44 = arith.constant 1.000000e-01 : f32
    %172 = vector.broadcast %cst_44 : f32 to vector<1x512xf32>
    %173 = arith.cmpf oge, %171, %172 : vector<1x512xf32>
    %174 = arith.select %173, %169, %163 : vector<1x512xi1>, vector<1x512xf32>
    %c4_i32_45 = arith.constant 4 : i32
    %175 = vector.broadcast %c4_i32_45 : i32 to vector<8x512xi32>
    %176 = arith.cmpi eq, %117, %175 : vector<8x512xi32>
    %177 = vector.shape_cast %174 : vector<1x512xf32> to vector<1x512xf32>
    %178 = vector.broadcast %177 : vector<1x512xf32> to vector<8x512xf32>
    %179 = arith.select %176, %178, %168 : vector<8x512xi1>, vector<8x512xf32>
    %180 = vector.extract_strided_slice %124 {offsets = [5, 0], sizes = [1, 512], strides = [1, 1]} : vector<8x512xf32> to vector<1x512xf32>
    %181 = arith.subf %180, %174 : vector<1x512xf32>
    %182 = math.absf %181 : vector<1x512xf32>
    %cst_46 = arith.constant 1.000000e-01 : f32
    %183 = vector.broadcast %cst_46 : f32 to vector<1x512xf32>
    %184 = arith.cmpf oge, %182, %183 : vector<1x512xf32>
    %185 = arith.select %184, %180, %174 : vector<1x512xi1>, vector<1x512xf32>
    %c5_i32_47 = arith.constant 5 : i32
    %186 = vector.broadcast %c5_i32_47 : i32 to vector<8x512xi32>
    %187 = arith.cmpi eq, %117, %186 : vector<8x512xi32>
    %188 = vector.shape_cast %185 : vector<1x512xf32> to vector<1x512xf32>
    %189 = vector.broadcast %188 : vector<1x512xf32> to vector<8x512xf32>
    %190 = arith.select %187, %189, %179 : vector<8x512xi1>, vector<8x512xf32>
    %191 = vector.extract_strided_slice %124 {offsets = [6, 0], sizes = [1, 512], strides = [1, 1]} : vector<8x512xf32> to vector<1x512xf32>
    %192 = arith.subf %191, %185 : vector<1x512xf32>
    %193 = math.absf %192 : vector<1x512xf32>
    %cst_48 = arith.constant 1.000000e-01 : f32
    %194 = vector.broadcast %cst_48 : f32 to vector<1x512xf32>
    %195 = arith.cmpf oge, %193, %194 : vector<1x512xf32>
    %196 = arith.select %195, %191, %185 : vector<1x512xi1>, vector<1x512xf32>
    %c6_i32_49 = arith.constant 6 : i32
    %197 = vector.broadcast %c6_i32_49 : i32 to vector<8x512xi32>
    %198 = arith.cmpi eq, %117, %197 : vector<8x512xi32>
    %199 = vector.shape_cast %196 : vector<1x512xf32> to vector<1x512xf32>
    %200 = vector.broadcast %199 : vector<1x512xf32> to vector<8x512xf32>
    %201 = arith.select %198, %200, %190 : vector<8x512xi1>, vector<8x512xf32>
    %202 = vector.extract_strided_slice %124 {offsets = [7, 0], sizes = [1, 512], strides = [1, 1]} : vector<8x512xf32> to vector<1x512xf32>
    %203 = arith.subf %202, %196 : vector<1x512xf32>
    %204 = math.absf %203 : vector<1x512xf32>
    %cst_50 = arith.constant 1.000000e-01 : f32
    %205 = vector.broadcast %cst_50 : f32 to vector<1x512xf32>
    %206 = arith.cmpf oge, %204, %205 : vector<1x512xf32>
    %207 = arith.select %206, %202, %196 : vector<1x512xi1>, vector<1x512xf32>
    %c7_i32_51 = arith.constant 7 : i32
    %208 = vector.broadcast %c7_i32_51 : i32 to vector<8x512xi32>
    %209 = arith.cmpi eq, %117, %208 : vector<8x512xi32>
    %210 = vector.shape_cast %207 : vector<1x512xf32> to vector<1x512xf32>
    %211 = vector.broadcast %210 : vector<1x512xf32> to vector<8x512xf32>
    %212 = arith.select %209, %211, %201 : vector<8x512xi1>, vector<8x512xf32>
    %213 = arith.truncf %212 : vector<8x512xf32> to vector<8x512xbf16>
    %c0_i32_52 = arith.constant 0 : i32
    %214 = arith.addi %c0_i32_52, %120 : i32
    %215 = arith.index_cast %214 : i32 to index
    %c0_53 = arith.constant 0 : index
    %216 = vector.load %arg8[%215, %c0_53] : memref<8x512xbf16, #tpu.memory_space<vmem>>, vector<8x512xbf16>
    tpu.vector_store %arg8[%215, %c0_53], %213 {strides = array<i32>} : memref<8x512xbf16, #tpu.memory_space<vmem>>, vector<8x512xbf16>,
    %c1_i32_54 = arith.constant 1 : i32
    %c0_55 = arith.constant 0 : index
    %c0_56 = arith.constant 0 : index
    %217 = vector.load %arg13[%c0_55, %c0_56] : memref<1x512xf32, #tpu.memory_space<vmem>>, vector<1x512xf32>
    tpu.vector_store %arg13[%c0_55, %c0_56], %207 {strides = array<i32>} : memref<1x512xf32, #tpu.memory_space<vmem>>, vector<1x512xf32>,
    %c0_57 = arith.constant 0 : index
    %c0_58 = arith.constant 0 : index
    %218 = vector.load %arg8[%c0_57, %c0_58] : memref<8x512xbf16, #tpu.memory_space<vmem>>, vector<8x512xbf16>
    %c0_59 = arith.constant 0 : index
    %c0_60 = arith.constant 0 : index
    %219 = vector.load %arg4[%c0_59, %c0_60] : memref<512x512xbf16, #tpu.memory_space<vmem>>, vector<512x512xbf16>
    %cst_61 = arith.constant dense<0.000000e+00> : vector<8x512xf32>
    %220 = tpu.matmul %218, %219, %cst_61 {dimension_numbers = #tpu.dot_dimension_numbers<[1], [0], [0], [1], [0, 0, 1, 1], [], []>} : vector<8x512xbf16>, vector<512x512xbf16>, vector<8x512xf32> -> vector<8x512xf32>
    %c0_62 = arith.constant 0 : index
    %c0_63 = arith.constant 0 : index
    %221 = vector.load %arg11[%c0_62, %c0_63] : memref<8x512xf32, #tpu.memory_space<vmem>>, vector<8x512xf32>
    tpu.vector_store %arg11[%c0_62, %c0_63], %220 {strides = array<i32>} : memref<8x512xf32, #tpu.memory_space<vmem>>, vector<8x512xf32>,
    %222 = tpu.iota {dimensions = array<i32: 0>} : vector<8x512xi32>
    %c0_64 = arith.constant 0 : index
    %c0_65 = arith.constant 0 : index
    %223 = vector.load %arg14[%c0_64, %c0_65] : memref<1x512xf32, #tpu.memory_space<vmem>>, vector<1x512xf32>
    %c0_i32_66 = arith.constant 0 : i32
    %c8_i32_67 = arith.constant 8 : i32
    %224 = arith.muli %c0_i32_66, %c8_i32_67 : i32
    %225 = tpu.assume_multiple %224, 8 : i32
    %226 = arith.index_cast %225 : i32 to index
    %c0_68 = arith.constant 0 : index
    %227 = vector.load %arg11[%226, %c0_68] : memref<8x512xf32, #tpu.memory_space<vmem>>, vector<8x512xf32>
    %cst_69 = arith.constant 0.000000e+00 : f32
    %228 = vector.broadcast %cst_69 : f32 to vector<8x512xf32>
    %229 = arith.maximumf %227, %228 : vector<8x512xf32>
    %230 = vector.extract_strided_slice %229 {offsets = [0, 0], sizes = [1, 512], strides = [1, 1]} : vector<8x512xf32> to vector<1x512xf32>
    %231 = arith.subf %230, %223 : vector<1x512xf32>
    %232 = math.absf %231 : vector<1x512xf32>
    %cst_70 = arith.constant 1.000000e-01 : f32
    %233 = vector.broadcast %cst_70 : f32 to vector<1x512xf32>
    %234 = arith.cmpf oge, %232, %233 : vector<1x512xf32>
    %235 = arith.select %234, %230, %223 : vector<1x512xi1>, vector<1x512xf32>
    %c0_i32_71 = arith.constant 0 : i32
    %236 = vector.broadcast %c0_i32_71 : i32 to vector<8x512xi32>
    %237 = arith.cmpi eq, %222, %236 : vector<8x512xi32>
    %238 = vector.shape_cast %235 : vector<1x512xf32> to vector<1x512xf32>
    %239 = vector.broadcast %238 : vector<1x512xf32> to vector<8x512xf32>
    %240 = arith.select %237, %239, %229 : vector<8x512xi1>, vector<8x512xf32>
    %241 = vector.extract_strided_slice %229 {offsets = [1, 0], sizes = [1, 512], strides = [1, 1]} : vector<8x512xf32> to vector<1x512xf32>
    %242 = arith.subf %241, %235 : vector<1x512xf32>
    %243 = math.absf %242 : vector<1x512xf32>
    %cst_72 = arith.constant 1.000000e-01 : f32
    %244 = vector.broadcast %cst_72 : f32 to vector<1x512xf32>
    %245 = arith.cmpf oge, %243, %244 : vector<1x512xf32>
    %246 = arith.select %245, %241, %235 : vector<1x512xi1>, vector<1x512xf32>
    %c1_i32_73 = arith.constant 1 : i32
    %247 = vector.broadcast %c1_i32_73 : i32 to vector<8x512xi32>
    %248 = arith.cmpi eq, %222, %247 : vector<8x512xi32>
    %249 = vector.shape_cast %246 : vector<1x512xf32> to vector<1x512xf32>
    %250 = vector.broadcast %249 : vector<1x512xf32> to vector<8x512xf32>
    %251 = arith.select %248, %250, %240 : vector<8x512xi1>, vector<8x512xf32>
    %252 = vector.extract_strided_slice %229 {offsets = [2, 0], sizes = [1, 512], strides = [1, 1]} : vector<8x512xf32> to vector<1x512xf32>
    %253 = arith.subf %252, %246 : vector<1x512xf32>
    %254 = math.absf %253 : vector<1x512xf32>
    %cst_74 = arith.constant 1.000000e-01 : f32
    %255 = vector.broadcast %cst_74 : f32 to vector<1x512xf32>
    %256 = arith.cmpf oge, %254, %255 : vector<1x512xf32>
    %257 = arith.select %256, %252, %246 : vector<1x512xi1>, vector<1x512xf32>
    %c2_i32_75 = arith.constant 2 : i32
    %258 = vector.broadcast %c2_i32_75 : i32 to vector<8x512xi32>
    %259 = arith.cmpi eq, %222, %258 : vector<8x512xi32>
    %260 = vector.shape_cast %257 : vector<1x512xf32> to vector<1x512xf32>
    %261 = vector.broadcast %260 : vector<1x512xf32> to vector<8x512xf32>
    %262 = arith.select %259, %261, %251 : vector<8x512xi1>, vector<8x512xf32>
    %263 = vector.extract_strided_slice %229 {offsets = [3, 0], sizes = [1, 512], strides = [1, 1]} : vector<8x512xf32> to vector<1x512xf32>
    %264 = arith.subf %263, %257 : vector<1x512xf32>
    %265 = math.absf %264 : vector<1x512xf32>
    %cst_76 = arith.constant 1.000000e-01 : f32
    %266 = vector.broadcast %cst_76 : f32 to vector<1x512xf32>
    %267 = arith.cmpf oge, %265, %266 : vector<1x512xf32>
    %268 = arith.select %267, %263, %257 : vector<1x512xi1>, vector<1x512xf32>
    %c3_i32_77 = arith.constant 3 : i32
    %269 = vector.broadcast %c3_i32_77 : i32 to vector<8x512xi32>
    %270 = arith.cmpi eq, %222, %269 : vector<8x512xi32>
    %271 = vector.shape_cast %268 : vector<1x512xf32> to vector<1x512xf32>
    %272 = vector.broadcast %271 : vector<1x512xf32> to vector<8x512xf32>
    %273 = arith.select %270, %272, %262 : vector<8x512xi1>, vector<8x512xf32>
    %274 = vector.extract_strided_slice %229 {offsets = [4, 0], sizes = [1, 512], strides = [1, 1]} : vector<8x512xf32> to vector<1x512xf32>
    %275 = arith.subf %274, %268 : vector<1x512xf32>
    %276 = math.absf %275 : vector<1x512xf32>
    %cst_78 = arith.constant 1.000000e-01 : f32
    %277 = vector.broadcast %cst_78 : f32 to vector<1x512xf32>
    %278 = arith.cmpf oge, %276, %277 : vector<1x512xf32>
    %279 = arith.select %278, %274, %268 : vector<1x512xi1>, vector<1x512xf32>
    %c4_i32_79 = arith.constant 4 : i32
    %280 = vector.broadcast %c4_i32_79 : i32 to vector<8x512xi32>
    %281 = arith.cmpi eq, %222, %280 : vector<8x512xi32>
    %282 = vector.shape_cast %279 : vector<1x512xf32> to vector<1x512xf32>
    %283 = vector.broadcast %282 : vector<1x512xf32> to vector<8x512xf32>
    %284 = arith.select %281, %283, %273 : vector<8x512xi1>, vector<8x512xf32>
    %285 = vector.extract_strided_slice %229 {offsets = [5, 0], sizes = [1, 512], strides = [1, 1]} : vector<8x512xf32> to vector<1x512xf32>
    %286 = arith.subf %285, %279 : vector<1x512xf32>
    %287 = math.absf %286 : vector<1x512xf32>
    %cst_80 = arith.constant 1.000000e-01 : f32
    %288 = vector.broadcast %cst_80 : f32 to vector<1x512xf32>
    %289 = arith.cmpf oge, %287, %288 : vector<1x512xf32>
    %290 = arith.select %289, %285, %279 : vector<1x512xi1>, vector<1x512xf32>
    %c5_i32_81 = arith.constant 5 : i32
    %291 = vector.broadcast %c5_i32_81 : i32 to vector<8x512xi32>
    %292 = arith.cmpi eq, %222, %291 : vector<8x512xi32>
    %293 = vector.shape_cast %290 : vector<1x512xf32> to vector<1x512xf32>
    %294 = vector.broadcast %293 : vector<1x512xf32> to vector<8x512xf32>
    %295 = arith.select %292, %294, %284 : vector<8x512xi1>, vector<8x512xf32>
    %296 = vector.extract_strided_slice %229 {offsets = [6, 0], sizes = [1, 512], strides = [1, 1]} : vector<8x512xf32> to vector<1x512xf32>
    %297 = arith.subf %296, %290 : vector<1x512xf32>
    %298 = math.absf %297 : vector<1x512xf32>
    %cst_82 = arith.constant 1.000000e-01 : f32
    %299 = vector.broadcast %cst_82 : f32 to vector<1x512xf32>
    %300 = arith.cmpf oge, %298, %299 : vector<1x512xf32>
    %301 = arith.select %300, %296, %290 : vector<1x512xi1>, vector<1x512xf32>
    %c6_i32_83 = arith.constant 6 : i32
    %302 = vector.broadcast %c6_i32_83 : i32 to vector<8x512xi32>
    %303 = arith.cmpi eq, %222, %302 : vector<8x512xi32>
    %304 = vector.shape_cast %301 : vector<1x512xf32> to vector<1x512xf32>
    %305 = vector.broadcast %304 : vector<1x512xf32> to vector<8x512xf32>
    %306 = arith.select %303, %305, %295 : vector<8x512xi1>, vector<8x512xf32>
    %307 = vector.extract_strided_slice %229 {offsets = [7, 0], sizes = [1, 512], strides = [1, 1]} : vector<8x512xf32> to vector<1x512xf32>
    %308 = arith.subf %307, %301 : vector<1x512xf32>
    %309 = math.absf %308 : vector<1x512xf32>
    %cst_84 = arith.constant 1.000000e-01 : f32
    %310 = vector.broadcast %cst_84 : f32 to vector<1x512xf32>
    %311 = arith.cmpf oge, %309, %310 : vector<1x512xf32>
    %312 = arith.select %311, %307, %301 : vector<1x512xi1>, vector<1x512xf32>
    %c7_i32_85 = arith.constant 7 : i32
    %313 = vector.broadcast %c7_i32_85 : i32 to vector<8x512xi32>
    %314 = arith.cmpi eq, %222, %313 : vector<8x512xi32>
    %315 = vector.shape_cast %312 : vector<1x512xf32> to vector<1x512xf32>
    %316 = vector.broadcast %315 : vector<1x512xf32> to vector<8x512xf32>
    %317 = arith.select %314, %316, %306 : vector<8x512xi1>, vector<8x512xf32>
    %318 = arith.truncf %317 : vector<8x512xf32> to vector<8x512xbf16>
    %c0_i32_86 = arith.constant 0 : i32
    %319 = arith.addi %c0_i32_86, %225 : i32
    %320 = arith.index_cast %319 : i32 to index
    %c0_87 = arith.constant 0 : index
    %321 = vector.load %arg9[%320, %c0_87] : memref<8x512xbf16, #tpu.memory_space<vmem>>, vector<8x512xbf16>
    tpu.vector_store %arg9[%320, %c0_87], %318 {strides = array<i32>} : memref<8x512xbf16, #tpu.memory_space<vmem>>, vector<8x512xbf16>,
    %c1_i32_88 = arith.constant 1 : i32
    %c0_89 = arith.constant 0 : index
    %c0_90 = arith.constant 0 : index
    %322 = vector.load %arg14[%c0_89, %c0_90] : memref<1x512xf32, #tpu.memory_space<vmem>>, vector<1x512xf32>
    tpu.vector_store %arg14[%c0_89, %c0_90], %312 {strides = array<i32>} : memref<1x512xf32, #tpu.memory_space<vmem>>, vector<1x512xf32>,
    %c0_91 = arith.constant 0 : index
    %c0_92 = arith.constant 0 : index
    %323 = vector.load %arg9[%c0_91, %c0_92] : memref<8x512xbf16, #tpu.memory_space<vmem>>, vector<8x512xbf16>
    %c0_93 = arith.constant 0 : index
    %c0_94 = arith.constant 0 : index
    %324 = vector.load %arg5[%c0_93, %c0_94] : memref<512x384xbf16, #tpu.memory_space<vmem>>, vector<512x384xbf16>
    %cst_95 = arith.constant dense<0.000000e+00> : vector<8x384xf32>
    %325 = tpu.matmul %323, %324, %cst_95 {dimension_numbers = #tpu.dot_dimension_numbers<[1], [0], [0], [1], [0, 0, 1, 1], [], []>} : vector<8x512xbf16>, vector<512x384xbf16>, vector<8x384xf32> -> vector<8x384xf32>
    %c0_96 = arith.constant 0 : index
    %c0_97 = arith.constant 0 : index
    %326 = vector.load %arg15[%c0_96, %c0_97] : memref<3x384xf32, #tpu.memory_space<vmem>>, vector<3x384xf32>
    %327 = vector.extract_strided_slice %325 {offsets = [0, 0], sizes = [5, 384], strides = [1, 1]} : vector<8x384xf32> to vector<5x384xf32>
    %328 = tpu.concatenate %326, %327 in 0 : vector<3x384xf32>, vector<5x384xf32> -> vector<8x384xf32>
    %c0_98 = arith.constant 0 : index
    %c0_99 = arith.constant 0 : index
    %c0_100 = arith.constant 0 : index
    %329 = vector.load %arg2[%c0_98, %c0_99, %c0_100] : memref<1x8x384xf32, #tpu.memory_space<vmem>>, vector<1x8x384xf32>
    %330 = vector.shape_cast %329 : vector<1x8x384xf32> to vector<8x384xf32>
    %cst_101 = arith.constant 1.000000e+00 : f32
    %331 = vector.broadcast %cst_101 : f32 to vector<8x384xf32>
    %332 = arith.addf %328, %331 : vector<8x384xf32>
    %cst_102 = arith.constant 0.000000e+00 : f32
    %333 = vector.broadcast %cst_102 : f32 to vector<8x384xf32>
    %334 = arith.maximumf %332, %333 : vector<8x384xf32>
    %335 = arith.mulf %330, %334 : vector<8x384xf32>
    %c0_103 = arith.constant 0 : index
    %c0_104 = arith.constant 0 : index
    %c0_105 = arith.constant 0 : index
    %336 = vector.load %arg6[%c0_103, %c0_104, %c0_105] : memref<1x8x384xf32, #tpu.memory_space<vmem>>, vector<1x8x384xf32>
    %337 = vector.shape_cast %336 : vector<1x8x384xf32> to vector<8x384xf32>
    %338 = vector.shape_cast %335 : vector<8x384xf32> to vector<1x8x384xf32>
    tpu.vector_store %arg6[%c0_103, %c0_104, %c0_105], %338 {strides = array<i32>} : memref<1x8x384xf32, #tpu.memory_space<vmem>>, vector<1x8x384xf32>,
    %339 = vector.extract_strided_slice %325 {offsets = [5, 0], sizes = [3, 384], strides = [1, 1]} : vector<8x384xf32> to vector<3x384xf32>
    %c0_106 = arith.constant 0 : index
    %c0_107 = arith.constant 0 : index
    %340 = vector.load %arg15[%c0_106, %c0_107] : memref<3x384xf32, #tpu.memory_space<vmem>>, vector<3x384xf32>
    tpu.vector_store %arg15[%c0_106, %c0_107], %339 {strides = array<i32>} : memref<3x384xf32, #tpu.memory_space<vmem>>, vector<3x384xf32>,
    return
  }
  func.func @transform_0(%arg0: i32, %arg1: i32) -> (i32, i32, i32) {
    %c0_i32 = arith.constant 0 : i32
    %c0_i32_0 = arith.constant 0 : i32
    return %arg0, %arg1, %c0_i32 : i32, i32, i32
  }
  func.func @transform_1(%arg0: i32, %arg1: i32) -> (i32, i32) {
    %c0_i32 = arith.constant 0 : i32
    %c0_i32_0 = arith.constant 0 : i32
    %c0_i32_1 = arith.constant 0 : i32
    return %c0_i32, %c0_i32_0 : i32, i32
  }
  func.func @transform_2(%arg0: i32, %arg1: i32) -> (i32, i32) {
    %c0_i32 = arith.constant 0 : i32
    %c0_i32_0 = arith.constant 0 : i32
    %c0_i32_1 = arith.constant 0 : i32
    return %c0_i32, %c0_i32_0 : i32, i32
  }
  func.func @transform_3(%arg0: i32, %arg1: i32) -> (i32, i32) {
    %c0_i32 = arith.constant 0 : i32
    %c0_i32_0 = arith.constant 0 : i32
    %c0_i32_1 = arith.constant 0 : i32
    return %c0_i32, %c0_i32_0 : i32, i32
  }
  func.func @transform_4(%arg0: i32, %arg1: i32) -> (i32, i32, i32) {
    %c0_i32 = arith.constant 0 : i32
    %c0_i32_0 = arith.constant 0 : i32
    return %arg0, %arg1, %c0_i32 : i32, i32, i32
  }
}

</mosaic_0001>

<bundles_post_ra>
// kernel: network_forward.1
= control target key start
LH: loop header
LB: loop body
LE: loop exit
PB: predicated region body
PF: predicated region fallthrough
CT: control target
= control target key end

     0   :  { %s5565_s15 = smov 0   ;;  %s5567_s16 = smov 0   ;;  %s8410_s0 = inlined_call_operand.vmem [shape: f32[2,8,384], index: 0, kind: input, shape index: {}]   ;;  %s8411_s1 = inlined_call_operand.vmem [shape: bf16[384,512], index: 1, kind: input, shape index: {}]   ;;  %s8412_s2 = inlined_call_operand.vmem [shape: bf16[512,512], index: 2, kind: input, shape index: {}]   ;;  %s8413_s3 = inlined_call_operand.vmem [shape: bf16[512,384], index: 3, kind: input, shape index: {}]   ;;  %s8414_s4 = inlined_call_operand.vmem [shape: f32[2,8,384], index: 4, kind: output, shape index: {}]  }
   0x1   :  { %s5569_s17 = smov 0  }
   0x2 LB: > { %s26_s18 = sadd.s32 1, %s5533_s16  ;;  %p3855_p0 = scmp.ge.s32.totalorder %s5537_s17, 1  ;;  %s5537_s17 = sphi %s5569_s17, %s14_s17   ;;  %s5533_s16 = sphi %s5567_s16, %s8428_s16   ;;  %s5529_s15 = sphi %s5565_s15, %s8427_s15  }
   0x3   : > { %p28_p1 = scmp.ge.s32.totalorder %s26_s18, 2  ;;  %p182_p2 = scmp.lt.s32.totalorder %s5537_s17, 3 }
   0x5   : > { %s8430_s18 = smov (%p28_p1, %s26_s18), 0  ;;  %p183_p3 = pnand %p3855_p0, %p182_p2 }
   0x6   : > { %p216_p4 = scmp.lt.s32.totalorder (!%p183_p3), %s5529_s15, 1 }
   0x7   : > { %186 = sbr.rel (%p183_p3) target bundleno = 854 (0x356), region = 36 }
   0xc   : > { %v3975_v0 = vld [vmem:[%s8411_s1 + $0xe0] sm:$0xf]  ;;  %v5175_v1 = vld [vmem:[%s8411_s1 + $0xec] sm:$0xf0]  ;;  %v5173_v9 = vld [vmem:[%s8411_s1 + $0xe4] sm:$0xf] }
   0xd   : > { %v4103_v2 = vld [vmem:[%s8411_s1 + $0x1e0] sm:$0xf]  ;;  %v3976_v3 = vor.u32 %v5175_v1, %v3975_v0  ;;  %v5207_v4 = vld [vmem:[%s8411_s1 + $0x1ec] sm:$0xf0]  ;;  %v3977_v10 = vld [vmem:[%s8411_s1 + $0xf0] sm:$0xf0] }
   0xe   : > { %v4231_v5 = vld [vmem:[%s8411_s1 + $0x2e0] sm:$0xf]  ;;  %v5239_v6 = vld [vmem:[%s8411_s1 + $0x2ec] sm:$0xf0]  ;;  %v4104_v7 = vor.u32 %v5207_v4, %v4103_v2  ;;  %v3980_v12 = vor.u32 %v5173_v9, %v3977_v10  ;;  %v5169_v20 = vld [vmem:[%s8411_s1 + $0xc4] sm:$0xf] }
   0xf   : > { %v4232_v8 = vor.u32 %v5239_v6, %v4231_v5  ;;  %v3959_v11 = vld [vmem:[%s8411_s1 + $0xc0] sm:$0xf]  ;;  %1104 = vmatpush.bf16.msra.mxu0 %v3976_v3  ;;  %v5171_v13 = vld [vmem:[%s8411_s1 + $0xcc] sm:$0xf0]  ;;  %v3961_v22 = vld [vmem:[%s8411_s1 + $0xd0] sm:$0xf0] }
  0x10   : > { %v4087_v14 = vld [vmem:[%s8411_s1 + $0x1c0] sm:$0xf]  ;;  %v5203_v15 = vld [vmem:[%s8411_s1 + $0x1cc] sm:$0xf0]  ;;  %1117 = vmatpush.bf16.msra.mxu1 %v4104_v7  ;;  %v3960_v16 = vor.u32 %v5171_v13, %v3959_v11  ;;  %1143 = vmatpush.bf16.msra.mxu3 %v3980_v12  ;;  %v3964_v25 = vor.u32 %v5169_v20, %v3961_v22  ;;  %v5165_v31 = vld [vmem:[%s8411_s1 + $0xa4] sm:$0xf] }
  0x11   : > { %1130 = vmatpush.bf16.msra.mxu2 %v4232_v8  ;;  %v4088_v17 = vor.u32 %v5203_v15, %v4087_v14  ;;  %v4215_v18 = vld [vmem:[%s8411_s1 + $0x2c0] sm:$0xf]  ;;  %v5235_v19 = vld [vmem:[%s8411_s1 + $0x2cc] sm:$0xf0]  ;;  %v3945_v32 = vld [vmem:[%s8411_s1 + $0xb0] sm:$0xf0] }
  0x12   : > { %v4216_v21 = vor.u32 %v5235_v19, %v4215_v18  ;;  %v3943_v23 = vld [vmem:[%s8411_s1 + $0xa0] sm:$0xf]  ;;  %v5167_v24 = vld [vmem:[%s8411_s1 + $0xac] sm:$0xf0]  ;;  %v3948_v38 = vor.u32 %v5165_v31, %v3945_v32  ;;  %v5161_v42 = vld [vmem:[%s8411_s1 + $0x84] sm:$0xf] }
  0x13   : > { %v4071_v26 = vld [vmem:[%s8411_s1 + $0x1a0] sm:$0xf]  ;;  %v5199_v27 = vld [vmem:[%s8411_s1 + $0x1ac] sm:$0xf0]  ;;  %1105 = vmatpush.bf16.msra.mxu0 %v3960_v16  ;;  %v3944_v29 = vor.u32 %v5167_v24, %v3943_v23  ;;  %v3929_v43 = vld [vmem:[%s8411_s1 + $0x90] sm:$0xf0] }
  0x14   : > { %v4199_v28 = vld [vmem:[%s8411_s1 + $0x2a0] sm:$0xf]  ;;  %v5231_v30 = vld [vmem:[%s8411_s1 + $0x2ac] sm:$0xf0]  ;;  %1118 = vmatpush.bf16.msra.mxu1 %v4088_v17  ;;  %v4072_v33 = vor.u32 %v5199_v27, %v4071_v26  ;;  %1144 = vmatpush.bf16.msra.mxu3 %v3964_v25  ;;  %v3932_v50 = vor.u32 %v5161_v42, %v3929_v43  ;;  %v5157_v54 = vld [vmem:[%s8411_s1 + $0x64] sm:$0xf] }
  0x15   : > { %1131 = vmatpush.bf16.msra.mxu2 %v4216_v21  ;;  %v4200_v34 = vor.u32 %v5231_v30, %v4199_v28  ;;  %v3927_v35 = vld [vmem:[%s8411_s1 + $0x80] sm:$0xf]  ;;  %v5163_v36 = vld [vmem:[%s8411_s1 + $0x8c] sm:$0xf0]  ;;  %v3913_v55 = vld [vmem:[%s8411_s1 + $0x70] sm:$0xf0] }
  0x16   : > { %v4055_v37 = vld [vmem:[%s8411_s1 + $0x180] sm:$0xf]  ;;  %v5195_v39 = vld [vmem:[%s8411_s1 + $0x18c] sm:$0xf0]  ;;  %v3928_v44 = vor.u32 %v5163_v36, %v3927_v35  ;;  %v3916_v62 = vor.u32 %v5157_v54, %v3913_v55  ;;  %v5153_v2 = vld [vmem:[%s8411_s1 + $0x44] sm:$0xf] }
  0x17   : > { %v4183_v40 = vld [vmem:[%s8411_s1 + $0x280] sm:$0xf]  ;;  %v5227_v41 = vld [vmem:[%s8411_s1 + $0x28c] sm:$0xf0]  ;;  %1106 = vmatpush.bf16.msra.mxu0 %v3944_v29  ;;  %v4056_v45 = vor.u32 %v5195_v39, %v4055_v37  ;;  %v3897_v3 = vld [vmem:[%s8411_s1 + $0x50] sm:$0xf0] }
  0x18   : > { %1119 = vmatpush.bf16.msra.mxu1 %v4072_v33  ;;  %v4184_v46 = vor.u32 %v5227_v41, %v4183_v40  ;;  %v3911_v47 = vld [vmem:[%s8411_s1 + $0x60] sm:$0xf]  ;;  %v5159_v48 = vld [vmem:[%s8411_s1 + $0x6c] sm:$0xf0]  ;;  %1145 = vmatpush.bf16.msra.mxu3 %v3948_v38  ;;  %v3900_v10 = vor.u32 %v5153_v2, %v3897_v3  ;;  %v5149_v14 = vld [vmem:[%s8411_s1 + $0x24] sm:$0xf] }
  0x19   : > { %1132 = vmatpush.bf16.msra.mxu2 %v4200_v34  ;;  %v4039_v49 = vld [vmem:[%s8411_s1 + $0x160] sm:$0xf]  ;;  %v5191_v51 = vld [vmem:[%s8411_s1 + $0x16c] sm:$0xf0]  ;;  %v3912_v56 = vor.u32 %v5159_v48, %v3911_v47  ;;  %v3881_v15 = vld [vmem:[%s8411_s1 + $0x30] sm:$0xf0] }
  0x1a   : > { %v4167_v52 = vld [vmem:[%s8411_s1 + $0x260] sm:$0xf]  ;;  %v5223_v53 = vld [vmem:[%s8411_s1 + $0x26c] sm:$0xf0]  ;;  %v4040_v57 = vor.u32 %v5191_v51, %v4039_v49  ;;  %v3884_v24 = vor.u32 %v5149_v14, %v3881_v15  ;;  %v5145_v26 = vld [vmem:[%s8411_s1 + $0x4] sm:$0xf] }
  0x1b   : > { %1107 = vmatpush.bf16.msra.mxu0 %v3928_v44  ;;  %v4168_v58 = vor.u32 %v5223_v53, %v4167_v52  ;;  %v3895_v59 = vld [vmem:[%s8411_s1 + $0x40] sm:$0xf]  ;;  %v5155_v60 = vld [vmem:[%s8411_s1 + $0x4c] sm:$0xf0]  ;;  %v3865_v27 = vld [vmem:[%s8411_s1 + $0x10] sm:$0xf0] }
  0x1c   : > { %1120 = vmatpush.bf16.msra.mxu1 %v4056_v45  ;;  %v4023_v61 = vld [vmem:[%s8411_s1 + $0x140] sm:$0xf]  ;;  %1146 = vmatpush.bf16.msra.mxu3 %v3932_v50  ;;  %v5187_v63 = vld [vmem:[%s8411_s1 + $0x14c] sm:$0xf0]  ;;  %v3896_v4 = vor.u32 %v5155_v60, %v3895_v59  ;;  %v5205_v28 = vld [vmem:[%s8411_s1 + $0x1e4] sm:$0xf]  ;;  %v3868_v39 = vor.u32 %v5145_v26, %v3865_v27 }
  0x1d   : > { %1133 = vmatpush.bf16.msra.mxu2 %v4184_v46  ;;  %v4151_v0 = vld [vmem:[%s8411_s1 + $0x240] sm:$0xf]  ;;  %v5219_v1 = vld [vmem:[%s8411_s1 + $0x24c] sm:$0xf0]  ;;  %v4024_v5 = vor.u32 %v5187_v63, %v4023_v61  ;;  %v4105_v29 = vld [vmem:[%s8411_s1 + $0x1f0] sm:$0xf0] }
  0x1e   : > { %v4152_v6 = vor.u32 %v5219_v1, %v4151_v0  ;;  %v3879_v7 = vld [vmem:[%s8411_s1 + $0x20] sm:$0xf]  ;;  %v5151_v8 = vld [vmem:[%s8411_s1 + $0x2c] sm:$0xf0]  ;;  %v5237_v30 = vld [vmem:[%s8411_s1 + $0x2e4] sm:$0xf]  ;;  %v4108_v40 = vor.u32 %v5205_v28, %v4105_v29  ;;  %v238_v0 = vlaneseq }
  0x1f   : > { %1108 = vmatpush.bf16.msra.mxu0 %v3912_v56  ;;  %v4007_v9 = vld [vmem:[%s8411_s1 + $0x120] sm:$0xf]  ;;  %v5183_v11 = vld [vmem:[%s8411_s1 + $0x12c] sm:$0xf0]  ;;  %v3880_v16 = vor.u32 %v5151_v8, %v3879_v7  ;;  %v4233_v32 = vld [vmem:[%s8411_s1 + $0x2f0] sm:$0xf0] }
  0x20   : > { %1121 = vmatpush.bf16.msra.mxu1 %v4040_v57  ;;  %1147 = vmatpush.bf16.msra.mxu3 %v3916_v62  ;;  %v4135_v12 = vld [vmem:[%s8411_s1 + $0x220] sm:$0xf]  ;;  %v5215_v13 = vld [vmem:[%s8411_s1 + $0x22c] sm:$0xf0]  ;;  %v4008_v19 = vor.u32 %v5183_v11, %v4007_v9  ;;  %v3983_v33 = vld [vmem:[%s8411_s1 + $0xe8] sm:$0xf]  ;;  %v4236_v41 = vor.u32 %v5237_v30, %v4233_v32 }
  0x21   : > { %1134 = vmatpush.bf16.msra.mxu2 %v4168_v58  ;;  %v3863_v17 = vld [vmem:[%s8411_s1] sm:$0xf]  ;;  %v5147_v18 = vld [vmem:[%s8411_s1 + $0xc] sm:$0xf0]  ;;  %v4136_v20 = vor.u32 %v5215_v13, %v4135_v12  ;;  %v5176_v34 = vld [vmem:[%s8411_s1 + $0xf4] sm:$0xf0] }
  0x22   : > { %v3991_v21 = vld [vmem:[%s8411_s1 + $0x100] sm:$0xf]  ;;  %v5179_v22 = vld [vmem:[%s8411_s1 + $0x10c] sm:$0xf0]  ;;  %v3864_v31 = vor.u32 %v5147_v18, %v3863_v17  ;;  %v4111_v37 = vld [vmem:[%s8411_s1 + $0x1e8] sm:$0xf]  ;;  %v3984_v42 = vor.u32 %v5176_v34, %v3983_v33 }
  0x23   : > { %1109 = vmatpush.bf16.msra.mxu0 %v3896_v4  ;;  %v4119_v23 = vld [vmem:[%s8411_s1 + $0x200] sm:$0xf]  ;;  %v5211_v25 = vld [vmem:[%s8411_s1 + $0x20c] sm:$0xf0]  ;;  %v3992_v35 = vor.u32 %v5179_v22, %v3991_v21  ;;  %v5208_v38 = vld [vmem:[%s8411_s1 + $0x1f4] sm:$0xf0] }
  0x24   : > { %1122 = vmatpush.bf16.msra.mxu1 %v4024_v5  ;;  %1148 = vmatpush.bf16.msra.mxu3 %v3900_v10  ;;  %v4120_v36 = vor.u32 %v5211_v25, %v4119_v23  ;;  %v5201_v43 = vld [vmem:[%s8411_s1 + $0x1c4] sm:$0xf]  ;;  %v4089_v44 = vld [vmem:[%s8411_s1 + $0x1d0] sm:$0xf0]  ;;  %v4112_v46 = vor.u32 %v5208_v38, %v4111_v37  ;;  %v3967_v48 = vld [vmem:[%s8411_s1 + $0xc8] sm:$0xf] }
  0x25   : > { %1135 = vmatpush.bf16.msra.mxu2 %v4152_v6  ;;  %v5233_v45 = vld [vmem:[%s8411_s1 + $0x2c4] sm:$0xf]  ;;  %v4217_v47 = vld [vmem:[%s8411_s1 + $0x2d0] sm:$0xf0]  ;;  %v5172_v49 = vld [vmem:[%s8411_s1 + $0xd4] sm:$0xf0]  ;;  %v4092_v52 = vor.u32 %v5201_v43, %v4089_v44 }
  0x26   : > { %v4095_v50 = vld [vmem:[%s8411_s1 + $0x1c8] sm:$0xf]  ;;  %v5204_v51 = vld [vmem:[%s8411_s1 + $0x1d4] sm:$0xf0]  ;;  %v4220_v53 = vor.u32 %v5233_v45, %v4217_v47  ;;  %v3968_v54 = vor.u32 %v5172_v49, %v3967_v48  ;;  %v5197_v55 = vld [vmem:[%s8411_s1 + $0x1a4] sm:$0xf] }
  0x27   : > { %1110 = vmatpush.bf16.msra.mxu0 %v3880_v16  ;;  %v4073_v56 = vld [vmem:[%s8411_s1 + $0x1b0] sm:$0xf0]  ;;  %v5229_v57 = vld [vmem:[%s8411_s1 + $0x2a4] sm:$0xf]  ;;  %v4096_v58 = vor.u32 %v5204_v51, %v4095_v50  ;;  %v3951_v60 = vld [vmem:[%s8411_s1 + $0xa8] sm:$0xf] }
  0x28   : > { %1123 = vmatpush.bf16.msra.mxu1 %v4008_v19  ;;  %1149 = vmatpush.bf16.msra.mxu3 %v3884_v24  ;;  %v4201_v59 = vld [vmem:[%s8411_s1 + $0x2b0] sm:$0xf0]  ;;  %v5168_v61 = vld [vmem:[%s8411_s1 + $0xb4] sm:$0xf0]  ;;  %v4079_v62 = vld [vmem:[%s8411_s1 + $0x1a8] sm:$0xf]  ;;  %v4076_v1 = vor.u32 %v5197_v55, %v4073_v56 }
  0x29   : > { %1136 = vmatpush.bf16.msra.mxu2 %v4136_v20  ;;  %v5200_v63 = vld [vmem:[%s8411_s1 + $0x1b4] sm:$0xf0]  ;;  %v5193_v2 = vld [vmem:[%s8411_s1 + $0x184] sm:$0xf]  ;;  %v4057_v3 = vld [vmem:[%s8411_s1 + $0x190] sm:$0xf0]  ;;  %v4204_v4 = vor.u32 %v5229_v57, %v4201_v59  ;;  %v3952_v5 = vor.u32 %v5168_v61, %v3951_v60 }
  0x2a   : > { %v5225_v6 = vld [vmem:[%s8411_s1 + $0x284] sm:$0xf]  ;;  %v4185_v7 = vld [vmem:[%s8411_s1 + $0x290] sm:$0xf0]  ;;  %v3935_v8 = vld [vmem:[%s8411_s1 + $0x88] sm:$0xf]  ;;  %v4080_v9 = vor.u32 %v5200_v63, %v4079_v62  ;;  %v4060_v16 = vor.u32 %v5193_v2, %v4057_v3 }
  0x2b   : > { %1111 = vmatpush.bf16.msra.mxu0 %v3864_v31  ;;  %v5164_v10 = vld [vmem:[%s8411_s1 + $0x94] sm:$0xf0]  ;;  %v4063_v11 = vld [vmem:[%s8411_s1 + $0x188] sm:$0xf]  ;;  %v5189_v13 = vld [vmem:[%s8411_s1 + $0x164] sm:$0xf]  ;;  %v4188_v21 = vor.u32 %v5225_v6, %v4185_v7 }
  0x2c   : > { %1124 = vmatpush.bf16.msra.mxu1 %v3992_v35  ;;  %1150 = vmatpush.bf16.msra.mxu3 %v3868_v39  ;;  %v5196_v12 = vld [vmem:[%s8411_s1 + $0x194] sm:$0xf0]  ;;  %v4041_v14 = vld [vmem:[%s8411_s1 + $0x170] sm:$0xf0]  ;;  %vm5881_vm0 = vcmp.lt.s32.totalorder %v238_v0, 384  ;;  %v5539_v20 = vmov 0.0   ;;  %v3936_v22 = vor.u32 %v5164_v10, %v3935_v8 }
  0x2d   : > { %1137 = vmatpush.bf16.msra.mxu2 %v4120_v36  ;;  %v5221_v17 = vld [vmem:[%s8411_s1 + $0x264] sm:$0xf]  ;;  %v4169_v18 = vld [vmem:[%s8411_s1 + $0x270] sm:$0xf0]  ;;  %v3919_v19 = vld [vmem:[%s8411_s1 + $0x68] sm:$0xf]  ;;  %v4064_v24 = vor.u32 %v5196_v12, %v4063_v11  ;;  %v4044_v29 = vor.u32 %v5189_v13, %v4041_v14 }
  0x2e   : > { %242 = vst.msk [vmem:[#allocation7] sm:$0x7] %vm5881_vm0, %v5539_v20  ;;  %v5160_v23 = vld [vmem:[%s8411_s1 + $0x74] sm:$0xf0]  ;;  %s8432_s15 = smov (!%p216_p4, %s5529_s15), 1  ;;  %v4172_v33 = vor.u32 %v5221_v17, %v4169_v18 }
  0x2f   : > { %1156 = vmatpush.bf16.msrb.mxu0 %v4108_v40  ;;  %247 = vst [vmem:[#allocation10] sm:$0x77] %v5539_v20  ;;  %v4047_v25 = vld [vmem:[%s8411_s1 + $0x168] sm:$0xf]  ;;  %v5192_v26 = vld [vmem:[%s8411_s1 + $0x174] sm:$0xf0]  ;;  %v3920_v34 = vor.u32 %v5160_v23, %v3919_v19 }
  0x30   : > { %1169 = vmatpush.bf16.msrb.mxu1 %v4236_v41  ;;  %1195 = vmatpush.bf16.msrb.mxu3 %v4112_v46  ;;  %248 = vst [vmem:[#allocation10 + $0x8] sm:$0x7] %v5539_v20  ;;  %v5185_v27 = vld [vmem:[%s8411_s1 + $0x144] sm:$0xf]  ;;  %v4025_v28 = vld [vmem:[%s8411_s1 + $0x150] sm:$0xf0]  ;;  %v4048_v38 = vor.u32 %v5192_v26, %v4047_v25 }
  0x31   : > { %1182 = vmatpush.bf16.msrb.mxu2 %v3984_v42  ;;  %s5465_s7 = smul.u32 24, %s8432_s15  ;;  %v5217_v30 = vld [vmem:[%s8411_s1 + $0x244] sm:$0xf]  ;;  %v4153_v31 = vld [vmem:[%s8411_s1 + $0x250] sm:$0xf0]  ;;  %v4028_v48 = vor.u32 %v5185_v27, %v4025_v28 }
  0x32   : > { %v3903_v32 = vld [vmem:[%s8411_s1 + $0x48] sm:$0xf]  ;;  %v5156_v35 = vld [vmem:[%s8411_s1 + $0x54] sm:$0xf0]  ;;  %v5181_v39 = vld [vmem:[%s8411_s1 + $0x124] sm:$0xf] }
  0x33   : > { %1157 = vmatpush.bf16.msrb.mxu0 %v4092_v52  ;;  %v4031_v36 = vld [vmem:[%s8411_s1 + $0x148] sm:$0xf]  ;;  %v5188_v37 = vld [vmem:[%s8411_s1 + $0x154] sm:$0xf0]  ;;  %s5943_s26 = scalar_lea.vmem %s8410_s0, %s5465_s7  ;;  %v4009_v40 = vld [vmem:[%s8411_s1 + $0x130] sm:$0xf0]  ;;  %v4156_v52 = vor.u32 %v5217_v30, %v4153_v31  ;;  %s8392_s24 = scalar_lea.vmem %s8414_s4, %s5465_s7 }
  0x34   : > { %1170 = vmatpush.bf16.msrb.mxu1 %v4220_v53  ;;  %1196 = vmatpush.bf16.msrb.mxu3 %v4096_v58  ;;  %v5213_v41 = vld [vmem:[%s8411_s1 + $0x224] sm:$0xf]  ;;  %v256_v43 = vld [vmem:[%s5943_s26 + $0x8] sm:$0xff]  ;;  %v257_v44 = vld [vmem:[%s5943_s26 + $0x10] sm:$0xff]  ;;  %v3904_v53 = vor.u32 %v5156_v35, %v3903_v32  ;;  %v4032_v58 = vor.u32 %v5188_v37, %v4031_v36  ;;  %v4012_v60 = vor.u32 %v5181_v39, %v4009_v40 }
  0x35   : > { %1183 = vmatpush.bf16.msrb.mxu2 %v3968_v54  ;;  %v255_v42 = vld [vmem:[%s5943_s26] sm:$0xff]  ;;  %v4137_v45 = vld [vmem:[%s8411_s1 + $0x230] sm:$0xf0]  ;;  %v3859_v47 = vadd.f32 -0.2, %v256_v43 }
  0x36   : > { %v3858_v46 = vadd.f32 -0.2, %v255_v42  ;;  %v3887_v49 = vld [vmem:[%s8411_s1 + $0x28] sm:$0xf]  ;;  %v5152_v50 = vld [vmem:[%s8411_s1 + $0x34] sm:$0xf0]  ;;  %v4140_v61 = vor.u32 %v5213_v41, %v4137_v45 }
  0x37   : > { %1158 = vmatpush.bf16.msrb.mxu0 %v4076_v1  ;;  %v3860_v51 = vadd.f32 -0.2, %v257_v44  ;;  %v4015_v54 = vld [vmem:[%s8411_s1 + $0x128] sm:$0xf]  ;;  %v5184_v55 = vld [vmem:[%s8411_s1 + $0x134] sm:$0xf0]  ;;  %v3888_v62 = vor.u32 %v5152_v50, %v3887_v49 }
  0x38   : > { %1171 = vmatpush.bf16.msrb.mxu1 %v4204_v4  ;;  %1197 = vmatpush.bf16.msrb.mxu3 %v4080_v9  ;;  %v261_v56 = vmul.f32 64.0, %v3858_v46  ;;  %v262_v57 = vmul.f32 64.0, %v3859_v47  ;;  %v4016_v1 = vor.u32 %v5184_v55, %v4015_v54  ;;  %v251_v17 = vld [vmem:[#allocation7] sm:$0x7] }
  0x39   : > { %1184 = vmatpush.bf16.msrb.mxu2 %v3952_v5  ;;  %v263_v59 = vmul.f32 64.0, %v3860_v51  ;;  %v274_v25 = vperm.slane %v251_v17, 0  ;;  %v275_v28 = vperm.slane %v251_v17, 1  ;;  %v276_v30 = vperm.slane %v251_v17, 2 }
  0x3a   : > { %v5468_v63 = vcvt.f32.s32 %v261_v56  ;;  %v5466_v2 = vand.u32 2147483647, %v261_v56  ;;  %v5476_v3 = vcvt.f32.s32 %v262_v57  ;;  %v5471_v6 = vand.u32 2147483648, %v261_v56 }
  0x3b   : > { %1159 = vmatpush.bf16.msrb.mxu0 %v4060_v16  ;;  %v5484_v4 = vcvt.f32.s32 %v263_v59  ;;  %v5474_v7 = vand.u32 2147483647, %v262_v57  ;;  %v5482_v8 = vand.u32 2147483647, %v263_v59  ;;  %v5479_v10 = vand.u32 2147483648, %v262_v57 }
  0x3c   : > { %1172 = vmatpush.bf16.msrb.mxu1 %v4188_v21  ;;  %1198 = vmatpush.bf16.msrb.mxu3 %v4064_v24  ;;  %v5469_v5 = vcvt.s32.f32 %v5468_v63  ;;  %v5477_v9 = vcvt.s32.f32 %v5476_v3  ;;  %v5487_v12 = vand.u32 2147483648, %v263_v59  ;;  %vm5467_vm1 = vcmp.lt.f32.partialorder %v5466_v2, 8388608.0 }
  0x3d   : > { %1185 = vmatpush.bf16.msrb.mxu2 %v3936_v22  ;;  %v5485_v11 = vcvt.s32.f32 %v5484_v4  ;;  %vm5475_vm2 = vcmp.lt.f32.partialorder %v5474_v7, 8388608.0  ;;  %vm5483_vm3 = vcmp.lt.f32.partialorder %v5482_v8, 8388608.0 }
  0x3e   : > { %v5470_v13 = vand.u32 2147483647, %v5469_v5  ;;  %v5478_v14 = vand.u32 2147483647, %v5477_v9 }
  0x3f   : > { %1160 = vmatpush.bf16.msrb.mxu0 %v4044_v29  ;;  %v5486_v16 = vand.u32 2147483647, %v5485_v11 }
  0x40   : > { %1173 = vmatpush.bf16.msrb.mxu1 %v4172_v33  ;;  %1199 = vmatpush.bf16.msrb.mxu3 %v4048_v38  ;;  %v5472_v18 = vor.u32 %v5471_v6, %v5470_v13  ;;  %v5480_v19 = vor.u32 %v5479_v10, %v5478_v14 }
  0x41   : > { %1186 = vmatpush.bf16.msrb.mxu2 %v3920_v34  ;;  %v5488_v21 = vor.u32 %v5487_v12, %v5486_v16 }
  0x42   : > { %v5473_v22 = vsel %vm5467_vm1, %v5472_v18, %v261_v56  ;;  %v5481_v23 = vsel %vm5475_vm2, %v5480_v19, %v262_v57 }
  0x43   : > { %1161 = vmatpush.bf16.msrb.mxu0 %v4028_v48  ;;  %v267_v24 = vmul.f32 0.015625, %v5473_v22  ;;  %v5489_v26 = vsel %vm5483_vm3, %v5488_v21, %v263_v59  ;;  %v268_v27 = vmul.f32 0.015625, %v5481_v23  ;;  %v6041_v23 = vshrl.u32 %v238_v0, 7 }
  0x44   : > { %1174 = vmatpush.bf16.msrb.mxu1 %v4156_v52  ;;  %1200 = vmatpush.bf16.msrb.mxu3 %v4032_v58  ;;  %v269_v29 = vmul.f32 0.015625, %v5489_v26 }
  0x45   : > { %1187 = vmatpush.bf16.msrb.mxu2 %v3904_v53  ;;  %v5972_v31 = vmax.f32 %v267_v24, 0.0  ;;  %v5974_v32 = vmax.f32 %v268_v27, 0.0  ;;  %vm292_vm3 = vcmp.eq.s32.totalorder %v6041_v23, 0 }
  0x46   : > { %v5976_v33 = vmax.f32 %v269_v29, 0.0 }
  0x47   : > { %1162 = vmatpush.bf16.msrb.mxu0 %v4012_v60  ;;  %v280_v34 = vsub.f32 %v5972_v31, %v274_v25  ;;  %v281_v35 = vsub.f32 %v5974_v32, %v275_v28 }
  0x48   : > { %1175 = vmatpush.bf16.msrb.mxu1 %v4140_v61  ;;  %1201 = vmatpush.bf16.msrb.mxu3 %v4016_v1  ;;  %v282_v36 = vsub.f32 %v5976_v33, %v276_v30 }
  0x49   : > { %1188 = vmatpush.bf16.msrb.mxu2 %v3888_v62  ;;  %v283_v37 = vand.u32 2147483647, %v280_v34  ;;  %v284_v38 = vand.u32 2147483647, %v281_v35 }
  0x4a   : > { %v285_v39 = vand.u32 2147483647, %v282_v36 }
  0x4b   : > { %vm286_vm4 = vcmp.ge.f32.partialorder %v283_v37, 0.1  ;;  %vm287_vm5 = vcmp.ge.f32.partialorder %v284_v38, 0.1  ;;  %v5177_v37 = vld [vmem:[%s8411_s1 + $0x104] sm:$0xf] }
  0x4c   : > { %v5982_v40 = vsel %vm286_vm4, %v5972_v31, %v274_v25  ;;  %vm288_vm6 = vcmp.ge.f32.partialorder %v285_v39, 0.1  ;;  %v5985_v41 = vsel %vm287_vm5, %v5974_v32, %v275_v28  ;;  %vm320_vm4 = vcmp.eq.s32.totalorder %v6041_v23, 1 }
  0x4d   : > { %v302_v42 = vrot.slane %v5982_v40, 7  ;;  %v303_v43 = vrot.slane %v5985_v41, 7  ;;  %v5990_v44 = vsel %vm288_vm6, %v5976_v33, %v276_v30  ;;  %v293_v27 = vperm.slane %v5982_v40, 0 }
  0x4e   : > { %v304_v46 = vrot.slane %v5990_v44, 7  ;;  %v294_v35 = vperm.slane %v5985_v41, 0  ;;  %vm348_vm6 = vcmp.eq.s32.totalorder %v6041_v23, 2  ;;  %v295_v39 = vperm.slane %v5990_v44, 0  ;;  %v3993_v41 = vld [vmem:[%s8411_s1 + $0x110] sm:$0xf0] }
  0x4f   : > { %v308_v45 = vsub.f32 %v5972_v31, %v302_v42  ;;  %v309_v47 = vsub.f32 %v5974_v32, %v303_v43  ;;  %v3999_v44 = vld [vmem:[%s8411_s1 + $0x108] sm:$0xf] }
  0x50   : > { %v310_v49 = vsub.f32 %v5976_v33, %v304_v46 }
  0x51   : > { %v311_v48 = vand.u32 2147483647, %v308_v45  ;;  %v312_v50 = vand.u32 2147483647, %v309_v47  ;;  %v5180_v47 = vld [vmem:[%s8411_s1 + $0x114] sm:$0xf0] }
  0x52   : > { %v313_v51 = vand.u32 2147483647, %v310_v49 }
  0x53   : > { %vm314_vm7 = vcmp.ge.f32.partialorder %v311_v48, 0.1  ;;  %vm315_vm8 = vcmp.ge.f32.partialorder %v312_v50, 0.1  ;;  %v3996_v50 = vor.u32 %v5177_v37, %v3993_v41 }
  0x54   : > { %v5997_v52 = vsel %vm314_vm7, %v5972_v31, %v302_v42  ;;  %v6000_v53 = vsel %vm315_vm8, %v5974_v32, %v303_v43  ;;  %vm316_vm9 = vcmp.ge.f32.partialorder %v313_v51, 0.1  ;;  %v296_v42 = vsel %vm292_vm3, %v293_v27, %v5972_v31 }
  0x55   : > { %v330_v54 = vrot.slane %v5997_v52, 7  ;;  %v331_v55 = vrot.slane %v6000_v53, 7  ;;  %v6006_v57 = vsel %vm316_vm9, %v5976_v33, %v304_v46  ;;  %v321_v43 = vperm.slane %v5997_v52, 1  ;;  %1163 = vmatpush.bf16.msrb.mxu0 %v3996_v50 }
  0x56   : > { %v332_v59 = vrot.slane %v6006_v57, 7  ;;  %vm376_vm7 = vcmp.eq.s32.totalorder %v6041_v23, 3  ;;  %v322_v48 = vperm.slane %v6000_v53, 1  ;;  %v4000_v51 = vor.u32 %v5180_v47, %v3999_v44 }
  0x57   : > { %v336_v56 = vsub.f32 %v5972_v31, %v330_v54  ;;  %v337_v58 = vsub.f32 %v5974_v32, %v331_v55  ;;  %v297_v52 = vsel %vm292_vm3, %v294_v35, %v5974_v32  ;;  %vm404_vm8 = vcmp.eq.s32.totalorder %v6041_v23, 4 }
  0x58   : > { %v338_v62 = vsub.f32 %v5976_v33, %v332_v59  ;;  %v298_v53 = vsel %vm292_vm3, %v295_v39, %v5976_v33  ;;  %1202 = vmatpush.bf16.msrb.mxu3 %v4000_v51 }
  0x59   : > { %v339_v60 = vand.u32 2147483647, %v336_v56  ;;  %v340_v61 = vand.u32 2147483647, %v337_v58 }
  0x5a   : > { %v341_v1 = vand.u32 2147483647, %v338_v62  ;;  %v5209_v62 = vld [vmem:[%s8411_s1 + $0x204] sm:$0xf] }
  0x5b   : > { %vm342_vm10 = vcmp.ge.f32.partialorder %v339_v60, 0.1  ;;  %vm343_vm11 = vcmp.ge.f32.partialorder %v340_v61, 0.1  ;;  %v324_v60 = vsel %vm320_vm4, %v321_v43, %v296_v42 }
  0x5c   : > { %v6012_v63 = vsel %vm342_vm10, %v5972_v31, %v330_v54  ;;  %v6015_v2 = vsel %vm343_vm11, %v5974_v32, %v331_v55  ;;  %vm344_vm12 = vcmp.ge.f32.partialorder %v341_v1, 0.1  ;;  %v323_v55 = vperm.slane %v6006_v57, 1 }
  0x5d   : > { %v358_v3 = vrot.slane %v6012_v63, 7  ;;  %v359_v4 = vrot.slane %v6015_v2, 7  ;;  %v6021_v6 = vsel %vm344_vm12, %v5976_v33, %v332_v59  ;;  %v349_v58 = vperm.slane %v6012_v63, 2 }
  0x5e   : > { %v360_v8 = vrot.slane %v6021_v6, 7  ;;  %v350_v59 = vperm.slane %v6015_v2, 2  ;;  %v325_v63 = vsel %vm320_vm4, %v322_v48, %v297_v52  ;;  %vm432_vm12 = vcmp.eq.s32.totalorder %v6041_v23, 5 }
  0x5f   : > { %v364_v5 = vsub.f32 %v5972_v31, %v358_v3  ;;  %v365_v7 = vsub.f32 %v5974_v32, %v359_v4 }
  0x60   : > { %v366_v11 = vsub.f32 %v5976_v33, %v360_v8 }
  0x61   : > { %v367_v9 = vand.u32 2147483647, %v364_v5  ;;  %v368_v10 = vand.u32 2147483647, %v365_v7  ;;  %v326_v7 = vsel %vm320_vm4, %v323_v55, %v298_v53 }
  0x62   : > { %v369_v13 = vand.u32 2147483647, %v366_v11 }
  0x63   : > { %vm370_vm13 = vcmp.ge.f32.partialorder %v367_v9, 0.1  ;;  %vm371_vm14 = vcmp.ge.f32.partialorder %v368_v10, 0.1  ;;  %v3871_v9 = vld [vmem:[%s8411_s1 + $0x8] sm:$0xf] }
  0x64   : > { %v6027_v12 = vsel %vm370_vm13, %v5972_v31, %v358_v3  ;;  %v6030_v14 = vsel %vm371_vm14, %v5974_v32, %v359_v4  ;;  %vm372_vm15 = vcmp.ge.f32.partialorder %v369_v13, 0.1  ;;  %v351_v3 = vperm.slane %v6021_v6, 2  ;;  %v4121_v4 = vld [vmem:[%s8411_s1 + $0x210] sm:$0xf0] }
  0x65   : > { %v386_v16 = vrot.slane %v6027_v12, 7  ;;  %v387_v17 = vrot.slane %v6030_v14, 7  ;;  %v6036_v19 = vsel %vm372_vm15, %v5976_v33, %v360_v8  ;;  %v4124_v8 = vor.u32 %v5209_v62, %v4121_v4 }
  0x66   : > { %v388_v22 = vrot.slane %v6036_v19, 7  ;;  %v377_v10 = vperm.slane %v6027_v12, 3  ;;  %v378_v11 = vperm.slane %v6030_v14, 3  ;;  %v379_v14 = vperm.slane %v6036_v19, 3 }
  0x67   : > { %v392_v18 = vsub.f32 %v5972_v31, %v386_v16  ;;  %v393_v21 = vsub.f32 %v5974_v32, %v387_v17  ;;  %1176 = vmatpush.bf16.msrb.mxu1 %v4124_v8  ;;  %v354_v27 = vsel %vm348_vm6, %v351_v3, %v326_v7 }
  0x68   : > { %v394_v26 = vsub.f32 %v5976_v33, %v388_v22  ;;  %v382_v42 = vsel %vm376_vm7, %v379_v14, %v354_v27  ;;  %v5236_v27 = vld [vmem:[%s8411_s1 + $0x2d4] sm:$0xf0] }
  0x69   : > { %v395_v24 = vand.u32 2147483647, %v392_v18  ;;  %v396_v25 = vand.u32 2147483647, %v393_v21  ;;  %v353_v18 = vsel %vm348_vm6, %v350_v59, %v325_v63 }
  0x6a   : > { %v397_v29 = vand.u32 2147483647, %v394_v26  ;;  %v381_v35 = vsel %vm376_vm7, %v378_v11, %v353_v18  ;;  %v5238_v11 = vld [vmem:[%s8411_s1 + $0x2ec] sm:$0xf] }
  0x6b   : > { %vm398_vm1 = vcmp.ge.f32.partialorder %v395_v24, 0.1  ;;  %vm399_vm2 = vcmp.ge.f32.partialorder %v396_v25, 0.1 }
  0x6c   : > { %v6046_v28 = vsel %vm398_vm1, %v5972_v31, %v386_v16  ;;  %v6051_v30 = vsel %vm399_vm2, %v5974_v32, %v387_v17  ;;  %vm400_vm5 = vcmp.ge.f32.partialorder %v397_v29, 0.1  ;;  %v5148_v16 = vld [vmem:[%s8411_s1 + $0x14] sm:$0xf0]  ;;  %v352_v17 = vsel %vm348_vm6, %v349_v58, %v324_v60 }
  0x6d   : > { %v414_v34 = vrot.slane %v6046_v28, 7  ;;  %v415_v36 = vrot.slane %v6051_v30, 7  ;;  %v6063_v40 = vsel %vm400_vm5, %v5976_v33, %v388_v22  ;;  %v3872_v24 = vor.u32 %v5148_v16, %v3871_v9  ;;  %v4241_v16 = vld [vmem:[%s8411_s1 + $0x2f8] sm:$0xf0] }
  0x6e   : > { %v416_v46 = vrot.slane %v6063_v40, 7  ;;  %v405_v25 = vperm.slane %v6046_v28, 4  ;;  %v407_v28 = vperm.slane %v6063_v40, 4  ;;  %vm460_vm1 = vcmp.eq.s32.totalorder %v6041_v23, 6 }
  0x6f   : > { %v420_v38 = vsub.f32 %v5972_v31, %v414_v34  ;;  %v421_v45 = vsub.f32 %v5974_v32, %v415_v36  ;;  %1189 = vmatpush.bf16.msrb.mxu2 %v3872_v24  ;;  %vm488_vm5 = vcmp.eq.s32.totalorder %v6041_v23, 7 }
  0x70   : > { %v422_v56 = vsub.f32 %v5976_v33, %v416_v46  ;;  %v410_v50 = vsel %vm404_vm8, %v407_v28, %v382_v42  ;;  %v5166_v42 = vld [vmem:[%s8411_s1 + $0xac] sm:$0xf] }
  0x71   : > { %v423_v49 = vand.u32 2147483647, %v420_v38  ;;  %v424_v54 = vand.u32 2147483647, %v421_v45 }
  0x72   : > { %v425_v61 = vand.u32 2147483647, %v422_v56 }
  0x73   : > { %vm426_vm9 = vcmp.ge.f32.partialorder %v423_v49, 0.1  ;;  %vm427_vm10 = vcmp.ge.f32.partialorder %v424_v54, 0.1 }
  0x74   : > { %v429_v57 = vsel %vm426_vm9, %v5972_v31, %v414_v34  ;;  %v430_v1 = vsel %vm427_vm10, %v5974_v32, %v415_v36  ;;  %vm428_vm11 = vcmp.ge.f32.partialorder %v425_v61, 0.1  ;;  %v380_v34 = vsel %vm376_vm7, %v377_v10, %v352_v17  ;;  %v5240_v10 = vld [vmem:[%s8411_s1 + $0x2f4] sm:$0xf0] }
  0x75   : > { %v442_v2 = vrot.slane %v429_v57, 7  ;;  %v443_v5 = vrot.slane %v430_v1, 7  ;;  %v431_v13 = vsel %vm428_vm11, %v5976_v33, %v416_v46  ;;  %v406_v36 = vperm.slane %v6051_v30, 4 }
  0x76   : > { %v444_v22 = vrot.slane %v431_v13, 7  ;;  %v433_v38 = vperm.slane %v429_v57, 5  ;;  %v408_v43 = vsel %vm404_vm8, %v405_v25, %v380_v34  ;;  %v434_v45 = vperm.slane %v430_v1, 5  ;;  %v5170_v34 = vld [vmem:[%s8411_s1 + $0xcc] sm:$0xf] }
  0x77   : > { %v448_v6 = vsub.f32 %v5972_v31, %v442_v2  ;;  %v449_v21 = vsub.f32 %v5974_v32, %v443_v5  ;;  %v409_v46 = vsel %vm404_vm8, %v406_v36, %v381_v35  ;;  %v435_v40 = vperm.slane %v431_v13, 5  ;;  %v3985_v13 = vld [vmem:[%s8411_s1 + $0xf8] sm:$0xf0] }
  0x78   : > { %v450_v29 = vsub.f32 %v5976_v33, %v444_v22  ;;  %v436_v52 = vsel %vm432_vm12, %v433_v38, %v408_v43  ;;  %v437_v56 = vsel %vm432_vm12, %v434_v45, %v409_v46  ;;  %v3969_v35 = vld [vmem:[%s8411_s1 + $0xd8] sm:$0xf0]  ;;  %v4207_v38 = vld [vmem:[%s8411_s1 + $0x2a8] sm:$0xf]  ;;  %vm6383_vm11 = vcmp.lt.s32.totalorder %v238_v0, 512 }
  0x79   : > { %v451_v12 = vand.u32 2147483647, %v448_v6  ;;  %v452_v26 = vand.u32 2147483647, %v449_v21  ;;  %v438_v53 = vsel %vm432_vm12, %v435_v40, %v410_v50  ;;  %v5174_v6 = vld [vmem:[%s8411_s1 + $0xec] sm:$0xf]  ;;  %v3972_v28 = vor.u32 %v5170_v34, %v3969_v35 }
  0x7a   : > { %v453_v37 = vand.u32 2147483647, %v450_v29  ;;  %v3988_v25 = vor.u32 %v5174_v6, %v3985_v13  ;;  %v5234_v29 = vld [vmem:[%s8411_s1 + $0x2cc] sm:$0xf]  ;;  %v4225_v36 = vld [vmem:[%s8411_s1 + $0x2d8] sm:$0xf0] }
  0x7b   : > { %vm454_vm13 = vcmp.ge.f32.partialorder %v451_v12, 0.1  ;;  %vm455_vm14 = vcmp.ge.f32.partialorder %v452_v26, 0.1  ;;  %v4223_v12 = vld [vmem:[%s8411_s1 + $0x2c8] sm:$0xf]  ;;  %v4244_v26 = vor.u32 %v5238_v11, %v4241_v16 }
  0x7c   : > { %v457_v19 = vsel %vm454_vm13, %v5972_v31, %v442_v2  ;;  %v458_v39 = vsel %vm455_vm14, %v5974_v32, %v443_v5  ;;  %vm456_vm15 = vcmp.ge.f32.partialorder %v453_v37, 0.1  ;;  %v4228_v37 = vor.u32 %v5234_v29, %v4225_v36  ;;  %v3953_v43 = vld [vmem:[%s8411_s1 + $0xb8] sm:$0xf0]  ;;  %v5228_v50 = vld [vmem:[%s8411_s1 + $0x294] sm:$0xf0] }
  0x7d   : > { %v470_v41 = vrot.slane %v457_v19, 7  ;;  %v471_v30 = vrot.slane %v458_v39, 7  ;;  %v459_v47 = vsel %vm456_vm15, %v5976_v33, %v444_v22  ;;  %v461_v48 = vperm.slane %v457_v19, 6  ;;  %v4113_v45 = vld [vmem:[%s8411_s1 + $0x1f8] sm:$0xf0] }
  0x7e   : > { %v472_v51 = vrot.slane %v459_v47, 7  ;;  %v462_v54 = vperm.slane %v458_v39, 6  ;;  %v463_v60 = vperm.slane %v459_v47, 6  ;;  %v4224_v19 = vor.u32 %v5236_v27, %v4223_v12  ;;  %v5232_v39 = vld [vmem:[%s8411_s1 + $0x2b4] sm:$0xf0] }
  0x7f   : > { %v476_v44 = vsub.f32 %v5972_v31, %v470_v41  ;;  %v477_v49 = vsub.f32 %v5974_v32, %v471_v30  ;;  %v464_v57 = vsel %vm460_vm1, %v461_v48, %v436_v52  ;;  %v4209_v46 = vld [vmem:[%s8411_s1 + $0x2b8] sm:$0xf0]  ;;  %v4208_v40 = vor.u32 %v5232_v39, %v4207_v38  ;;  %v5202_v52 = vld [vmem:[%s8411_s1 + $0x1cc] sm:$0xf]  ;;  %v5220_v11 = vld [vmem:[%s8411_s1 + $0x254] sm:$0xf0] }
  0x80   : > { %v478_v59 = vsub.f32 %v5976_v33, %v472_v51  ;;  %v465_v63 = vsel %vm460_vm1, %v462_v54, %v437_v56  ;;  %v466_v5 = vsel %vm460_vm1, %v463_v60, %v438_v53  ;;  %v3956_v48 = vor.u32 %v5166_v42, %v3953_v43  ;;  %v3937_v56 = vld [vmem:[%s8411_s1 + $0x98] sm:$0xf0]  ;;  %v5226_v53 = vld [vmem:[%s8411_s1 + $0x28c] sm:$0xf]  ;;  %v5216_v27 = vld [vmem:[%s8411_s1 + $0x234] sm:$0xf0] }
  0x81   : > { %v479_v55 = vand.u32 2147483647, %v476_v44  ;;  %v480_v58 = vand.u32 2147483647, %v477_v49  ;;  %v4191_v49 = vld [vmem:[%s8411_s1 + $0x288] sm:$0xf] }
  0x82   : > { %v481_v62 = vand.u32 2147483647, %v478_v59  ;;  %v4097_v59 = vld [vmem:[%s8411_s1 + $0x1d8] sm:$0xf0]  ;;  %v5194_v6 = vld [vmem:[%s8411_s1 + $0x18c] sm:$0xf] }
  0x83   : > { %vm482_vm2 = vcmp.ge.f32.partialorder %v479_v55, 0.1  ;;  %vm483_vm9 = vcmp.ge.f32.partialorder %v480_v58, 0.1  ;;  %v5162_v55 = vld [vmem:[%s8411_s1 + $0x8c] sm:$0xf] }
  0x84   : > { %v485_v61 = vsel %vm482_vm2, %v5972_v31, %v470_v41  ;;  %v486_v1 = vsel %vm483_vm9, %v5974_v32, %v471_v30  ;;  %vm484_vm10 = vcmp.ge.f32.partialorder %v481_v62, 0.1  ;;  %v4239_v32 = vld [vmem:[%s8411_s1 + $0x2e8] sm:$0xf]  ;;  %v5206_v41 = vld [vmem:[%s8411_s1 + $0x1ec] sm:$0xf] }
  0x85   : > { %v489_v2 = vperm.slane %v485_v61, 7  ;;  %504 = vst [vmem:[#allocation1] sm:$0xff] %v485_v61  ;;  %v490_v3 = vperm.slane %v486_v1, 7  ;;  %v487_v7 = vsel %vm484_vm10, %v5976_v33, %v472_v51  ;;  %v4240_v22 = vor.u32 %v5240_v10, %v4239_v32  ;;  %v5230_v30 = vld [vmem:[%s8411_s1 + $0x2ac] sm:$0xf] }
  0x86   : > { %505 = vst [vmem:[#allocation1 + $0x9] sm:$0xff] %v486_v1  ;;  %v491_v8 = vperm.slane %v487_v7, 7  ;;  %v4116_v51 = vor.u32 %v5206_v41, %v4113_v45  ;;  %v4212_v54 = vor.u32 %v5230_v30, %v4209_v46  ;;  %v4193_v60 = vld [vmem:[%s8411_s1 + $0x298] sm:$0xf0]  ;;  %v3940_v61 = vor.u32 %v5162_v55, %v3937_v56  ;;  %v4175_v62 = vld [vmem:[%s8411_s1 + $0x268] sm:$0xf] }
  0x87   : > { %v492_v4 = vsel %vm488_vm5, %v489_v2, %v464_v57  ;;  %v493_v31 = vsel %vm488_vm5, %v490_v3, %v465_v63  ;;  %506 = vst [vmem:[#allocation1 + $0x12] sm:$0xff] %v487_v7  ;;  %v4192_v57 = vor.u32 %v5228_v50, %v4191_v49  ;;  %v5224_v63 = vld [vmem:[%s8411_s1 + $0x274] sm:$0xf0]  ;;  %v4100_v1 = vor.u32 %v5202_v52, %v4097_v59  ;;  %v5198_v2 = vld [vmem:[%s8411_s1 + $0x1ac] sm:$0xf] }
  0x88   : > { %v495_v9 = vpack.c.bf16 %v493_v31, %v492_v4  ;;  %v494_v33 = vsel %vm488_vm5, %v491_v8, %v466_v5  ;;  %v4196_v3 = vor.u32 %v5226_v53, %v4193_v60  ;;  %v5158_v4 = vld [vmem:[%s8411_s1 + $0x6c] sm:$0xf]  ;;  %v3921_v5 = vld [vmem:[%s8411_s1 + $0x78] sm:$0xf0]  ;;  %v4159_v10 = vld [vmem:[%s8411_s1 + $0x248] sm:$0xf] }
  0x89   : > { %v496_v21 = vpack.c.bf16 %v494_v33, %v494_v33  ;;  %v4081_v7 = vld [vmem:[%s8411_s1 + $0x1b8] sm:$0xf0]  ;;  %v5222_v31 = vld [vmem:[%s8411_s1 + $0x26c] sm:$0xf]  ;;  %v3924_v32 = vor.u32 %v5158_v4, %v3921_v5  ;;  %v4160_v12 = vor.u32 %v5220_v11, %v4159_v10  ;;  %v4127_v42 = vld [vmem:[%s8411_s1 + $0x208] sm:$0xf] }
  0x8a   : > { %v615_v17 = vunpack.c.l.b16 %v495_v9  ;;  %v616_v18 = vunpack.c.h.b16 %v495_v9  ;;  %v4177_v8 = vld [vmem:[%s8411_s1 + $0x278] sm:$0xf0]  ;;  %v4176_v9 = vor.u32 %v5224_v63, %v4175_v62  ;;  %v4084_v33 = vor.u32 %v5198_v2, %v4081_v7  ;;  %v5154_v16 = vld [vmem:[%s8411_s1 + $0x4c] sm:$0xf]  ;;  %v5212_v43 = vld [vmem:[%s8411_s1 + $0x214] sm:$0xf0] }
  0x8b   : > { %500 = vst [vmem:[#allocation2 + $0x8] sm:$0xf] %v496_v21  ;;  %v4180_v13 = vor.u32 %v5222_v31, %v4177_v8  ;;  %v5218_v21 = vld [vmem:[%s8411_s1 + $0x24c] sm:$0xf]  ;;  %v4145_v38 = vld [vmem:[%s8411_s1 + $0x238] sm:$0xf0]  ;;  %v4128_v50 = vor.u32 %v5212_v43, %v4127_v42 }
  0x8c   : > { %v6193_v14 = vpack.c.b16 %v615_v17, %v615_v17  ;;  %v6195_v24 = vpack.c.b16 %v616_v18, %v616_v18  ;;  %v3905_v17 = vld [vmem:[%s8411_s1 + $0x58] sm:$0xf0]  ;;  %v5190_v34 = vld [vmem:[%s8411_s1 + $0x16c] sm:$0xf]  ;;  %245 = vst.msk [vmem:[#allocation8] sm:$0xf] %vm6383_vm11, %v5539_v20 }
  0x8d   : > { %v4065_v18 = vld [vmem:[%s8411_s1 + $0x198] sm:$0xf0]  ;;  %v5150_v36 = vld [vmem:[%s8411_s1 + $0x2c] sm:$0xf]  ;;  %246 = vst.msk [vmem:[#allocation9] sm:$0xf] %vm6383_vm11, %v5539_v20 }
  0x8e   : > { %1112 = vmatmul.bf16.vlgmr.msra.gmra.mxu0 %v6193_v14  ;;  %1125 = vmatmul.bf16.vlgmr.msra.gmra.mxu1 %v6195_v24  ;;  %v4068_v29 = vor.u32 %v5194_v6, %v4065_v18  ;;  %v5186_v30 = vld [vmem:[%s8411_s1 + $0x14c] sm:$0xf]  ;;  %v4129_v49 = vld [vmem:[%s8411_s1 + $0x218] sm:$0xf0]  ;;  %v5271_v0 = vld [vmem:[%s8412_s2 + $0xec] sm:$0xf0] }
  0x8f   : > { %1151 = vmatmul.bf16.vlgmr.msra.gmra.mxu3 %v6193_v14  ;;  %1208 = vmatpush.bf16.msra.mxu0 %v4240_v22  ;;  %v4161_v22 = vld [vmem:[%s8411_s1 + $0x258] sm:$0xf0]  ;;  %v5182_v55 = vld [vmem:[%s8411_s1 + $0x12c] sm:$0xf]  ;;  %v4487_v62 = vld [vmem:[%s8412_s2 + $0x1e0] sm:$0xf] }
  0x90   : > { %1221 = vmatpush.bf16.msra.mxu1 %v3988_v25  ;;  %1247 = vmatpush.bf16.msra.mxu3 %v4244_v26  ;;  %v3908_v25 = vor.u32 %v5154_v16, %v3905_v17  ;;  %v4143_v26 = vld [vmem:[%s8411_s1 + $0x228] sm:$0xf]  ;;  %v4164_v35 = vor.u32 %v5218_v21, %v4161_v22  ;;  %v4017_v56 = vld [vmem:[%s8411_s1 + $0x138] sm:$0xf0]  ;;  %v5178_v53 = vld [vmem:[%s8411_s1 + $0x10c] sm:$0xf] }
  0x91   : > { %v4144_v39 = vor.u32 %v5216_v27, %v4143_v26  ;;  %v4020_v59 = vor.u32 %v5182_v55, %v4017_v56  ;;  %v4001_v60 = vld [vmem:[%s8411_s1 + $0x118] sm:$0xf0]  ;;  %v5303_v20 = vld [vmem:[%s8412_s2 + $0x1ec] sm:$0xf0]  ;;  %v4471_v5 = vld [vmem:[%s8412_s2 + $0x1c0] sm:$0xf] }
  0x92   : > { %v516_v44 = vld [vmem:[#allocation2 + $0x8] sm:$0xf]  ;;  %v4327_v10 = vld [vmem:[%s8412_s2 + $0xa0] sm:$0xf] }
  0x93   : > { %1209 = vmatpush.bf16.msra.mxu0 %v4224_v19  ;;  %v617_v47 = vunpack.c.l.b16 %v516_v44  ;;  %v3889_v19 = vld [vmem:[%s8411_s1 + $0x38] sm:$0xf0]  ;;  %v5146_v44 = vld [vmem:[%s8411_s1 + $0xc] sm:$0xf]  ;;  %v5267_v4 = vld [vmem:[%s8412_s2 + $0xcc] sm:$0xf0] }
  0x94   : > { %1222 = vmatpush.bf16.msra.mxu1 %v3972_v28  ;;  %1248 = vmatpush.bf16.msra.mxu3 %v4228_v37  ;;  %v4049_v28 = vld [vmem:[%s8411_s1 + $0x178] sm:$0xf0]  ;;  %v5214_v37 = vld [vmem:[%s8411_s1 + $0x22c] sm:$0xf]  ;;  %v3892_v41 = vor.u32 %v5150_v36, %v3889_v19  ;;  %v5263_v11 = vld [vmem:[%s8412_s2 + $0xac] sm:$0xf0] }
  0x95   : > { %v6254_v58 = vpack.c.b16 %v617_v47, %v617_v47  ;;  %v4052_v45 = vor.u32 %v5190_v34, %v4049_v28  ;;  %v4148_v46 = vor.u32 %v5214_v37, %v4145_v38  ;;  %v4033_v47 = vld [vmem:[%s8411_s1 + $0x158] sm:$0xf0]  ;;  %v4328_v6 = vor.u32 %v5263_v11, %v4327_v10  ;;  %v4311_v18 = vld [vmem:[%s8412_s2 + $0x80] sm:$0xf]  ;;  %v5259_v21 = vld [vmem:[%s8412_s2 + $0x8c] sm:$0xf0] }
  0x96   : > { %v4036_v52 = vor.u32 %v5186_v30, %v4033_v47  ;;  %v4439_v22 = vld [vmem:[%s8412_s2 + $0x180] sm:$0xf]  ;;  %v4312_v26 = vor.u32 %v5259_v21, %v4311_v18  ;;  %v5291_v27 = vld [vmem:[%s8412_s2 + $0x18c] sm:$0xf0]  ;;  %v4489_v10 = vld [vmem:[%s8412_s2 + $0x1f0] sm:$0xf0] }
  0x97   : > { %1210 = vmatpush.bf16.msra.mxu0 %v4208_v40  ;;  %1138 = vmatmul.bf16.vlgmr.msra.gmra.mxu2 %v6254_v58  ;;  %v3873_v40 = vld [vmem:[%s8411_s1 + $0x18] sm:$0xf0]  ;;  %v4440_v34 = vor.u32 %v5291_v27, %v4439_v22  ;;  %v5255_v36 = vld [vmem:[%s8412_s2 + $0x6c] sm:$0xf0]  ;;  %v4423_v28 = vld [vmem:[%s8412_s2 + $0x160] sm:$0xf] }
  0x98   : > { %1223 = vmatpush.bf16.msra.mxu1 %v3956_v48  ;;  %1234 = vmatpush.bf16.msra.mxu2 %v4116_v51  ;;  %v5210_v48 = vld [vmem:[%s8411_s1 + $0x20c] sm:$0xf]  ;;  %v3876_v51 = vor.u32 %v5146_v44, %v3873_v40  ;;  %v5287_v37 = vld [vmem:[%s8412_s2 + $0x16c] sm:$0xf0]  ;;  %v4407_v43 = vld [vmem:[%s8412_s2 + $0x140] sm:$0xf] }
  0x99   : > { %1249 = vmatpush.bf16.msra.mxu3 %v4212_v54  ;;  %v4132_v54 = vor.u32 %v5210_v48, %v4129_v49  ;;  %v4424_v38 = vor.u32 %v5287_v37, %v4423_v28  ;;  %v5251_v42 = vld [vmem:[%s8412_s2 + $0x4c] sm:$0xf0]  ;;  %v4615_v40 = vld [vmem:[%s8412_s2 + $0x2e0] sm:$0xf]  ;;  %v5265_v27 = vld [vmem:[%s8412_s2 + $0xc4] sm:$0xf] }
  0x9a   : > { %v5283_v44 = vld [vmem:[%s8412_s2 + $0x14c] sm:$0xf0]  ;;  %v5297_v28 = vld [vmem:[%s8412_s2 + $0x1c4] sm:$0xf]  ;;  %v4473_v37 = vld [vmem:[%s8412_s2 + $0x1d0] sm:$0xf0] }
  0x9b   : > { %1211 = vmatpush.bf16.msra.mxu0 %v4192_v57  ;;  %v4004_v57 = vor.u32 %v5178_v53, %v4001_v60  ;;  %v5335_v47 = vld [vmem:[%s8412_s2 + $0x2ec] sm:$0xf0]  ;;  %v4408_v49 = vor.u32 %v5283_v44, %v4407_v43  ;;  %v4695_v43 = vld [vmem:[%s8412_s2 + $0x380] sm:$0xf]  ;;  %v4476_v44 = vor.u32 %v5297_v28, %v4473_v37  ;;  %v4281_v28 = vld [vmem:[%s8412_s2 + $0x50] sm:$0xf0] }
  0x9c   : > { %1224 = vmatpush.bf16.msra.mxu1 %v3940_v61  ;;  %1235 = vmatpush.bf16.msra.mxu2 %v4100_v1  ;;  %v4488_v1 = vor.u32 %v5303_v20, %v4487_v62  ;;  %v5247_v56 = vld [vmem:[%s8412_s2 + $0x2c] sm:$0xf0]  ;;  %v4727_v62 = vld [vmem:[%s8412_s2 + $0x3c0] sm:$0xf] }
  0x9d   : > { %1250 = vmatpush.bf16.msra.mxu3 %v4196_v3  ;;  %v4343_v3 = vld [vmem:[%s8412_s2 + $0xc0] sm:$0xf]  ;;  %v5279_v53 = vld [vmem:[%s8412_s2 + $0x12c] sm:$0xf0] }
  0x9e   : > { %1164 = vmatmul.bf16.vlgmr.msrb.gmra.mxu0 %v6195_v24  ;;  %1177 = vmatmul.bf16.vlgmr.msrb.gmra.mxu1 %v6254_v58  ;;  %v4344_v8 = vor.u32 %v5267_v4, %v4343_v3  ;;  %v5363_v20 = vld [vmem:[%s8412_s2 + $0x3cc] sm:$0xf0]  ;;  %v5115_v61 = vld [vmem:[%s8413_s3 + $0x2c0] sm:$0xf] }
  0x9f   : > { %1203 = vmatmul.bf16.vlgmr.msrb.gmra.mxu3 %v6195_v24  ;;  %1212 = vmatpush.bf16.msra.mxu0 %v4176_v9  ;;  %v5299_v9 = vld [vmem:[%s8412_s2 + $0x1cc] sm:$0xf0]  ;;  %v4728_v4 = vor.u32 %v5363_v20, %v4727_v62  ;;  %v5289_v62 = vld [vmem:[%s8412_s2 + $0x184] sm:$0xf] }
  0xa0   : > { %1225 = vmatpush.bf16.msra.mxu1 %v3924_v32  ;;  %1236 = vmatpush.bf16.msra.mxu2 %v4084_v33  ;;  %v4472_v32 = vor.u32 %v5299_v9, %v4471_v5  ;;  %v4455_v33 = vld [vmem:[%s8412_s2 + $0x1a0] sm:$0xf]  ;;  %v5243_v3 = vld [vmem:[%s8412_s2 + $0xc] sm:$0xf0]  ;;  %v4361_v9 = vld [vmem:[%s8412_s2 + $0xf0] sm:$0xf0] }
  0xa1   : > { %1251 = vmatpush.bf16.msra.mxu3 %v4180_v13  ;;  %v5295_v13 = vld [vmem:[%s8412_s2 + $0x1ac] sm:$0xf0]  ;;  %v4375_v5 = vld [vmem:[%s8412_s2 + $0x100] sm:$0xf] }
  0xa2   : > { %v4456_v16 = vor.u32 %v5295_v13, %v4455_v33  ;;  %v4583_v13 = vld [vmem:[%s8412_s2 + $0x2a0] sm:$0xf] }
  0xa3   : > { %1213 = vmatpush.bf16.msra.mxu0 %v4160_v12 }
  0xa4   : > { %1226 = vmatpush.bf16.msra.mxu1 %v3908_v25  ;;  %1237 = vmatpush.bf16.msra.mxu2 %v4068_v29 }
  0xa5   : > { %1252 = vmatpush.bf16.msra.mxu3 %v4164_v35  ;;  %v4295_v35 = vld [vmem:[%s8412_s2 + $0x60] sm:$0xf] }
  0xa6   : > { %v4296_v19 = vor.u32 %v5255_v36, %v4295_v35 }
  0xa7   : > { %1214 = vmatpush.bf16.msra.mxu0 %v4144_v39  ;;  %1190 = vmatmul.bf16.vlgmr.msrb.gmra.mxu2 %v6193_v14 }
  0xa8   : > { %1227 = vmatpush.bf16.msra.mxu1 %v3892_v41  ;;  %1238 = vmatpush.bf16.msra.mxu2 %v4052_v45  ;;  %v4279_v41 = vld [vmem:[%s8412_s2 + $0x40] sm:$0xf] }
  0xa9   : > { %1253 = vmatpush.bf16.msra.mxu3 %v4148_v46  ;;  %v4280_v46 = vor.u32 %v5251_v42, %v4279_v41  ;;  %v5323_v42 = vld [vmem:[%s8412_s2 + $0x28c] sm:$0xf0] }
  0xab   : > { %1215 = vmatpush.bf16.msra.mxu0 %v4128_v50  ;;  %v4616_v50 = vor.u32 %v5335_v47, %v4615_v40  ;;  %v5261_v47 = vld [vmem:[%s8412_s2 + $0xa4] sm:$0xf] }
  0xac   : > { %1228 = vmatpush.bf16.msra.mxu1 %v3876_v51  ;;  %1239 = vmatpush.bf16.msra.mxu2 %v4036_v52  ;;  %v4743_v51 = vld [vmem:[%s8412_s2 + $0x3e0] sm:$0xf]  ;;  %v5367_v52 = vld [vmem:[%s8412_s2 + $0x3ec] sm:$0xf0] }
  0xad   : > { %1254 = vmatpush.bf16.msra.mxu3 %v4132_v54  ;;  %v4263_v54 = vld [vmem:[%s8412_s2 + $0x20] sm:$0xf]  ;;  %v4744_v55 = vor.u32 %v5367_v52, %v4743_v51 }
  0xae   : > { %1216 = vmatmul.bf16.vlgmr.msra.gmra.mxu0 %v6254_v58  ;;  %v4264_v60 = vor.u32 %v5247_v56, %v4263_v54  ;;  %v4679_v52 = vld [vmem:[%s8412_s2 + $0x360] sm:$0xf]  ;;  %v5351_v54 = vld [vmem:[%s8412_s2 + $0x36c] sm:$0xf0] }
  0xaf   : > { %1229 = vmatmul.bf16.vlgmr.msra.gmra.mxu1 %v6193_v14 }
  0xb0   : > { %1255 = vmatmul.bf16.vlgmr.msra.gmra.mxu3 %v6254_v58  ;;  %1240 = vmatpush.bf16.msra.mxu2 %v4020_v59  ;;  %v4391_v59 = vld [vmem:[%s8412_s2 + $0x120] sm:$0xf] }
  0xb1   : > { %2378 = vmatpush.bf16.msrb.mxu1 %v4488_v1  ;;  %2404 = vmatpush.bf16.msrb.mxu3 %v4744_v55  ;;  %v4247_v1 = vld [vmem:[%s8412_s2] sm:$0xf] }
  0xb4   : > { %1241 = vmatpush.bf16.msra.mxu2 %v4004_v57  ;;  %v4392_v57 = vor.u32 %v5279_v53, %v4391_v59 }
  0xb5   : > { %2379 = vmatpush.bf16.msrb.mxu1 %v4472_v32  ;;  %v5301_v32 = vld [vmem:[%s8412_s2 + $0x1e4] sm:$0xf]  ;;  %2405 = vmatpush.bf16.msrb.mxu3 %v4728_v4  ;;  %v4535_v4 = vld [vmem:[%s8412_s2 + $0x240] sm:$0xf] }
  0xb6   : > { %v4492_v21 = vor.u32 %v5301_v32, %v4489_v10 }
  0xb7   : > { %1242 = vmatmul.bf16.vlgmr.msra.gmra.mxu2 %v6195_v24  ;;  %v4359_v24 = vld [vmem:[%s8412_s2 + $0xe0] sm:$0xf] }
  0xb8   : > { %v4360_v63 = vor.u32 %v5271_v0, %v4359_v24  ;;  %2391 = vmatpush.bf16.msrb.mxu2 %v4616_v50  ;;  %v4599_v24 = vld [vmem:[%s8412_s2 + $0x2c0] sm:$0xf]  ;;  %v5331_v0 = vld [vmem:[%s8412_s2 + $0x2cc] sm:$0xf0] }
  0xb9   : > { %2380 = vmatpush.bf16.msrb.mxu1 %v4456_v16  ;;  %v5327_v16 = vld [vmem:[%s8412_s2 + $0x2ac] sm:$0xf0] }
  0xba   : > { %2365 = vmatpush.bf16.msrb.mxu0 %v4360_v63  ;;  %v4600_v63 = vor.u32 %v5331_v0, %v4599_v24  ;;  %v4584_v22 = vor.u32 %v5327_v16, %v4583_v13  ;;  %v5319_v50 = vld [vmem:[%s8412_s2 + $0x26c] sm:$0xf0]  ;;  %v5257_v0 = vld [vmem:[%s8412_s2 + $0x84] sm:$0xf] }
  0xbc   : > { %2392 = vmatpush.bf16.msrb.mxu2 %v4600_v63 }
  0xbd   : > { %2381 = vmatpush.bf16.msrb.mxu1 %v4440_v34  ;;  %v4345_v34 = vld [vmem:[%s8412_s2 + $0xd0] sm:$0xf0] }
  0xbe   : > { %2366 = vmatpush.bf16.msrb.mxu0 %v4344_v8  ;;  %v4248_v8 = vor.u32 %v5243_v3, %v4247_v1  ;;  %v4680_v1 = vor.u32 %v5351_v54, %v4679_v52  ;;  %v4441_v3 = vld [vmem:[%s8412_s2 + $0x190] sm:$0xf0]  ;;  %v5245_v52 = vld [vmem:[%s8412_s2 + $0x24] sm:$0xf] }
  0xbf   : > { %v4444_v13 = vor.u32 %v5289_v62, %v4441_v3  ;;  %v4265_v54 = vld [vmem:[%s8412_s2 + $0x30] sm:$0xf0] }
  0xc0   : > { %2393 = vmatpush.bf16.msrb.mxu2 %v4584_v22 }
  0xc1   : > { %2382 = vmatpush.bf16.msrb.mxu1 %v4424_v38  ;;  %v4567_v38 = vld [vmem:[%s8412_s2 + $0x280] sm:$0xf] }
  0xc2   : > { %2367 = vmatpush.bf16.msrb.mxu0 %v4328_v6  ;;  %v4568_v40 = vor.u32 %v5323_v42, %v4567_v38  ;;  %v5281_v38 = vld [vmem:[%s8412_s2 + $0x144] sm:$0xf]  ;;  %v4503_v42 = vld [vmem:[%s8412_s2 + $0x200] sm:$0xf] }
  0xc4   : > { %2394 = vmatpush.bf16.msrb.mxu2 %v4568_v40  ;;  %v4631_v40 = vld [vmem:[%s8412_s2 + $0x300] sm:$0xf] }
  0xc5   : > { %2383 = vmatpush.bf16.msrb.mxu1 %v4408_v49  ;;  %v4551_v49 = vld [vmem:[%s8412_s2 + $0x260] sm:$0xf] }
  0xc6   : > { %2368 = vmatpush.bf16.msrb.mxu0 %v4312_v26  ;;  %v5359_v26 = vld [vmem:[%s8412_s2 + $0x3ac] sm:$0xf0]  ;;  %v4552_v24 = vor.u32 %v5319_v50, %v4551_v49  ;;  %v4617_v49 = vld [vmem:[%s8412_s2 + $0x2f0] sm:$0xf0]  ;;  %v5365_v50 = vld [vmem:[%s8412_s2 + $0x3e4] sm:$0xf] }
  0xc8   : > { %2395 = vmatpush.bf16.msrb.mxu2 %v4552_v24  ;;  %v508_v24 = vld [vmem:[#allocation1 + $0x7] ss:$9 sm:$0xff] }
  0xc9   : > { %2384 = vmatpush.bf16.msrb.mxu1 %v4392_v57  ;;  %514 = vst.msk [vmem:[#allocation7] sm:$0x7] %vm5881_vm0, %v508_v24 }
  0xca   : > { %2369 = vmatpush.bf16.msrb.mxu0 %v4296_v19 }
  0xce   : > { %2370 = vmatpush.bf16.msrb.mxu0 %v4280_v46 }
  0xd2   : > { %2371 = vmatpush.bf16.msrb.mxu0 %v4264_v60 }
  0xd6   : > { %2372 = vmatpush.bf16.msrb.mxu0 %v4248_v8  ;;  %v5347_v8 = vld [vmem:[%s8412_s2 + $0x34c] sm:$0xf0] }
 0x10b   : > { %v6393_v14 = vpop.f32.mrf.mxu0  ;;  %v6395_v58 = vpop.f32.mrf.mxu1 }
 0x10c   : > { %v1127_v41 = vadd.f32 %v6395_v58, %v6393_v14  ;;  %v4348_v14 = vor.u32 %v5265_v27, %v4345_v34  ;;  %v6582_v58 = vld [vmem:[#allocation8] sm:$0xf]  ;;  %v5311_v27 = vld [vmem:[%s8412_s2 + $0x22c] sm:$0xf0]  ;;  %v4647_v34 = vld [vmem:[%s8412_s2 + $0x320] sm:$0xf] }
 0x10d   : > { %v1277_v53 = vperm.slane %v6582_v58, 0 }
 0x112   : > { %v6409_v2 = vpop.f32.mrf.mxu3 }
 0x113   : > { %v1115_v7 = vpop.f32.mrf.mxu0  ;;  %v1128_v31 = vpop.f32.mrf.mxu1 }
 0x114   : > { %v5275_v7 = vld [vmem:[%s8412_s2 + $0x10c] sm:$0xf0]  ;;  %v5269_v31 = vld [vmem:[%s8412_s2 + $0xe4] sm:$0xf] }
 0x115   : > { %v4376_v33 = vor.u32 %v5275_v7, %v4375_v5  ;;  %v4364_v6 = vor.u32 %v5269_v31, %v4361_v9  ;;  %v5315_v5 = vld [vmem:[%s8412_s2 + $0x24c] sm:$0xf0]  ;;  %v4663_v31 = vld [vmem:[%s8412_s2 + $0x340] sm:$0xf]  ;;  %v1278_v9 = vperm.slane %v6582_v58, 1 }
 0x116   : > { %v4536_v16 = vor.u32 %v5315_v5, %v4535_v4  ;;  %v4664_v22 = vor.u32 %v5347_v8, %v4663_v31  ;;  %v4601_v31 = vld [vmem:[%s8412_s2 + $0x2d0] sm:$0xf0]  ;;  %v5361_v8 = vld [vmem:[%s8412_s2 + $0x3c4] sm:$0xf] }
 0x117   : > { %2385 = vmatpush.bf16.msrb.mxu1 %v4376_v33  ;;  %2417 = vmatpush.bf16.msra.mxu0 %v4364_v6  ;;  %v5253_v33 = vld [vmem:[%s8412_s2 + $0x64] sm:$0xf]  ;;  %v1279_v6 = vperm.slane %v6582_v58, 2 }
 0x118   : > { %2396 = vmatpush.bf16.msrb.mxu2 %v4536_v16 }
 0x11a   : > { %v1154_v17 = vpop.f32.mrf.mxu3  ;;  %v6444_v12 = vpop.f32.mrf.mxu2 }
 0x11b   : > { %v6446_v25 = vpop.f32.mrf.mxu0  ;;  %v6451_v29 = vpop.f32.mrf.mxu1  ;;  %v4711_v17 = vld [vmem:[%s8412_s2 + $0x3a0] sm:$0xf]  ;;  %2430 = vmatpush.bf16.msra.mxu1 %v4492_v21  ;;  %v1140_v51 = vadd.f32 %v6444_v12, %v1127_v41  ;;  %2418 = vmatpush.bf16.msra.mxu0 %v4348_v14  ;;  %v4425_v21 = vld [vmem:[%s8412_s2 + $0x170] sm:$0xf0] }
 0x11c   : > { %v4712_v19 = vor.u32 %v5359_v26, %v4711_v17  ;;  %v4297_v17 = vld [vmem:[%s8412_s2 + $0x70] sm:$0xf0]  ;;  %v4519_v26 = vld [vmem:[%s8412_s2 + $0x220] sm:$0xf] }
 0x11d   : > { %v6631_v7 = vmax.f32 %v1140_v51, 0.0  ;;  %v4300_v37 = vor.u32 %v5253_v33, %v4297_v17  ;;  %v4409_v41 = vld [vmem:[%s8412_s2 + $0x150] sm:$0xf0]  ;;  %v4520_v14 = vor.u32 %v5311_v27, %v4519_v26 }
 0x11e   : > { %2406 = vmatpush.bf16.msrb.mxu3 %v4712_v19  ;;  %v5249_v19 = vld [vmem:[%s8412_s2 + $0x44] sm:$0xf]  ;;  %v4729_v33 = vld [vmem:[%s8412_s2 + $0x3d0] sm:$0xf0] }
 0x11f   : > { %2431 = vmatpush.bf16.msra.mxu1 %v4476_v44  ;;  %v5307_v44 = vld [vmem:[%s8412_s2 + $0x20c] sm:$0xf0]  ;;  %2397 = vmatpush.bf16.msrb.mxu2 %v4520_v14 }
 0x122   : > { %v6465_v39 = vpop.f32.mrf.mxu3  ;;  %v1141_v45 = vpop.f32.mrf.mxu2 }
 0x123   : > { %v1167_v30 = vpop.f32.mrf.mxu0  ;;  %v1180_v48 = vpop.f32.mrf.mxu1  ;;  %v5355_v45 = vld [vmem:[%s8412_s2 + $0x38c] sm:$0xf0] }
 0x124   : > { %v1166_v30 = vadd.f32 %v6446_v25, %v6409_v2  ;;  %v4329_v48 = vld [vmem:[%s8412_s2 + $0xb0] sm:$0xf0]  ;;  %v5293_v2 = vld [vmem:[%s8412_s2 + $0x1a4] sm:$0xf]  ;;  %v4696_v25 = vor.u32 %v5355_v45, %v4695_v43  ;;  %v1285_v43 = vsub.f32 %v6631_v7, %v1277_v53 }
 0x125   : > { %v4332_v59 = vor.u32 %v5261_v47, %v4329_v48  ;;  %v5339_v47 = vld [vmem:[%s8412_s2 + $0x30c] sm:$0xf0] }
 0x126   : > { %v1179_v55 = vadd.f32 %v6451_v29, %v1166_v30  ;;  %v4313_v29 = vld [vmem:[%s8412_s2 + $0x90] sm:$0xf0]  ;;  %2407 = vmatpush.bf16.msrb.mxu3 %v4696_v25  ;;  %v4632_v62 = vor.u32 %v5339_v47, %v4631_v40 }
 0x127   : > { %2419 = vmatpush.bf16.msra.mxu0 %v4332_v59  ;;  %v4412_v59 = vor.u32 %v5281_v38, %v4409_v41 }
 0x128   : > { %v6640_v32 = vmax.f32 %v1179_v55, 0.0 }
 0x12a   : > { %v1206_v11 = vpop.f32.mrf.mxu3  ;;  %v1191_v18 = vpop.f32.mrf.mxu2  ;;  %2408 = vmatpush.bf16.msrb.mxu3 %v4680_v1  ;;  %v1286_v48 = vsub.f32 %v6640_v32, %v1278_v9 }
 0x12b   : > { %v1217_v35 = vpop.f32.mrf.mxu0  ;;  %v1205_v46 = vadd.f32 %v6465_v39, %v1191_v18  ;;  %v4457_v39 = vld [vmem:[%s8412_s2 + $0x1b0] sm:$0xf0]  ;;  %v4316_v11 = vor.u32 %v5257_v0, %v4313_v29  ;;  %v5285_v18 = vld [vmem:[%s8412_s2 + $0x164] sm:$0xf]  ;;  %v1289_v0 = vand.u32 2147483647, %v1285_v43  ;;  %v4504_v29 = vor.u32 %v5307_v44, %v4503_v42 }
 0x12c   : > { %v6557_v36 = vpop.f32.mrf.mxu1  ;;  %v4460_v12 = vor.u32 %v5293_v2, %v4457_v39  ;;  %v5333_v39 = vld [vmem:[%s8412_s2 + $0x2e4] sm:$0xf] }
 0x12d   : > { %v1218_v56 = vadd.f32 %v1217_v35, %v1205_v46  ;;  %v5343_v35 = vld [vmem:[%s8412_s2 + $0x32c] sm:$0xf0]  ;;  %2420 = vmatpush.bf16.msra.mxu0 %v4316_v11  ;;  %v4428_v46 = vor.u32 %v5285_v18, %v4425_v21  ;;  %v4620_v3 = vor.u32 %v5333_v39, %v4617_v49  ;;  %vm1293_vm13 = vcmp.ge.f32.partialorder %v1289_v0, 0.1  ;;  %2398 = vmatpush.bf16.msrb.mxu2 %v4504_v29 }
 0x12e   : > { %2432 = vmatpush.bf16.msra.mxu1 %v4460_v12  ;;  %2409 = vmatpush.bf16.msrb.mxu3 %v4664_v22  ;;  %v4648_v25 = vor.u32 %v5343_v35, %v4647_v34  ;;  %v4393_v12 = vld [vmem:[%s8412_s2 + $0x130] sm:$0xf0]  ;;  %v6745_v15 = vsel %vm1293_vm13, %v6631_v7, %v1277_v53  ;;  %v4268_v11 = vor.u32 %v5245_v52, %v4265_v54 }
 0x12f   : > { %v6642_v10 = vmax.f32 %v1218_v56, 0.0  ;;  %v4284_v56 = vor.u32 %v5249_v19, %v4281_v28  ;;  %v1313_v17 = vrot.slane %v6745_v15, 7  ;;  %v4249_v22 = vld [vmem:[%s8412_s2 + $0x10] sm:$0xf0] }
 0x130   : > { %v4377_v34 = vld [vmem:[%s8412_s2 + $0x110] sm:$0xf0] }
 0x131   : > { %v1287_v51 = vsub.f32 %v6642_v10, %v1279_v6  ;;  %2421 = vmatpush.bf16.msra.mxu0 %v4300_v37  ;;  %2443 = vmatpush.bf16.msra.mxu2 %v4620_v3  ;;  %v1321_v35 = vsub.f32 %v6631_v7, %v1313_v17  ;;  %v4732_v37 = vor.u32 %v5361_v8, %v4729_v33 }
 0x132   : > { %v1193_v60 = vpop.f32.mrf.mxu2  ;;  %2433 = vmatpush.bf16.msra.mxu1 %v4444_v13  ;;  %2410 = vmatpush.bf16.msrb.mxu3 %v4648_v25  ;;  %v5241_v13 = vld [vmem:[%s8412_s2 + $0x4] sm:$0xf] }
 0x133   : > { %v6611_v57 = vpop.f32.mrf.mxu3  ;;  %v1219_v63 = vpop.f32.mrf.mxu0  ;;  %v5277_v60 = vld [vmem:[%s8412_s2 + $0x124] sm:$0xf]  ;;  %v1291_v4 = vand.u32 2147483647, %v1287_v51  ;;  %v4252_v42 = vor.u32 %v5241_v13, %v4249_v22  ;;  %v1325_v43 = vand.u32 2147483647, %v1321_v35 }
 0x134   : > { %v1232_v20 = vpop.f32.mrf.mxu1  ;;  %v1290_v63 = vand.u32 2147483647, %v1286_v48  ;;  %v4396_v21 = vor.u32 %v5277_v60, %v4393_v12 }
 0x135   : > { %v1280_v20 = vperm.slane %v6582_v58, 3  ;;  %2422 = vmatpush.bf16.msra.mxu0 %v4284_v56  ;;  %vm1295_vm0 = vcmp.ge.f32.partialorder %v1291_v4, 0.1  ;;  %vm1329_vm2 = vcmp.ge.f32.partialorder %v1325_v43, 0.1 }
 0x136   : > { %2434 = vmatpush.bf16.msra.mxu1 %v4428_v46  ;;  %vm1294_vm14 = vcmp.ge.f32.partialorder %v1290_v63, 0.1  ;;  %2411 = vmatpush.bf16.msrb.mxu3 %v4632_v62  ;;  %v6774_v28 = vsel %vm1295_vm0, %v6642_v10, %v1279_v6  ;;  %v6784_v14 = vsel %vm1329_vm2, %v6631_v7, %v1313_v17  ;;  %v5325_v43 = vld [vmem:[%s8412_s2 + $0x2a4] sm:$0xf] }
 0x137   : > { %v6756_v16 = vsel %vm1294_vm14, %v6640_v32, %v1278_v9  ;;  %v5273_v9 = vld [vmem:[%s8412_s2 + $0x104] sm:$0xf]  ;;  %v1315_v41 = vrot.slane %v6774_v28, 7  ;;  %v1349_v47 = vrot.slane %v6784_v14, 7 }
 0x138   : > { %v1314_v26 = vrot.slane %v6756_v16, 7 }
 0x139   : > { %2423 = vmatpush.bf16.msra.mxu0 %v4268_v11  ;;  %v1323_v58 = vsub.f32 %v6642_v10, %v1315_v41  ;;  %v1357_v25 = vsub.f32 %v6631_v7, %v1349_v47 }
 0x13a   : > { %v1243_v45 = vpop.f32.mrf.mxu2  ;;  %2435 = vmatpush.bf16.msra.mxu1 %v4412_v59  ;;  %v1322_v38 = vsub.f32 %v6640_v32, %v1314_v26 }
 0x13b   : > { %v1258_v30 = vpop.f32.mrf.mxu3  ;;  %v1244_v2 = vadd.f32 %v1243_v45, %v6557_v36  ;;  %v4745_v36 = vld [vmem:[%s8412_s2 + $0x3f0] sm:$0xf0]  ;;  %v4380_v45 = vor.u32 %v5273_v9, %v4377_v34  ;;  %v1327_v44 = vand.u32 2147483647, %v1323_v58  ;;  %v1361_v51 = vand.u32 2147483647, %v1357_v25 }
 0x13c   : > { %v4748_v5 = vor.u32 %v5365_v50, %v4745_v36  ;;  %v1326_v30 = vand.u32 2147483647, %v1322_v38 }
 0x13d   : > { %v1257_v55 = vadd.f32 %v6611_v57, %v1244_v2  ;;  %v5329_v57 = vld [vmem:[%s8412_s2 + $0x2c4] sm:$0xf]  ;;  %2424 = vmatpush.bf16.msra.mxu0 %v4252_v42  ;;  %vm1331_vm10 = vcmp.ge.f32.partialorder %v1327_v44, 0.1  ;;  %vm1365_vm14 = vcmp.ge.f32.partialorder %v1361_v51, 0.1 }
 0x13e   : > { %v4604_v27 = vor.u32 %v5329_v57, %v4601_v31  ;;  %2456 = vmatpush.bf16.msra.mxu3 %v4748_v5  ;;  %2436 = vmatpush.bf16.msra.mxu1 %v4396_v21  ;;  %vm1330_vm9 = vcmp.ge.f32.partialorder %v1326_v30, 0.1  ;;  %v6794_v39 = vsel %vm1331_vm10, %v6642_v10, %v1315_v41  ;;  %v6803_v56 = vsel %vm1365_vm14, %v6631_v7, %v1349_v47  ;;  %v5357_v47 = vld [vmem:[%s8412_s2 + $0x3a4] sm:$0xf] }
 0x13f   : > { %v6734_v1 = vmax.f32 %v1257_v55, 0.0  ;;  %v6787_v40 = vsel %vm1330_vm9, %v6640_v32, %v1314_v26  ;;  %v1351_v36 = vrot.slane %v6794_v39, 7  ;;  %v1385_v12 = vrot.slane %v6803_v56, 7 }
 0x140   : > { %2444 = vmatpush.bf16.msra.mxu2 %v4604_v27  ;;  %v1350_v48 = vrot.slane %v6787_v40, 7 }
 0x141   : > { %v1288_v53 = vsub.f32 %v6734_v1, %v1280_v20  ;;  %v1359_v55 = vsub.f32 %v6642_v10, %v1351_v36  ;;  %v1393_v62 = vsub.f32 %v6631_v7, %v1385_v12 }
 0x142   : > { %v1245_v18 = vpop.f32.mrf.mxu2  ;;  %2457 = vmatpush.bf16.msra.mxu3 %v4732_v37  ;;  %2437 = vmatpush.bf16.msra.mxu1 %v4380_v45  ;;  %v1358_v49 = vsub.f32 %v6640_v32, %v1350_v48  ;;  %v4585_v45 = vld [vmem:[%s8412_s2 + $0x2b0] sm:$0xf0] }
 0x143   : > { %v1292_v19 = vand.u32 2147483647, %v1288_v53  ;;  %v1363_v24 = vand.u32 2147483647, %v1359_v55  ;;  %v1397_v3 = vand.u32 2147483647, %v1393_v62  ;;  %v4588_v44 = vor.u32 %v5325_v43, %v4585_v45 }
 0x144   : > { %v1362_v52 = vand.u32 2147483647, %v1358_v49  ;;  %v1302_v62 = vperm.slane %v6756_v16, 0  ;;  %v5317_v16 = vld [vmem:[%s8412_s2 + $0x264] sm:$0xf] }
 0x145   : > { %vm1296_vm15 = vcmp.ge.f32.partialorder %v1292_v19, 0.1  ;;  %vm1401_vm9 = vcmp.ge.f32.partialorder %v1397_v3, 0.1  ;;  %2445 = vmatpush.bf16.msra.mxu2 %v4588_v44  ;;  %v1337_v3 = vperm.slane %v6784_v14, 1 }
 0x146   : > { %v6779_v46 = vsel %vm1296_vm15, %v6734_v1, %v1280_v20  ;;  %vm1366_vm0 = vcmp.ge.f32.partialorder %v1362_v52, 0.1  ;;  %vm1367_vm15 = vcmp.ge.f32.partialorder %v1363_v24, 0.1  ;;  %v6822_v8 = vsel %vm1401_vm9, %v6631_v7, %v1385_v12  ;;  %v4569_v52 = vld [vmem:[%s8412_s2 + $0x290] sm:$0xf0] }
 0x147   : > { %v1316_v6 = vrot.slane %v6779_v46, 7  ;;  %v6807_v60 = vsel %vm1366_vm0, %v6640_v32, %v1350_v48  ;;  %v6815_v20 = vsel %vm1367_vm15, %v6642_v10, %v1351_v36  ;;  %v1421_v13 = vrot.slane %v6822_v8, 7  ;;  %v4713_v48 = vld [vmem:[%s8412_s2 + $0x3b0] sm:$0xf0]  ;;  %v5321_v36 = vld [vmem:[%s8412_s2 + $0x284] sm:$0xf] }
 0x148   : > { %v1386_v0 = vrot.slane %v6807_v60, 7  ;;  %v1387_v4 = vrot.slane %v6815_v20, 7  ;;  %v4716_v25 = vor.u32 %v5357_v47, %v4713_v48  ;;  %v4572_v12 = vor.u32 %v5321_v36, %v4569_v52  ;;  %v5353_v24 = vld [vmem:[%s8412_s2 + $0x384] sm:$0xf]  ;;  %v4553_v14 = vld [vmem:[%s8412_s2 + $0x270] sm:$0xf0] }
 0x149   : > { %v1324_v2 = vsub.f32 %v6734_v1, %v1316_v6  ;;  %v1429_v21 = vsub.f32 %v6631_v7, %v1421_v13  ;;  %v5345_v44 = vld [vmem:[%s8412_s2 + $0x344] sm:$0xf]  ;;  %v4665_v47 = vld [vmem:[%s8412_s2 + $0x350] sm:$0xf0] }
 0x14a   : > { %v1394_v57 = vsub.f32 %v6640_v32, %v1386_v0  ;;  %v1395_v17 = vsub.f32 %v6642_v10, %v1387_v4  ;;  %2458 = vmatpush.bf16.msra.mxu3 %v4716_v25  ;;  %2446 = vmatpush.bf16.msra.mxu2 %v4572_v12 }
 0x14b   : > { %v1328_v50 = vand.u32 2147483647, %v1324_v2  ;;  %v1433_v26 = vand.u32 2147483647, %v1429_v21  ;;  %v4556_v21 = vor.u32 %v5317_v16, %v4553_v14 }
 0x14c   : > { %v1398_v5 = vand.u32 2147483647, %v1394_v57  ;;  %v1399_v27 = vand.u32 2147483647, %v1395_v17  ;;  %v1338_v17 = vperm.slane %v6787_v40, 1 }
 0x14d   : > { %vm1332_vm13 = vcmp.ge.f32.partialorder %v1328_v50, 0.1 }
 0x14e   : > { %v6799_v54 = vsel %vm1332_vm13, %v6734_v1, %v1316_v6  ;;  %vm1402_vm10 = vcmp.ge.f32.partialorder %v1398_v5, 0.1  ;;  %vm1437_vm13 = vcmp.ge.f32.partialorder %v1433_v26, 0.1  ;;  %vm1403_vm0 = vcmp.ge.f32.partialorder %v1399_v27, 0.1  ;;  %2447 = vmatpush.bf16.msra.mxu2 %v4556_v21 }
 0x14f   : > { %v1352_v59 = vrot.slane %v6799_v54, 7  ;;  %v6826_v33 = vsel %vm1402_vm10, %v6640_v32, %v1386_v0  ;;  %v6835_v35 = vsel %vm1437_vm13, %v6631_v7, %v1421_v13  ;;  %v6851_v30 = vsel %vm1403_vm0, %v6642_v10, %v1387_v4  ;;  %v4697_v0 = vld [vmem:[%s8412_s2 + $0x390] sm:$0xf0]  ;;  %v5349_v13 = vld [vmem:[%s8412_s2 + $0x364] sm:$0xf] }
 0x150   : > { %v1422_v53 = vrot.slane %v6826_v33, 7  ;;  %v1457_v37 = vrot.slane %v6835_v35, 7  ;;  %v1423_v49 = vrot.slane %v6851_v30, 7  ;;  %v1374_v26 = vperm.slane %v6807_v60, 2  ;;  %v5313_v60 = vld [vmem:[%s8412_s2 + $0x244] sm:$0xf] }
 0x151   : > { %v1360_v29 = vsub.f32 %v6734_v1, %v1352_v59  ;;  %v1409_v27 = vperm.slane %v6822_v8, 3  ;;  %v4537_v8 = vld [vmem:[%s8412_s2 + $0x250] sm:$0xf0]  ;;  %v1445_v36 = vperm.slane %v6835_v35, 4  ;;  %v5309_v35 = vld [vmem:[%s8412_s2 + $0x224] sm:$0xf] }
 0x152   : > { %v1430_v22 = vsub.f32 %v6640_v32, %v1422_v53  ;;  %v1465_v41 = vsub.f32 %v6631_v7, %v1457_v37  ;;  %v1431_v5 = vsub.f32 %v6642_v10, %v1423_v49 }
 0x153   : > { %v1364_v63 = vand.u32 2147483647, %v1360_v29  ;;  %v1301_v29 = vperm.slane %v6745_v15, 0 }
 0x154   : > { %v1434_v34 = vand.u32 2147483647, %v1430_v22  ;;  %v1469_v6 = vand.u32 2147483647, %v1465_v41  ;;  %v4681_v22 = vld [vmem:[%s8412_s2 + $0x370] sm:$0xf0] }
 0x155   : > { %vm1368_vm2 = vcmp.ge.f32.partialorder %v1364_v63, 0.1  ;;  %v4700_v63 = vor.u32 %v5353_v24, %v4697_v0  ;;  %v1305_v40 = vsel %vm292_vm3, %v1301_v29, %v6631_v7 }
 0x156   : > { %v6819_v31 = vsel %vm1368_vm2, %v6734_v1, %v1352_v59  ;;  %vm1438_vm14 = vcmp.ge.f32.partialorder %v1434_v34, 0.1  ;;  %vm1473_vm2 = vcmp.ge.f32.partialorder %v1469_v6, 0.1  ;;  %v4684_v34 = vor.u32 %v5349_v13, %v4681_v22  ;;  %v5305_v22 = vld [vmem:[%s8412_s2 + $0x204] sm:$0xf] }
 0x157   : > { %v1388_v11 = vrot.slane %v6819_v31, 7  ;;  %v6838_v19 = vsel %vm1438_vm14, %v6640_v32, %v1422_v53  ;;  %v6865_v51 = vsel %vm1473_vm2, %v6631_v7, %v1457_v37  ;;  %2459 = vmatpush.bf16.msra.mxu3 %v4700_v63  ;;  %v1373_v53 = vperm.slane %v6803_v56, 2 }
 0x158   : > { %v1458_v38 = vrot.slane %v6838_v19, 7  ;;  %v1493_v59 = vrot.slane %v6865_v51, 7  ;;  %v1435_v37 = vand.u32 2147483647, %v1431_v5  ;;  %v1306_v56 = vsel %vm292_vm3, %v1302_v62, %v6640_v32  ;;  %v5341_v5 = vld [vmem:[%s8412_s2 + $0x324] sm:$0xf] }
 0x159   : > { %v1396_v18 = vsub.f32 %v6734_v1, %v1388_v11  ;;  %v4540_v6 = vor.u32 %v5313_v60, %v4537_v8  ;;  %v1341_v48 = vsel %vm320_vm4, %v1337_v3, %v1305_v40  ;;  %v1446_v52 = vperm.slane %v6838_v19, 4  ;;  %v4521_v19 = vld [vmem:[%s8412_s2 + $0x230] sm:$0xf0] }
 0x15a   : > { %v1466_v42 = vsub.f32 %v6640_v32, %v1458_v38  ;;  %v1501_v4 = vsub.f32 %v6631_v7, %v1493_v59  ;;  %vm6939_vm14 = vcmp.ge.f32.partialorder %v1435_v37, 0.1  ;;  %v1377_v24 = vsel %vm348_vm6, %v1373_v53, %v1341_v48  ;;  %v4633_v37 = vld [vmem:[%s8412_s2 + $0x310] sm:$0xf0]  ;;  %v5304_v48 = vld [vmem:[%s8412_s2 + $0x1f4] sm:$0xf0] }
 0x15b   : > { %v1400_v9 = vand.u32 2147483647, %v1396_v18  ;;  %2460 = vmatpush.bf16.msra.mxu3 %v4684_v34  ;;  %2448 = vmatpush.bf16.msra.mxu2 %v4540_v6 }
 0x15c   : > { %v1470_v2 = vand.u32 2147483647, %v1466_v42  ;;  %v1505_v18 = vand.u32 2147483647, %v1501_v4  ;;  %v1410_v42 = vperm.slane %v6826_v33, 3  ;;  %v4668_v33 = vor.u32 %v5345_v44, %v4665_v47 }
 0x15d   : > { %vm1404_vm15 = vcmp.ge.f32.partialorder %v1400_v9, 0.1  ;;  %v4524_v4 = vor.u32 %v5309_v35, %v4521_v19  ;;  %v5272_v44 = vld [vmem:[%s8412_s2 + $0xf4] sm:$0xf0]  ;;  %v4495_v47 = vld [vmem:[%s8412_s2 + $0x1e8] sm:$0xf] }
 0x15e   : > { %v6854_v58 = vsel %vm1404_vm15, %v6734_v1, %v1388_v11  ;;  %vm1474_vm9 = vcmp.ge.f32.partialorder %v1470_v2, 0.1  ;;  %vm1509_vm10 = vcmp.ge.f32.partialorder %v1505_v18, 0.1  ;;  %v1342_v2 = vsel %vm320_vm4, %v1338_v17, %v1306_v56  ;;  %v4479_v35 = vld [vmem:[%s8412_s2 + $0x1c8] sm:$0xf] }
 0x15f   : > { %v1424_v50 = vrot.slane %v6854_v58, 7  ;;  %v6874_v55 = vsel %vm1474_vm9, %v6640_v32, %v1458_v38  ;;  %v1513_v41 = vsel %vm1509_vm10, %v6631_v7, %v1493_v59  ;;  %v1378_v0 = vsel %vm348_vm6, %v1374_v26, %v1342_v2  ;;  %2461 = vmatpush.bf16.msra.mxu3 %v4668_v33  ;;  %2449 = vmatpush.bf16.msra.mxu2 %v4524_v4 }
 0x160   : > { %v1494_v57 = vrot.slane %v6874_v55, 7  ;;  %v1529_v45 = vrot.slane %v1513_v41, 7  ;;  %v1414_v63 = vsel %vm376_vm7, %v1410_v42, %v1378_v0  ;;  %v1482_v16 = vperm.slane %v6874_v55, 5  ;;  %v4351_v0 = vld [vmem:[%s8412_s2 + $0xc8] sm:$0xf] }
 0x161   : > { %v1432_v11 = vsub.f32 %v6734_v1, %v1424_v50  ;;  %v1517_v53 = vperm.slane %v1513_v41, 6  ;;  %v6984_v55 = vsel %vm6939_vm14, %v6642_v10, %v1423_v49  ;;  %v1450_v26 = vsel %vm404_vm8, %v1446_v52, %v1414_v63  ;;  %v5337_v49 = vld [vmem:[%s8412_s2 + $0x304] sm:$0xf] }
 0x162   : > { %v1502_v15 = vsub.f32 %v6640_v32, %v1494_v57  ;;  %v1537_v59 = vsub.f32 %v6631_v7, %v1529_v45  ;;  %v1459_v60 = vrot.slane %v6984_v55, 7 }
 0x163   : > { %v1436_v38 = vand.u32 2147483647, %v1432_v11  ;;  %v4649_v11 = vld [vmem:[%s8412_s2 + $0x330] sm:$0xf0] }
 0x164   : > { %v1506_v9 = vand.u32 2147483647, %v1502_v15  ;;  %v1541_v3 = vand.u32 2147483647, %v1537_v59  ;;  %v1481_v15 = vperm.slane %v6865_v51, 5  ;;  %v4652_v13 = vor.u32 %v5341_v5, %v4649_v11 }
 0x165   : > { %vm6954_vm0 = vcmp.ge.f32.partialorder %v1436_v38, 0.1  ;;  %v4505_v51 = vld [vmem:[%s8412_s2 + $0x210] sm:$0xf0]  ;;  %v1486_v38 = vsel %vm432_vm12, %v1482_v16, %v1450_v26  ;;  %v1467_v2 = vsub.f32 %v6642_v10, %v1459_v60  ;;  %v4335_v16 = vld [vmem:[%s8412_s2 + $0xa8] sm:$0xf] }
 0x166   : > { %vm1510_vm13 = vcmp.ge.f32.partialorder %v1506_v9, 0.1  ;;  %vm1545_vm15 = vcmp.ge.f32.partialorder %v1541_v3, 0.1  ;;  %2462 = vmatpush.bf16.msra.mxu3 %v4652_v13  ;;  %v4508_v34 = vor.u32 %v5305_v22, %v4505_v51  ;;  %v4463_v13 = vld [vmem:[%s8412_s2 + $0x1a8] sm:$0xf] }
 0x167   : > { %v1514_v43 = vsel %vm1510_vm13, %v6640_v32, %v1494_v57  ;;  %v1413_v57 = vsel %vm376_vm7, %v1409_v27, %v1377_v24  ;;  %v1549_v21 = vsel %vm1545_vm15, %v6631_v7, %v1529_v45  ;;  %v6991_v7 = vsel %vm6954_vm0, %v6734_v1, %v1424_v50  ;;  %v4367_v45 = vld [vmem:[%s8412_s2 + $0xe8] sm:$0xf] }
 0x168   : > { %v1530_v25 = vrot.slane %v1514_v43, 7  ;;  %v1449_v17 = vsel %vm404_vm8, %v1445_v36, %v1413_v57  ;;  %v1518_v18 = vperm.slane %v1514_v43, 6  ;;  %v1553_v9 = vperm.slane %v1549_v21, 7  ;;  %1571 = vst [vmem:[#allocation1] sm:$0xff] %v1549_v21  ;;  %2450 = vmatpush.bf16.msra.mxu2 %v4508_v34  ;;  %v5300_v57 = vld [vmem:[%s8412_s2 + $0x1d4] sm:$0xf0] }
 0x169   : > { %v1485_v50 = vsel %vm432_vm12, %v1481_v15, %v1449_v17  ;;  %v1460_v8 = vrot.slane %v6991_v7, 7  ;;  %v1471_v52 = vand.u32 2147483647, %v1467_v2  ;;  %v4368_v12 = vor.u32 %v5272_v44, %v4367_v45  ;;  %v5296_v17 = vld [vmem:[%s8412_s2 + $0x1b4] sm:$0xf0] }
 0x16a   : > { %v1538_v29 = vsub.f32 %v6640_v32, %v1530_v25  ;;  %v1521_v56 = vsel %vm460_vm1, %v1517_v53, %v1485_v50  ;;  %v1522_v41 = vsel %vm460_vm1, %v1518_v18, %v1486_v38  ;;  %v4496_v24 = vor.u32 %v5304_v48, %v4495_v47  ;;  %v4319_v50 = vld [vmem:[%s8412_s2 + $0x88] sm:$0xf]  ;;  %v5256_v45 = vld [vmem:[%s8412_s2 + $0x74] sm:$0xf0] }
 0x16b   : > { %v1557_v42 = vsel %vm488_vm5, %v1553_v9, %v1521_v56  ;;  %vm1475_vm9 = vcmp.ge.f32.partialorder %v1471_v52, 0.1  ;;  %v4480_v15 = vor.u32 %v5300_v57, %v4479_v35  ;;  %v1303_v21 = vperm.slane %v6774_v28, 0  ;;  %v5260_v28 = vld [vmem:[%s8412_s2 + $0x94] sm:$0xf0] }
 0x16c   : > { %v1542_v14 = vand.u32 2147483647, %v1538_v29  ;;  %v5268_v29 = vld [vmem:[%s8412_s2 + $0xd4] sm:$0xf0]  ;;  %v7047_v63 = vsel %vm1475_vm9, %v6642_v10, %v1459_v60  ;;  %v1304_v22 = vperm.slane %v6779_v46, 0  ;;  %v1339_v51 = vperm.slane %v6794_v39, 1 }
 0x16d   : > { %v1495_v4 = vrot.slane %v7047_v63, 7  ;;  %v4352_v11 = vor.u32 %v5268_v29, %v4351_v0  ;;  %v1340_v26 = vperm.slane %v6799_v54, 1  ;;  %v4447_v46 = vld [vmem:[%s8412_s2 + $0x188] sm:$0xf]  ;;  %v5292_v39 = vld [vmem:[%s8412_s2 + $0x194] sm:$0xf0] }
 0x16e   : > { %vm1546_vm2 = vcmp.ge.f32.partialorder %v1542_v14, 0.1  ;;  %v5264_v14 = vld [vmem:[%s8412_s2 + $0xb4] sm:$0xf0]  ;;  %v1376_v54 = vperm.slane %v6819_v31, 2  ;;  %v1308_v56 = vsel %vm292_vm3, %v1304_v22, %v6734_v1  ;;  %v4448_v31 = vor.u32 %v5292_v39, %v4447_v46 }
 0x16f   : > { %v1550_v27 = vsel %vm1546_vm2, %v6640_v32, %v1530_v25  ;;  %v4636_v32 = vor.u32 %v5337_v49, %v4633_v37  ;;  %v1468_v25 = vsub.f32 %v6734_v1, %v1460_v8  ;;  %v1503_v53 = vsub.f32 %v6642_v10, %v1495_v4  ;;  %v5288_v44 = vld [vmem:[%s8412_s2 + $0x174] sm:$0xf0]  ;;  %v4399_v46 = vld [vmem:[%s8412_s2 + $0x128] sm:$0xf] }
 0x170   : > { %v1554_v40 = vperm.slane %v1550_v27, 7  ;;  %1572 = vst [vmem:[#allocation1 + $0x9] sm:$0xff] %v1550_v27  ;;  %v1375_v27 = vperm.slane %v6815_v20, 2  ;;  %v4336_v49 = vor.u32 %v5264_v14, %v4335_v16  ;;  %v4464_v37 = vor.u32 %v5296_v17, %v4463_v13  ;;  %v5280_v39 = vld [vmem:[%s8412_s2 + $0x134] sm:$0xf0] }
 0x171   : > { %2463 = vmatpush.bf16.msra.mxu3 %v4636_v32  ;;  %v1472_v59 = vand.u32 2147483647, %v1468_v25  ;;  %v1507_v9 = vand.u32 2147483647, %v1503_v53  ;;  %v1411_v20 = vperm.slane %v6851_v30, 3  ;;  %v1307_v32 = vsel %vm292_vm3, %v1303_v21, %v6642_v10 }
 0x172   : > { %v1558_v43 = vsel %vm488_vm5, %v1554_v40, %v1522_v41  ;;  %v4303_v30 = vld [vmem:[%s8412_s2 + $0x68] sm:$0xf]  ;;  %v1344_v47 = vsel %vm320_vm4, %v1340_v26, %v1308_v56  ;;  %v5332_v56 = vld [vmem:[%s8412_s2 + $0x2d4] sm:$0xf0] }
 0x173   : > { %v1561_v6 = vpack.c.bf16 %v1558_v43, %v1557_v42  ;;  %vm1476_vm10 = vcmp.ge.f32.partialorder %v1472_v59, 0.1  ;;  %vm1511_vm13 = vcmp.ge.f32.partialorder %v1507_v9, 0.1  ;;  %v1343_v42 = vsel %vm320_vm4, %v1339_v51, %v1307_v32  ;;  %v4287_v25 = vld [vmem:[%s8412_s2 + $0x48] sm:$0xf] }
 0x174   : > { %v7050_v3 = vsel %vm1476_vm10, %v6734_v1, %v1460_v8  ;;  %v1515_v38 = vsel %vm1511_vm13, %v6642_v10, %v1495_v4  ;;  %v4320_v8 = vor.u32 %v5260_v28, %v4319_v50  ;;  %v1412_v43 = vperm.slane %v6854_v58, 3  ;;  %v5336_v9 = vld [vmem:[%s8412_s2 + $0x2f4] sm:$0xf0]  ;;  %v4271_v50 = vld [vmem:[%s8412_s2 + $0x28] sm:$0xf] }
 0x175   : > { %v1713_v33 = vunpack.c.l.b16 %v1561_v6  ;;  %v1714_v36 = vunpack.c.h.b16 %v1561_v6  ;;  %v1496_v5 = vrot.slane %v7050_v3, 7  ;;  %v1531_v41 = vrot.slane %v1515_v38, 7  ;;  %v4431_v6 = vld [vmem:[%s8412_s2 + $0x168] sm:$0xf]  ;;  %v5248_v28 = vld [vmem:[%s8412_s2 + $0x34] sm:$0xf0] }
 0x176   : > { %v1379_v48 = vsel %vm348_vm6, %v1375_v27, %v1343_v42  ;;  %v1447_v59 = vperm.slane %v6984_v55, 4  ;;  %v1484_v0 = vperm.slane %v7050_v3, 5  ;;  %v4304_v57 = vor.u32 %v5256_v45, %v4303_v30  ;;  %v5284_v55 = vld [vmem:[%s8412_s2 + $0x154] sm:$0xf0]  ;;  %v4623_v27 = vld [vmem:[%s8412_s2 + $0x2e8] sm:$0xf] }
 0x177   : > { %v7039_v19 = vpack.c.b16 %v1713_v33, %v1713_v33  ;;  %v7041_v62 = vpack.c.b16 %v1714_v36, %v1714_v36  ;;  %v1504_v18 = vsub.f32 %v6734_v1, %v1496_v5  ;;  %v1539_v58 = vsub.f32 %v6642_v10, %v1531_v41  ;;  %v5252_v33 = vld [vmem:[%s8412_s2 + $0x54] sm:$0xf0]  ;;  %v4607_v32 = vld [vmem:[%s8412_s2 + $0x2c8] sm:$0xf] }
 0x178   : > { %v1380_v36 = vsel %vm348_vm6, %v1376_v54, %v1344_v47  ;;  %v1415_v52 = vsel %vm376_vm7, %v1411_v20, %v1379_v48  ;;  %v4432_v4 = vor.u32 %v5288_v44, %v4431_v6  ;;  %v4288_v16 = vor.u32 %v5252_v33, %v4287_v25  ;;  %v5364_v42 = vld [vmem:[%s8412_s2 + $0x3d4] sm:$0xf0]  ;;  %v4383_v6 = vld [vmem:[%s8412_s2 + $0x108] sm:$0xf]  ;;  %v5270_v47 = vld [vmem:[%s8412_s2 + $0xec] sm:$0xf] }
 0x179   : > { %2373 = vmatmul.bf16.vlgmr.msrb.gmra.mxu0 %v7039_v19  ;;  %2386 = vmatmul.bf16.vlgmr.msrb.gmra.mxu1 %v7041_v62  ;;  %v1508_v34 = vand.u32 2147483647, %v1504_v18  ;;  %v1543_v29 = vand.u32 2147483647, %v1539_v58  ;;  %v4400_v30 = vor.u32 %v5280_v39, %v4399_v46  ;;  %v5244_v45 = vld [vmem:[%s8412_s2 + $0x14] sm:$0xf0]  ;;  %v4608_v25 = vor.u32 %v5332_v56, %v4607_v32 }
 0x17a   : > { %2469 = vmatpush.bf16.msrb.mxu0 %v4368_v12  ;;  %2482 = vmatpush.bf16.msrb.mxu1 %v4496_v24  ;;  %v1448_v12 = vperm.slane %v6991_v7, 4  ;;  %v1483_v24 = vperm.slane %v7047_v63, 5  ;;  %v1416_v7 = vsel %vm376_vm7, %v1412_v43, %v1380_v36  ;;  %v1451_v63 = vsel %vm404_vm8, %v1447_v59, %v1415_v52  ;;  %v4255_v43 = vld [vmem:[%s8412_s2 + $0x8] sm:$0xf]  ;;  %v5276_v44 = vld [vmem:[%s8412_s2 + $0x114] sm:$0xf0] }
 0x17b   : > { %vm1512_vm14 = vcmp.ge.f32.partialorder %v1508_v34, 0.1  ;;  %vm1547_vm0 = vcmp.ge.f32.partialorder %v1543_v29, 0.1  ;;  %v4369_v48 = vld [vmem:[%s8412_s2 + $0xf8] sm:$0xf0]  ;;  %v4256_v59 = vor.u32 %v5244_v45, %v4255_v43 }
 0x17c   : > { %v1516_v40 = vsel %vm1512_vm14, %v6734_v1, %v1496_v5  ;;  %v4415_v5 = vld [vmem:[%s8412_s2 + $0x148] sm:$0xf]  ;;  %v1452_v3 = vsel %vm404_vm8, %v1448_v12, %v1416_v7  ;;  %v1551_v14 = vsel %vm1547_vm0, %v6642_v10, %v1531_v41  ;;  %v1487_v17 = vsel %vm432_vm12, %v1483_v24, %v1451_v63  ;;  %v5302_v58 = vld [vmem:[%s8412_s2 + $0x1ec] sm:$0xf]  ;;  %v5328_v24 = vld [vmem:[%s8412_s2 + $0x2b4] sm:$0xf0] }
 0x17d   : > { %v1532_v60 = vrot.slane %v1516_v40, 7  ;;  %v1488_v53 = vsel %vm432_vm12, %v1484_v0, %v1452_v3  ;;  %v1555_v18 = vperm.slane %v1551_v14, 7  ;;  %1573 = vst [vmem:[#allocation1 + $0x12] sm:$0xff] %v1551_v14  ;;  %v4416_v22 = vor.u32 %v5284_v55, %v4415_v5  ;;  %v4735_v41 = vld [vmem:[%s8412_s2 + $0x3c8] sm:$0xf] }
 0x17e   : > { %2470 = vmatpush.bf16.msrb.mxu0 %v4352_v11  ;;  %2483 = vmatpush.bf16.msrb.mxu1 %v4480_v15  ;;  %v1519_v11 = vperm.slane %v1515_v38, 6  ;;  %v1520_v15 = vperm.slane %v1516_v40, 6  ;;  %v4624_v38 = vor.u32 %v5336_v9, %v4623_v27  ;;  %v4736_v33 = vor.u32 %v5364_v42, %v4735_v41  ;;  %v4591_v36 = vld [vmem:[%s8412_s2 + $0x2a8] sm:$0xf]  ;;  %v5360_v29 = vld [vmem:[%s8412_s2 + $0x3b4] sm:$0xf0] }
 0x17f   : > { %v1540_v2 = vsub.f32 %v6734_v1, %v1532_v60  ;;  %v4384_v12 = vor.u32 %v5276_v44, %v4383_v6  ;;  %v4719_v0 = vld [vmem:[%s8412_s2 + $0x3a8] sm:$0xf]  ;;  %v4353_v5 = vld [vmem:[%s8412_s2 + $0xd8] sm:$0xf0]  ;;  %v5324_v63 = vld [vmem:[%s8412_s2 + $0x294] sm:$0xf0] }
 0x180   : > { %v1523_v10 = vsel %vm460_vm1, %v1519_v11, %v1487_v17  ;;  %v5298_v11 = vld [vmem:[%s8412_s2 + $0x1cc] sm:$0xf]  ;;  %v4720_v55 = vor.u32 %v5360_v29, %v4719_v0  ;;  %v4575_v7 = vld [vmem:[%s8412_s2 + $0x288] sm:$0xf]  ;;  %v5356_v14 = vld [vmem:[%s8412_s2 + $0x394] sm:$0xf0] }
 0x181   : > { %v1544_v35 = vand.u32 2147483647, %v1540_v2  ;;  %v1559_v51 = vsel %vm488_vm5, %v1555_v18, %v1523_v10  ;;  %v4497_v2 = vld [vmem:[%s8412_s2 + $0x1f8] sm:$0xf0]  ;;  %v4703_v3 = vld [vmem:[%s8412_s2 + $0x388] sm:$0xf]  ;;  %v4576_v10 = vor.u32 %v5324_v63, %v4575_v7 }
 0x182   : > { %2471 = vmatpush.bf16.msrb.mxu0 %v4336_v49  ;;  %2484 = vmatpush.bf16.msrb.mxu1 %v4464_v37  ;;  %v4751_v49 = vld [vmem:[%s8412_s2 + $0x3e8] sm:$0xf]  ;;  %v5368_v37 = vld [vmem:[%s8412_s2 + $0x3f4] sm:$0xf0]  ;;  %v4337_v18 = vld [vmem:[%s8412_s2 + $0xb8] sm:$0xf0] }
 0x183   : > { %vm1548_vm15 = vcmp.ge.f32.partialorder %v1544_v35, 0.1  ;;  %v4752_v40 = vor.u32 %v5368_v37, %v4751_v49  ;;  %v4372_v35 = vor.u32 %v5270_v47, %v4369_v48  ;;  %v4687_v27 = vld [vmem:[%s8412_s2 + $0x368] sm:$0xf]  ;;  %v5352_v9 = vld [vmem:[%s8412_s2 + $0x374] sm:$0xf0] }
 0x184   : > { %v1552_v13 = vsel %vm1548_vm15, %v6734_v1, %v1532_v60  ;;  %v1524_v1 = vsel %vm460_vm1, %v1520_v15, %v1488_v53  ;;  %v4481_v15 = vld [vmem:[%s8412_s2 + $0x1d8] sm:$0xf0]  ;;  %v5262_v53 = vld [vmem:[%s8412_s2 + $0xac] sm:$0xf]  ;;  %v5348_v32 = vld [vmem:[%s8412_s2 + $0x354] sm:$0xf0] }
 0x185   : > { %v1556_v21 = vperm.slane %v1552_v13, 7  ;;  %1574 = vst [vmem:[#allocation1 + $0x1b] sm:$0xff] %v1552_v13  ;;  %v4484_v17 = vor.u32 %v5298_v11, %v4481_v15  ;;  %v5258_v37 = vld [vmem:[%s8412_s2 + $0x8c] sm:$0xf]  ;;  %v4449_v46 = vld [vmem:[%s8412_s2 + $0x198] sm:$0xf0] }
 0x186   : > { %2472 = vmatpush.bf16.msrb.mxu0 %v4320_v8  ;;  %2485 = vmatpush.bf16.msrb.mxu1 %v4448_v31  ;;  %v4272_v31 = vor.u32 %v5248_v28, %v4271_v50  ;;  %v4321_v50 = vld [vmem:[%s8412_s2 + $0x98] sm:$0xf0]  ;;  %v5290_v28 = vld [vmem:[%s8412_s2 + $0x18c] sm:$0xf]  ;;  %v4527_v44 = vld [vmem:[%s8412_s2 + $0x228] sm:$0xf] }
 0x187   : > { %v1560_v26 = vsel %vm488_vm5, %v1556_v21, %v1524_v1  ;;  %v5294_v21 = vld [vmem:[%s8412_s2 + $0x1ac] sm:$0xf]  ;;  %v4704_v1 = vor.u32 %v5356_v14, %v4703_v3  ;;  %v4324_v56 = vor.u32 %v5258_v37, %v4321_v50  ;;  %v4452_v41 = vor.u32 %v5290_v28, %v4449_v46  ;;  %v4433_v43 = vld [vmem:[%s8412_s2 + $0x178] sm:$0xf0]  ;;  %v5312_v47 = vld [vmem:[%s8412_s2 + $0x234] sm:$0xf0] }
 0x188   : > { %v1562_v34 = vpack.c.bf16 %v1560_v26, %v1559_v51  ;;  %v4559_v51 = vld [vmem:[%s8412_s2 + $0x268] sm:$0xf]  ;;  %v5320_v26 = vld [vmem:[%s8412_s2 + $0x274] sm:$0xf0]  ;;  %v5286_v42 = vld [vmem:[%s8412_s2 + $0x16c] sm:$0xf] }
 0x189   : > { %2425 = vmatmul.bf16.vlgmr.msra.gmra.mxu0 %v7039_v19  ;;  %2438 = vmatmul.bf16.vlgmr.msra.gmra.mxu1 %v7041_v62  ;;  %v4560_v39 = vor.u32 %v5320_v26, %v4559_v51  ;;  %v4655_v48 = vld [vmem:[%s8412_s2 + $0x328] sm:$0xf]  ;;  %v5308_v29 = vld [vmem:[%s8412_s2 + $0x214] sm:$0xf0]  ;;  %v5246_v7 = vld [vmem:[%s8412_s2 + $0x2c] sm:$0xf] }
 0x18a   : > { %2473 = vmatpush.bf16.msrb.mxu0 %v4304_v57  ;;  %2486 = vmatpush.bf16.msrb.mxu1 %v4432_v4  ;;  %v1715_v54 = vunpack.c.l.b16 %v1562_v34  ;;  %v1716_v20 = vunpack.c.h.b16 %v1562_v34  ;;  %v4500_v57 = vor.u32 %v5302_v58, %v4497_v2  ;;  %v5266_v4 = vld [vmem:[%s8412_s2 + $0xcc] sm:$0xf]  ;;  %v4340_v34 = vor.u32 %v5262_v53, %v4337_v18  ;;  %v5344_v58 = vld [vmem:[%s8412_s2 + $0x334] sm:$0xf0]  ;;  %v4511_v0 = vld [vmem:[%s8412_s2 + $0x208] sm:$0xf] }
 0x18b   : > { %v4356_v13 = vor.u32 %v5266_v4, %v4353_v5  ;;  %v5334_v4 = vld [vmem:[%s8412_s2 + $0x2ec] sm:$0xf]  ;;  %v4625_v5 = vld [vmem:[%s8412_s2 + $0x2f8] sm:$0xf0] }
 0x18c   : > { %v7193_v60 = vpack.c.b16 %v1715_v54, %v1715_v54  ;;  %v7195_v8 = vpack.c.b16 %v1716_v20, %v1716_v20  ;;  %v1576_v52 = vld [vmem:[#allocation1 + $0x7] ss:$9 sm:$0xff]  ;;  %v4688_v54 = vor.u32 %v5352_v9, %v4687_v27  ;;  %v5278_v3 = vld [vmem:[%s8412_s2 + $0x12c] sm:$0xf]  ;;  %v4628_v53 = vor.u32 %v5334_v4, %v4625_v5 }
 0x18d   : > { %1580 = vst.msk [vmem:[#allocation8] sm:$0xf] %vm6383_vm11, %v1576_v52  ;;  %v4543_v20 = vld [vmem:[%s8412_s2 + $0x248] sm:$0xf]  ;;  %v5282_v52 = vld [vmem:[%s8412_s2 + $0x14c] sm:$0xf] }
 0x18e   : > { %2474 = vmatpush.bf16.msrb.mxu0 %v4288_v16  ;;  %2487 = vmatpush.bf16.msrb.mxu1 %v4416_v22  ;;  %v4592_v16 = vor.u32 %v5328_v24, %v4591_v36  ;;  %v4465_v22 = vld [vmem:[%s8412_s2 + $0x1b8] sm:$0xf0]  ;;  %v4656_v24 = vor.u32 %v5344_v58, %v4655_v48  ;;  %v5362_v51 = vld [vmem:[%s8412_s2 + $0x3cc] sm:$0xf] }
 0x18f   : > { %2399 = vmatmul.bf16.vlgmr.msrb.gmra.mxu2 %v7193_v60  ;;  %2412 = vmatmul.bf16.vlgmr.msrb.gmra.mxu3 %v7195_v8  ;;  %v4468_v49 = vor.u32 %v5294_v21, %v4465_v22  ;;  %v4289_v36 = vld [vmem:[%s8412_s2 + $0x58] sm:$0xf0]  ;;  %v5330_v21 = vld [vmem:[%s8412_s2 + $0x2cc] sm:$0xf] }
 0x190   : > { %2495 = vmatpush.bf16.msrb.mxu2 %v4624_v38  ;;  %2508 = vmatpush.bf16.msrb.mxu3 %v4752_v40  ;;  %v5316_v38 = vld [vmem:[%s8412_s2 + $0x254] sm:$0xf0]  ;;  %v4671_v40 = vld [vmem:[%s8412_s2 + $0x348] sm:$0xf]  ;;  %v4273_v63 = vld [vmem:[%s8412_s2 + $0x38] sm:$0xf0] }
 0x191   : > { %v4544_v45 = vor.u32 %v5316_v38, %v4543_v20  ;;  %v4672_v6 = vor.u32 %v5348_v32, %v4671_v40  ;;  %v4401_v14 = vld [vmem:[%s8412_s2 + $0x138] sm:$0xf0]  ;;  %v5242_v27 = vld [vmem:[%s8412_s2 + $0xc] sm:$0xf] }
 0x192   : > { %2475 = vmatpush.bf16.msrb.mxu0 %v4272_v31  ;;  %2488 = vmatpush.bf16.msrb.mxu1 %v4400_v30  ;;  %v5254_v31 = vld [vmem:[%s8412_s2 + $0x6c] sm:$0xf]  ;;  %v4305_v30 = vld [vmem:[%s8412_s2 + $0x78] sm:$0xf0] }
 0x193   : > { %v4308_v2 = vor.u32 %v5254_v31, %v4305_v30  ;;  %v4609_v22 = vld [vmem:[%s8412_s2 + $0x2d8] sm:$0xf0]  ;;  %v5326_v28 = vld [vmem:[%s8412_s2 + $0x2ac] sm:$0xf] }
 0x194   : > { %2496 = vmatpush.bf16.msrb.mxu2 %v4608_v25  ;;  %2509 = vmatpush.bf16.msrb.mxu3 %v4736_v33  ;;  %v4436_v25 = vor.u32 %v5286_v42, %v4433_v43  ;;  %v5250_v33 = vld [vmem:[%s8412_s2 + $0x4c] sm:$0xf]  ;;  %v4737_v26 = vld [vmem:[%s8412_s2 + $0x3d8] sm:$0xf0]  ;;  %v4612_v37 = vor.u32 %v5330_v21, %v4609_v22 }
 0x195   : > { %v4292_v11 = vor.u32 %v5250_v33, %v4289_v36  ;;  %v4257_v9 = vld [vmem:[%s8412_s2 + $0x18] sm:$0xf0]  ;;  %v4740_v50 = vor.u32 %v5362_v51, %v4737_v26  ;;  %v5358_v20 = vld [vmem:[%s8412_s2 + $0x3ac] sm:$0xf] }
 0x196   : > { %2476 = vmatpush.bf16.msrb.mxu0 %v4256_v59  ;;  %2489 = vmatpush.bf16.msrb.mxu1 %v4384_v12  ;;  %v4417_v59 = vld [vmem:[%s8412_s2 + $0x158] sm:$0xf0]  ;;  %v4528_v12 = vor.u32 %v5312_v47, %v4527_v44  ;;  %v4260_v46 = vor.u32 %v5242_v27, %v4257_v9  ;;  %v5354_v31 = vld [vmem:[%s8412_s2 + $0x38c] sm:$0xf]  ;;  %v5391_v27 = vld [vmem:[%s8413_s3 + $0xb0] sm:$0xf0] }
 0x197   : > { %v4420_v15 = vor.u32 %v5282_v52, %v4417_v59  ;;  %v4721_v38 = vld [vmem:[%s8412_s2 + $0x3b8] sm:$0xf0]  ;;  %v5350_v44 = vld [vmem:[%s8412_s2 + $0x36c] sm:$0xf] }
 0x198   : > { %2497 = vmatpush.bf16.msrb.mxu2 %v4592_v16  ;;  %2510 = vmatpush.bf16.msrb.mxu3 %v4720_v55  ;;  %v5366_v16 = vld [vmem:[%s8412_s2 + $0x3ec] sm:$0xf]  ;;  %v4753_v55 = vld [vmem:[%s8412_s2 + $0x3f8] sm:$0xf0]  ;;  %v4724_v32 = vor.u32 %v5358_v20, %v4721_v38  ;;  %v4927_v38 = vld [vmem:[%s8413_s3 + $0x150] sm:$0xf] }
 0x199   : > { %2477 = vmatmul.bf16.vlgmr.msrb.gmra.mxu0 %v7039_v19  ;;  %2490 = vmatmul.bf16.vlgmr.msrb.gmra.mxu1 %v7041_v62  ;;  %v4756_v18 = vor.u32 %v5366_v16, %v4753_v55  ;;  %v4705_v30 = vld [vmem:[%s8412_s2 + $0x398] sm:$0xf0]  ;;  %v5310_v52 = vld [vmem:[%s8412_s2 + $0x22c] sm:$0xf] }
 0x19a   : > { %2521 = vmatpush.bf16.msra.mxu0 %v4372_v35  ;;  %2534 = vmatpush.bf16.msra.mxu1 %v4500_v57  ;;  %v4639_v35 = vld [vmem:[%s8412_s2 + $0x308] sm:$0xf]  ;;  %v5340_v57 = vld [vmem:[%s8412_s2 + $0x314] sm:$0xf0]  ;;  %v4708_v43 = vor.u32 %v5354_v31, %v4705_v30  ;;  %v4689_v47 = vld [vmem:[%s8412_s2 + $0x378] sm:$0xf0] }
 0x19b   : > { %v4692_v58 = vor.u32 %v5350_v44, %v4689_v47  ;;  %v4529_v59 = vld [vmem:[%s8412_s2 + $0x238] sm:$0xf0]  ;;  %v5338_v4 = vld [vmem:[%s8412_s2 + $0x30c] sm:$0xf]  ;;  %v4915_v30 = vld [vmem:[%s8413_s3 + $0x138] sm:$0xf] }
 0x19c   : > { %2498 = vmatpush.bf16.msrb.mxu2 %v4576_v10  ;;  %2511 = vmatpush.bf16.msrb.mxu3 %v4704_v1  ;;  %v4276_v10 = vor.u32 %v5246_v7, %v4273_v63  ;;  %v4404_v1 = vor.u32 %v5278_v3, %v4401_v14  ;;  %v4641_v5 = vld [vmem:[%s8412_s2 + $0x318] sm:$0xf0] }
 0x19d   : > { %v7490_v26 = vld [vmem:[#allocation9] sm:$0xf] }
 0x19e   : > { %2522 = vmatpush.bf16.msra.mxu0 %v4356_v13  ;;  %2535 = vmatpush.bf16.msra.mxu1 %v4484_v17  ;;  %v4512_v13 = vor.u32 %v5308_v29, %v4511_v0  ;;  %v4640_v17 = vor.u32 %v5340_v57, %v4639_v35  ;;  %v4532_v0 = vor.u32 %v5310_v52, %v4529_v59  ;;  %v5306_v35 = vld [vmem:[%s8412_s2 + $0x20c] sm:$0xf]  ;;  %v4513_v57 = vld [vmem:[%s8412_s2 + $0x218] sm:$0xf0] }
 0x19f   : > { %2451 = vmatmul.bf16.vlgmr.msra.gmra.mxu2 %v7193_v60  ;;  %2464 = vmatmul.bf16.vlgmr.msra.gmra.mxu3 %v7195_v8  ;;  %v5388_v20 = vld [vmem:[%s8413_s3 + $0x98] sm:$0xf0] }
 0x1a0   : > { %2499 = vmatpush.bf16.msrb.mxu2 %v4560_v39  ;;  %2512 = vmatpush.bf16.msrb.mxu3 %v4688_v54  ;;  %v4593_v54 = vld [vmem:[%s8412_s2 + $0x2b8] sm:$0xf0] }
 0x1a1   : > { %v4596_v40 = vor.u32 %v5326_v28, %v4593_v54  ;;  %v2589_v28 = vperm.slane %v7490_v26, 0  ;;  %v4831_v54 = vld [vmem:[%s8413_s3 + $0x90] sm:$0xf] }
 0x1a2   : > { %2523 = vmatpush.bf16.msra.mxu0 %v4340_v34  ;;  %2536 = vmatpush.bf16.msra.mxu1 %v4468_v49  ;;  %v5274_v34 = vld [vmem:[%s8412_s2 + $0x10c] sm:$0xf]  ;;  %v4385_v49 = vld [vmem:[%s8412_s2 + $0x118] sm:$0xf0] }
 0x1a3   : > { %v4388_v39 = vor.u32 %v5274_v34, %v4385_v49  ;;  %v4939_v34 = vld [vmem:[%s8413_s3 + $0x168] sm:$0xf]  ;;  %v5415_v49 = vld [vmem:[%s8413_s3 + $0x170] sm:$0xf0] }
 0x1a4   : > { %2500 = vmatpush.bf16.msrb.mxu2 %v4544_v45  ;;  %2513 = vmatpush.bf16.msrb.mxu3 %v4672_v6  ;;  %v5318_v45 = vld [vmem:[%s8412_s2 + $0x26c] sm:$0xf]  ;;  %v4561_v6 = vld [vmem:[%s8412_s2 + $0x278] sm:$0xf0] }
 0x1a5   : > { %v4564_v48 = vor.u32 %v5318_v45, %v4561_v6 }
 0x1a6   : > { %2524 = vmatpush.bf16.msra.mxu0 %v4324_v56  ;;  %2537 = vmatpush.bf16.msra.mxu1 %v4452_v41  ;;  %v5322_v56 = vld [vmem:[%s8412_s2 + $0x28c] sm:$0xf]  ;;  %v4577_v41 = vld [vmem:[%s8412_s2 + $0x298] sm:$0xf0] }
 0x1a7   : > { %v4580_v42 = vor.u32 %v5322_v56, %v4577_v41  ;;  %v4819_v56 = vld [vmem:[%s8413_s3 + $0x78] sm:$0xf]  ;;  %v5385_v41 = vld [vmem:[%s8413_s3 + $0x80] sm:$0xf0] }
 0x1a8   : > { %2501 = vmatpush.bf16.msrb.mxu2 %v4528_v12  ;;  %2514 = vmatpush.bf16.msrb.mxu3 %v4656_v24  ;;  %v5342_v12 = vld [vmem:[%s8412_s2 + $0x32c] sm:$0xf]  ;;  %v4657_v24 = vld [vmem:[%s8412_s2 + $0x338] sm:$0xf0]  ;;  %v4820_v44 = vor.u32 %v5385_v41, %v4819_v56 }
 0x1a9   : > { %v4660_v29 = vor.u32 %v5342_v12, %v4657_v24  ;;  %v4795_v24 = vld [vmem:[%s8413_s3 + $0x48] sm:$0xf]  ;;  %v5370_v56 = vld [vmem:[%s8413_s3 + $0x8] sm:$0xf0] }
 0x1aa   : > { %2525 = vmatpush.bf16.msra.mxu0 %v4308_v2  ;;  %2538 = vmatpush.bf16.msra.mxu1 %v4436_v25  ;;  %v5346_v2 = vld [vmem:[%s8412_s2 + $0x34c] sm:$0xf]  ;;  %v4673_v25 = vld [vmem:[%s8412_s2 + $0x358] sm:$0xf0] }
 0x1ab   : > { %v4676_v36 = vor.u32 %v5346_v2, %v4673_v25 }
 0x1ac   : > { %2502 = vmatpush.bf16.msrb.mxu2 %v4512_v13  ;;  %2515 = vmatpush.bf16.msrb.mxu3 %v4640_v17 }
 0x1ae   : > { %2526 = vmatpush.bf16.msra.mxu0 %v4292_v11  ;;  %2539 = vmatpush.bf16.msra.mxu1 %v4420_v15  ;;  %v4516_v11 = vor.u32 %v5306_v35, %v4513_v57  ;;  %v4644_v15 = vor.u32 %v5338_v4, %v4641_v5  ;;  %v5403_v35 = vld [vmem:[%s8413_s3 + $0x110] sm:$0xf0]  ;;  %v2590_v5 = vperm.slane %v7490_v26, 1 }
 0x1af   : > { %2503 = vmatmul.bf16.vlgmr.msrb.gmra.mxu2 %v7193_v60  ;;  %2516 = vmatmul.bf16.vlgmr.msrb.gmra.mxu3 %v7195_v8 }
 0x1b0   : > { %2547 = vmatpush.bf16.msra.mxu2 %v4628_v53  ;;  %2560 = vmatpush.bf16.msra.mxu3 %v4756_v18 }
 0x1b2   : > { %2527 = vmatpush.bf16.msra.mxu0 %v4276_v10  ;;  %2540 = vmatpush.bf16.msra.mxu1 %v4404_v1 }
 0x1b4   : > { %2548 = vmatpush.bf16.msra.mxu2 %v4612_v37  ;;  %2561 = vmatpush.bf16.msra.mxu3 %v4740_v50  ;;  %v4940_v50 = vor.u32 %v5415_v49, %v4939_v34 }
 0x1b6   : > { %2528 = vmatpush.bf16.msra.mxu0 %v4260_v46  ;;  %2541 = vmatpush.bf16.msra.mxu1 %v4388_v39 }
 0x1b8   : > { %2549 = vmatpush.bf16.msra.mxu2 %v4596_v40  ;;  %2562 = vmatpush.bf16.msra.mxu3 %v4724_v32  ;;  %v4832_v40 = vor.u32 %v5388_v20, %v4831_v54  ;;  %v5412_v32 = vld [vmem:[%s8413_s3 + $0x158] sm:$0xf0]  ;;  %v5373_v54 = vld [vmem:[%s8413_s3 + $0x20] sm:$0xf0]  ;;  %v4867_v20 = vld [vmem:[%s8413_s3 + $0xd8] sm:$0xf] }
 0x1b9   : > { %2529 = vmatmul.bf16.vlgmr.msra.gmra.mxu0 %v7039_v19  ;;  %2542 = vmatmul.bf16.vlgmr.msra.gmra.mxu1 %v7041_v62  ;;  %v5314_v19 = vld [vmem:[%s8412_s2 + $0x24c] sm:$0xf]  ;;  %v4545_v62 = vld [vmem:[%s8412_s2 + $0x258] sm:$0xf0]  ;;  %v4928_v31 = vor.u32 %v5412_v32, %v4927_v38  ;;  %v4759_v32 = vld [vmem:[%s8413_s3] sm:$0xf] }
 0x1ba   : > { %v4548_v33 = vor.u32 %v5314_v19, %v4545_v62  ;;  %3560 = vmatpush.bf16.msrb.mxu1 %v4940_v50  ;;  %v4903_v19 = vld [vmem:[%s8413_s3 + $0x120] sm:$0xf]  ;;  %v5406_v62 = vld [vmem:[%s8413_s3 + $0x128] sm:$0xf0] }
 0x1bb   : > { %v4904_v12 = vor.u32 %v5406_v62, %v4903_v19  ;;  %v4941_v19 = vld [vmem:[%s8413_s3 + $0x174] sm:$0xf0] }
 0x1bc   : > { %2550 = vmatpush.bf16.msra.mxu2 %v4580_v42  ;;  %2563 = vmatpush.bf16.msra.mxu3 %v4708_v43  ;;  %v5409_v42 = vld [vmem:[%s8413_s3 + $0x140] sm:$0xf0] }
 0x1bd   : > { %v4916_v47 = vor.u32 %v5409_v42, %v4915_v30  ;;  %v4855_v30 = vld [vmem:[%s8413_s3 + $0xc0] sm:$0xf]  ;;  %v5394_v42 = vld [vmem:[%s8413_s3 + $0xc8] sm:$0xf0] }
 0x1be   : > { %3561 = vmatpush.bf16.msrb.mxu1 %v4928_v31 }
 0x1c0   : > { %2551 = vmatpush.bf16.msra.mxu2 %v4564_v48  ;;  %2564 = vmatpush.bf16.msra.mxu3 %v4692_v58  ;;  %v4807_v48 = vld [vmem:[%s8413_s3 + $0x60] sm:$0xf]  ;;  %v5382_v58 = vld [vmem:[%s8413_s3 + $0x68] sm:$0xf0] }
 0x1c1   : > { %v4808_v52 = vor.u32 %v5382_v58, %v4807_v48  ;;  %v4856_v48 = vor.u32 %v5394_v42, %v4855_v30  ;;  %v5457_v30 = vld [vmem:[%s8413_s3 + $0x2c0] sm:$0xf0] }
 0x1c2   : > { %3562 = vmatpush.bf16.msrb.mxu1 %v4916_v47 }
 0x1c4   : > { %2552 = vmatpush.bf16.msra.mxu2 %v4548_v33  ;;  %2565 = vmatpush.bf16.msra.mxu3 %v4676_v36 }
 0x1c6   : > { %3563 = vmatpush.bf16.msrb.mxu1 %v4904_v12  ;;  %v4929_v12 = vld [vmem:[%s8413_s3 + $0x15c] sm:$0xf0] }
 0x1c8   : > { %2553 = vmatpush.bf16.msra.mxu2 %v4532_v0  ;;  %2566 = vmatpush.bf16.msra.mxu3 %v4660_v29  ;;  %v5379_v0 = vld [vmem:[%s8413_s3 + $0x50] sm:$0xf0]  ;;  %v4891_v29 = vld [vmem:[%s8413_s3 + $0x108] sm:$0xf] }
 0x1cc   : > { %2554 = vmatpush.bf16.msra.mxu2 %v4516_v11  ;;  %2567 = vmatpush.bf16.msra.mxu3 %v4644_v15  ;;  %v4796_v15 = vor.u32 %v5379_v0, %v4795_v24 }
 0x1cf   : > { %2555 = vmatmul.bf16.vlgmr.msra.gmra.mxu2 %v7193_v60  ;;  %2568 = vmatmul.bf16.vlgmr.msra.gmra.mxu3 %v7195_v8  ;;  %v4843_v8 = vld [vmem:[%s8413_s3 + $0xa8] sm:$0xf] }
 0x1d0   : > { %v4844_v9 = vor.u32 %v5391_v27, %v4843_v8 }
 0x1d2   : > { %3547 = vmatpush.bf16.msrb.mxu0 %v4844_v9 }
 0x1d6   : > { %3548 = vmatpush.bf16.msrb.mxu0 %v4832_v40  ;;  %v5397_v40 = vld [vmem:[%s8413_s3 + $0xe0] sm:$0xf0] }
 0x1d7   : > { %v4868_v31 = vor.u32 %v5397_v40, %v4867_v20  ;;  %v4905_v40 = vld [vmem:[%s8413_s3 + $0x12c] sm:$0xf0] }
 0x1da   : > { %3549 = vmatpush.bf16.msrb.mxu0 %v4820_v44 }
 0x1de   : > { %3550 = vmatpush.bf16.msrb.mxu0 %v4808_v52 }
 0x1e2   : > { %3551 = vmatpush.bf16.msrb.mxu0 %v4796_v15  ;;  %v5439_v15 = vld [vmem:[%s8413_s3 + $0x230] sm:$0xf0] }
 0x1f6   : > { %v2374_v16 = vpop.f32.mrf.mxu0  ;;  %v2387_v55 = vpop.f32.mrf.mxu1 }
 0x1f7   : > { %v2388_v53 = vadd.f32 %v2387_v55, %v2374_v16  ;;  %v4892_v55 = vor.u32 %v5403_v35, %v4891_v29 }
 0x1f9   : > { %3564 = vmatpush.bf16.msrb.mxu1 %v4892_v55 }
 0x1fe   : > { %v2376_v7 = vpop.f32.mrf.mxu0  ;;  %v2389_v63 = vpop.f32.mrf.mxu1 }
 0x1ff   : > { %v4783_v7 = vld [vmem:[%s8413_s3 + $0x30] sm:$0xf]  ;;  %v5376_v63 = vld [vmem:[%s8413_s3 + $0x38] sm:$0xf0] }
 0x206   : > { %v2426_v3 = vpop.f32.mrf.mxu0  ;;  %v2439_v14 = vpop.f32.mrf.mxu1 }
 0x207   : > { %v2440_v2 = vadd.f32 %v2439_v14, %v2426_v3  ;;  %v4879_v14 = vld [vmem:[%s8413_s3 + $0xf0] sm:$0xf] }
 0x20e   : > { %v2428_v13 = vpop.f32.mrf.mxu0  ;;  %v2441_v17 = vpop.f32.mrf.mxu1 }
 0x20f   : > { %v5400_v13 = vld [vmem:[%s8413_s3 + $0xf8] sm:$0xf0] }
 0x212   : > { %v2400_v18 = vpop.f32.mrf.mxu2  ;;  %v2413_v21 = vpop.f32.mrf.mxu3 }
 0x213   : > { %v2401_v22 = vadd.f32 %v2400_v18, %v2388_v53 }
 0x215   : > { %v2414_v10 = vadd.f32 %v2413_v21, %v2401_v22  ;;  %v4784_v22 = vor.u32 %v5376_v63, %v4783_v7  ;;  %v4821_v7 = vld [vmem:[%s8413_s3 + $0x84] sm:$0xf0] }
 0x216   : > { %v2478_v1 = vpop.f32.mrf.mxu0  ;;  %v2491_v51 = vpop.f32.mrf.mxu1 }
 0x217   : > { %v7492_v60 = vadd.f32 %v2491_v51, %v2478_v1  ;;  %v7506_v37 = vmax.f32 %v2414_v10, 0.0  ;;  %v4880_v10 = vor.u32 %v5400_v13, %v4879_v14  ;;  %3552 = vmatpush.bf16.msrb.mxu0 %v4784_v22  ;;  %v5463_v14 = vld [vmem:[%s8413_s3 + $0x2f0] sm:$0xf0]  ;;  %v5023_v22 = vld [vmem:[%s8413_s3 + $0x210] sm:$0xf] }
 0x219   : > { %v2597_v43 = vsub.f32 %v7506_v37, %v2589_v28  ;;  %3565 = vmatpush.bf16.msrb.mxu1 %v4880_v10  ;;  %v5436_v10 = vld [vmem:[%s8413_s3 + $0x218] sm:$0xf0] }
 0x21a   : > { %v2402_v46 = vpop.f32.mrf.mxu2  ;;  %v2415_v39 = vpop.f32.mrf.mxu3 }
 0x21b   : > { %v2601_v25 = vand.u32 2147483647, %v2597_v43  ;;  %v4771_v39 = vld [vmem:[%s8413_s3 + $0x18] sm:$0xf]  ;;  %v5390_v43 = vld [vmem:[%s8413_s3 + $0xac] sm:$0xf] }
 0x21c   : > { %v4772_v38 = vor.u32 %v5373_v54, %v4771_v39  ;;  %v5024_v39 = vor.u32 %v5436_v10, %v5023_v22  ;;  %v5460_v54 = vld [vmem:[%s8413_s3 + $0x2d8] sm:$0xf0] }
 0x21d   : > { %vm2605_vm2 = vcmp.ge.f32.partialorder %v2601_v25, 0.1  ;;  %3566 = vmatpush.bf16.msrb.mxu1 %v4868_v31  ;;  %v4833_v25 = vld [vmem:[%s8413_s3 + $0x9c] sm:$0xf0]  ;;  %v5107_v31 = vld [vmem:[%s8413_s3 + $0x2b8] sm:$0xf] }
 0x21e   : > { %v2480_v45 = vpop.f32.mrf.mxu0  ;;  %v2493_v6 = vpop.f32.mrf.mxu1  ;;  %v7559_v57 = vsel %vm2605_vm2, %v7506_v37, %v2589_v28  ;;  %3553 = vmatpush.bf16.msrb.mxu0 %v4772_v38  ;;  %v5405_v38 = vld [vmem:[%s8413_s3 + $0x124] sm:$0xf]  ;;  %v5396_v10 = vld [vmem:[%s8413_s3 + $0xdc] sm:$0xf] }
 0x21f   : > { %v2625_v11 = vrot.slane %v7559_v57, 7  ;;  %v4760_v45 = vor.u32 %v5370_v56, %v4759_v32  ;;  %v4845_v6 = vld [vmem:[%s8413_s3 + $0xb4] sm:$0xf0] }
 0x220   : > { %v4848_v58 = vor.u32 %v5390_v43, %v4845_v6  ;;  %v5011_v56 = vld [vmem:[%s8413_s3 + $0x1f8] sm:$0xf]  ;;  %v5378_v43 = vld [vmem:[%s8413_s3 + $0x4c] sm:$0xf] }
 0x221   : > { %v2633_v3 = vsub.f32 %v7506_v37, %v2625_v11  ;;  %3567 = vmatpush.bf16.msrb.mxu1 %v4856_v48  ;;  %v5108_v48 = vor.u32 %v5457_v30, %v5107_v31 }
 0x222   : > { %v2452_v33 = vpop.f32.mrf.mxu2  ;;  %v2465_v36 = vpop.f32.mrf.mxu3  ;;  %3554 = vmatpush.bf16.msrb.mxu0 %v4760_v45  ;;  %v4797_v45 = vld [vmem:[%s8413_s3 + $0x54] sm:$0xf0] }
 0x223   : > { %v2453_v59 = vadd.f32 %v2452_v33, %v2440_v2  ;;  %v2637_v53 = vand.u32 2147483647, %v2633_v3  ;;  %v5387_v2 = vld [vmem:[%s8413_s3 + $0x94] sm:$0xf]  ;;  %v5131_v3 = vld [vmem:[%s8413_s3 + $0x2e8] sm:$0xf] }
 0x225   : > { %v2466_v4 = vadd.f32 %v2465_v36, %v2453_v59  ;;  %vm2641_vm9 = vcmp.ge.f32.partialorder %v2637_v53, 0.1  ;;  %v5411_v59 = vld [vmem:[%s8413_s3 + $0x154] sm:$0xf]  ;;  %v4917_v53 = vld [vmem:[%s8413_s3 + $0x144] sm:$0xf0] }
 0x226   : > { %v7580_v51 = vsel %vm2641_vm9, %v7506_v37, %v2625_v11  ;;  %3599 = vmatpush.bf16.msra.mxu0 %v4848_v58  ;;  %v5035_v11 = vld [vmem:[%s8413_s3 + $0x228] sm:$0xf]  ;;  %v4932_v55 = vor.u32 %v5411_v59, %v4929_v12  ;;  %v4999_v58 = vld [vmem:[%s8413_s3 + $0x1e0] sm:$0xf] }
 0x227   : > { %v7563_v16 = vmax.f32 %v2466_v4, 0.0  ;;  %v2661_v8 = vrot.slane %v7580_v51, 7  ;;  %v4836_v4 = vor.u32 %v5387_v2, %v4833_v25  ;;  %v5036_v63 = vor.u32 %v5439_v15, %v5035_v11  ;;  %v5454_v2 = vld [vmem:[%s8413_s3 + $0x2a8] sm:$0xf0]  ;;  %v4893_v25 = vld [vmem:[%s8413_s3 + $0x114] sm:$0xf0] }
 0x229   : > { %v2598_v17 = vsub.f32 %v7563_v16, %v2590_v5  ;;  %v2669_v46 = vsub.f32 %v7506_v37, %v2661_v8  ;;  %3573 = vmatpush.bf16.msrb.mxu2 %v5036_v63 }
 0x22a   : > { %v2454_v18 = vpop.f32.mrf.mxu2  ;;  %v2467_v21 = vpop.f32.mrf.mxu3  ;;  %3600 = vmatpush.bf16.msra.mxu0 %v4836_v4  ;;  %v4785_v4 = vld [vmem:[%s8413_s3 + $0x3c] sm:$0xf0] }
 0x22b   : > { %v2602_v1 = vand.u32 2147483647, %v2598_v17  ;;  %v2673_v47 = vand.u32 2147483647, %v2669_v46  ;;  %v5408_v17 = vld [vmem:[%s8413_s3 + $0x13c] sm:$0xf]  ;;  %v5132_v18 = vor.u32 %v5463_v14, %v5131_v3 }
 0x22c   : > { %v2591_v21 = vperm.slane %v7490_v26, 2  ;;  %v4809_v46 = vld [vmem:[%s8413_s3 + $0x6c] sm:$0xf0]  ;;  %v4920_v20 = vor.u32 %v5408_v17, %v4917_v53 }
 0x22d   : > { %vm2606_vm10 = vcmp.ge.f32.partialorder %v2602_v1, 0.1  ;;  %vm7649_vm13 = vcmp.ge.f32.partialorder %v2673_v47, 0.1  ;;  %v5119_v1 = vld [vmem:[%s8413_s3 + $0x2d0] sm:$0xf]  ;;  %3586 = vmatpush.bf16.msrb.mxu3 %v5132_v18  ;;  %3574 = vmatpush.bf16.msrb.mxu2 %v5024_v39 }
 0x22e   : > { %v7584_v27 = vsel %vm2606_vm10, %v7563_v16, %v2590_v5  ;;  %v5384_v5 = vld [vmem:[%s8413_s3 + $0x7c] sm:$0xf]  ;;  %v5120_v32 = vor.u32 %v5460_v54, %v5119_v1  ;;  %v5402_v47 = vld [vmem:[%s8413_s3 + $0x10c] sm:$0xf]  ;;  %v4869_v1 = vld [vmem:[%s8413_s3 + $0xe4] sm:$0xf0] }
 0x22f   : > { %v2626_v28 = vrot.slane %v7584_v27, 7  ;;  %v4896_v35 = vor.u32 %v5402_v47, %v4893_v25  ;;  %v5372_v18 = vld [vmem:[%s8413_s3 + $0x1c] sm:$0xf] }
 0x231   : > { %v7631_v44 = vsub.f32 %v7563_v16, %v2626_v28  ;;  %3587 = vmatpush.bf16.msrb.mxu3 %v5120_v32  ;;  %v4872_v32 = vor.u32 %v5396_v10, %v4869_v1  ;;  %v5451_v10 = vld [vmem:[%s8413_s3 + $0x290] sm:$0xf0] }
 0x232   : > { %v2504_v9 = vpop.f32.mrf.mxu2  ;;  %v2517_v34 = vpop.f32.mrf.mxu3 }
 0x233   : > { %v2505_v41 = vadd.f32 %v2504_v9, %v7492_v60  ;;  %v5414_v60 = vld [vmem:[%s8413_s3 + $0x16c] sm:$0xf]  ;;  %v2638_v29 = vand.u32 2147483647, %v7631_v44  ;;  %v4824_v9 = vor.u32 %v5384_v5, %v4821_v7  ;;  %v5399_v5 = vld [vmem:[%s8413_s3 + $0xf4] sm:$0xf] }
 0x234   : > { %v4944_v62 = vor.u32 %v5414_v60, %v4941_v19  ;;  %v7728_v60 = vsel %vm7649_vm13, %v7506_v37, %v2661_v8  ;;  %v5430_v19 = vld [vmem:[%s8413_s3 + $0x1e8] sm:$0xf0]  ;;  %v5095_v8 = vld [vmem:[%s8413_s3 + $0x2a0] sm:$0xf] }
 0x235   : > { %v2518_v33 = vadd.f32 %v2517_v34, %v2505_v41  ;;  %v5381_v34 = vld [vmem:[%s8413_s3 + $0x64] sm:$0xf]  ;;  %3601 = vmatpush.bf16.msra.mxu0 %v4824_v9  ;;  %vm2642_vm14 = vcmp.ge.f32.partialorder %v2638_v29, 0.1  ;;  %v5000_v59 = vor.u32 %v5430_v19, %v4999_v58  ;;  %3588 = vmatpush.bf16.msrb.mxu3 %v5108_v48 }
 0x236   : > { %v7586_v49 = vpop.f32.mrf.mxu0  ;;  %v7588_v50 = vpop.f32.mrf.mxu1  ;;  %3612 = vmatpush.bf16.msra.mxu1 %v4944_v62  ;;  %v5433_v41 = vld [vmem:[%s8413_s3 + $0x200] sm:$0xf0]  ;;  %v4812_v44 = vor.u32 %v5381_v34, %v4809_v46  ;;  %v4908_v62 = vor.u32 %v5405_v38, %v4905_v40 }
 0x237   : > { %v7671_v13 = vmax.f32 %v2518_v33, 0.0  ;;  %v5012_v6 = vor.u32 %v5433_v41, %v5011_v56  ;;  %v7751_v33 = vsel %vm2642_vm14, %v7563_v16, %v2626_v28  ;;  %v5375_v28 = vld [vmem:[%s8413_s3 + $0x34] sm:$0xf]  ;;  %v2544_v31 = vadd.f32 %v7588_v50, %v7586_v49 }
 0x238   : > { %v2662_v12 = vrot.slane %v7751_v33, 7  ;;  %v4788_v14 = vor.u32 %v5375_v28, %v4785_v4  ;;  %v5393_v28 = vld [vmem:[%s8413_s3 + $0xc4] sm:$0xf] }
 0x239   : > { %v2599_v42 = vsub.f32 %v7671_v13, %v2591_v21  ;;  %3575 = vmatpush.bf16.msrb.mxu2 %v5012_v6  ;;  %3602 = vmatpush.bf16.msra.mxu0 %v4812_v44 }
 0x23a   : > { %v2506_v36 = vpop.f32.mrf.mxu2  ;;  %v2519_v52 = vpop.f32.mrf.mxu3  ;;  %3613 = vmatpush.bf16.msra.mxu1 %v4932_v55  ;;  %v2670_v11 = vsub.f32 %v7563_v16, %v2662_v12  ;;  %v4881_v55 = vld [vmem:[%s8413_s3 + $0xfc] sm:$0xf0] }
 0x23b   : > { %v2697_v36 = vrot.slane %v7728_v60, 7  ;;  %v2603_v52 = vand.u32 2147483647, %v2599_v42  ;;  %v4884_v53 = vor.u32 %v5399_v5, %v4881_v55 }
 0x23c   : > { %v2674_v3 = vand.u32 2147483647, %v2670_v11  ;;  %v4857_v11 = vld [vmem:[%s8413_s3 + $0xcc] sm:$0xf0] }
 0x23d   : > { %v2705_v29 = vsub.f32 %v7506_v37, %v2697_v36  ;;  %vm2607_vm0 = vcmp.ge.f32.partialorder %v2603_v52, 0.1  ;;  %3576 = vmatpush.bf16.msrb.mxu2 %v5000_v59  ;;  %v2592_v52 = vperm.slane %v7490_v26, 3  ;;  %v4761_v26 = vld [vmem:[%s8413_s3 + $0xc] sm:$0xf0] }
 0x23e   : > { %v2532_v24 = vpop.f32.mrf.mxu0  ;;  %v2545_v0 = vpop.f32.mrf.mxu1  ;;  %3614 = vmatpush.bf16.msra.mxu1 %v4920_v20  ;;  %v7767_v15 = vsel %vm2607_vm0, %v7671_v13, %v2591_v21  ;;  %v4773_v21 = vld [vmem:[%s8413_s3 + $0x24] sm:$0xf0]  ;;  %vm2678_vm2 = vcmp.ge.f32.partialorder %v2674_v3, 0.1 }
 0x23f   : > { %v4800_v24 = vor.u32 %v5378_v43, %v4797_v45  ;;  %v5096_v0 = vor.u32 %v5454_v2, %v5095_v8  ;;  %v2709_v7 = vand.u32 2147483647, %v2705_v29  ;;  %v2627_v63 = vrot.slane %v7767_v15, 7 }
 0x240   : > { %v7790_v9 = vsel %vm2678_vm2, %v7563_v16, %v2662_v12  ;;  %v4776_v20 = vor.u32 %v5372_v18, %v4773_v21  ;;  %v5083_v21 = vld [vmem:[%s8413_s3 + $0x288] sm:$0xf] }
 0x241   : > { %3603 = vmatpush.bf16.msra.mxu0 %v4800_v24  ;;  %3589 = vmatpush.bf16.msrb.mxu3 %v5096_v0  ;;  %vm2713_vm15 = vcmp.ge.f32.partialorder %v2709_v7, 0.1  ;;  %v2635_v17 = vsub.f32 %v7671_v13, %v2627_v63  ;;  %v2698_v54 = vrot.slane %v7790_v9, 7 }
 0x242   : > { %3615 = vmatpush.bf16.msra.mxu1 %v4908_v62  ;;  %v7781_v22 = vsel %vm2713_vm15, %v7506_v37, %v2697_v36 }
 0x243   : > { %v2733_v34 = vrot.slane %v7781_v22, 7  ;;  %v2639_v40 = vand.u32 2147483647, %v2635_v17  ;;  %v2706_v56 = vsub.f32 %v7563_v16, %v2698_v54  ;;  %v4987_v17 = vld [vmem:[%s8413_s3 + $0x1c8] sm:$0xf] }
 0x245   : > { %3604 = vmatpush.bf16.msra.mxu0 %v4788_v14  ;;  %v2741_v38 = vsub.f32 %v7506_v37, %v2733_v34  ;;  %v2710_v30 = vand.u32 2147483647, %v2706_v56  ;;  %vm2643_vm10 = vcmp.ge.f32.partialorder %v2639_v40, 0.1  ;;  %v5424_v56 = vld [vmem:[%s8413_s3 + $0x1b8] sm:$0xf0] }
 0x246   : > { %3616 = vmatpush.bf16.msra.mxu1 %v4896_v35  ;;  %v7807_v49 = vsel %vm2643_vm10, %v7671_v13, %v2627_v63  ;;  %v5369_v35 = vld [vmem:[%s8413_s3 + $0x4] sm:$0xf]  ;;  %v4860_v63 = vor.u32 %v5393_v28, %v4857_v11  ;;  %v5047_v11 = vld [vmem:[%s8413_s3 + $0x240] sm:$0xf] }
 0x247   : > { %v2745_v41 = vand.u32 2147483647, %v2741_v38  ;;  %vm2714_vm13 = vcmp.ge.f32.partialorder %v2710_v30, 0.1  ;;  %v2663_v8 = vrot.slane %v7807_v49, 7  ;;  %v4764_v5 = vor.u32 %v5369_v35, %v4761_v26 }
 0x248   : > { %v7802_v45 = vsel %vm2714_vm13, %v7563_v16, %v2698_v54  ;;  %v2649_v38 = vperm.slane %v7580_v51, 1  ;;  %v5071_v51 = vld [vmem:[%s8413_s3 + $0x270] sm:$0xf]  ;;  %v2721_v35 = vperm.slane %v7781_v22, 3 }
 0x249   : > { %3605 = vmatpush.bf16.msra.mxu0 %v4776_v20  ;;  %vm2749_vm9 = vcmp.ge.f32.partialorder %v2745_v41, 0.1  ;;  %v2734_v48 = vrot.slane %v7802_v45, 7  ;;  %v2671_v24 = vsub.f32 %v7671_v13, %v2663_v8  ;;  %v2685_v41 = vperm.slane %v7728_v60, 2  ;;  %v4963_v60 = vld [vmem:[%s8413_s3 + $0x198] sm:$0xf] }
 0x24a   : > { %3617 = vmatpush.bf16.msra.mxu1 %v4884_v53  ;;  %v7799_v43 = vsel %vm2749_vm9, %v7506_v37, %v2733_v34  ;;  %v5427_v53 = vld [vmem:[%s8413_s3 + $0x1d0] sm:$0xf0]  ;;  %v5084_v34 = vor.u32 %v5451_v10, %v5083_v21 }
 0x24b   : > { %v2769_v6 = vrot.slane %v7799_v43, 7  ;;  %v2742_v19 = vsub.f32 %v7563_v16, %v2734_v48  ;;  %v2675_v3 = vand.u32 2147483647, %v2671_v24  ;;  %v4988_v18 = vor.u32 %v5427_v53, %v4987_v17  ;;  %v5037_v17 = vld [vmem:[%s8413_s3 + $0x234] sm:$0xf0] }
 0x24c   : > { %3590 = vmatpush.bf16.msrb.mxu3 %v5084_v34  ;;  %v5462_v53 = vld [vmem:[%s8413_s3 + $0x2ec] sm:$0xf]  ;;  %v5133_v34 = vld [vmem:[%s8413_s3 + $0x2f4] sm:$0xf0] }
 0x24d   : > { %v2777_v50 = vsub.f32 %v7506_v37, %v2769_v6  ;;  %v2746_v2 = vand.u32 2147483647, %v2742_v19  ;;  %3606 = vmatpush.bf16.msra.mxu0 %v4764_v5  ;;  %3577 = vmatpush.bf16.msrb.mxu2 %v4988_v18  ;;  %vm7879_vm10 = vcmp.ge.f32.partialorder %v2675_v3, 0.1  ;;  %v2722_v18 = vperm.slane %v7802_v45, 3 }
 0x24e   : > { %3618 = vmatpush.bf16.msra.mxu1 %v4872_v32  ;;  %v4975_v32 = vld [vmem:[%s8413_s3 + $0x1b0] sm:$0xf]  ;;  %v7925_v22 = vsel %vm7879_vm10, %v7671_v13, %v2663_v8  ;;  %v5435_v45 = vld [vmem:[%s8413_s3 + $0x214] sm:$0xf] }
 0x24f   : > { %v2781_v62 = vand.u32 2147483647, %v2777_v50  ;;  %vm2750_vm0 = vcmp.ge.f32.partialorder %v2746_v2, 0.1  ;;  %v4976_v30 = vor.u32 %v5424_v56, %v4975_v32  ;;  %v5445_v2 = vld [vmem:[%s8413_s3 + $0x260] sm:$0xf0] }
 0x250   : > { %v7819_v59 = vsel %vm2750_vm0, %v7563_v16, %v2734_v48  ;;  %v5421_v48 = vld [vmem:[%s8413_s3 + $0x1a0] sm:$0xf0] }
 0x251   : > { %vm2785_vm14 = vcmp.ge.f32.partialorder %v2781_v62, 0.1  ;;  %v2770_v0 = vrot.slane %v7819_v59, 7  ;;  %3578 = vmatpush.bf16.msrb.mxu2 %v4976_v30  ;;  %v4964_v19 = vor.u32 %v5421_v48, %v4963_v60  ;;  %v5059_v62 = vld [vmem:[%s8413_s3 + $0x258] sm:$0xf] }
 0x252   : > { %v2556_v46 = vpop.f32.mrf.mxu2  ;;  %v2569_v39 = vpop.f32.mrf.mxu3  ;;  %v7815_v36 = vsel %vm2785_vm14, %v7506_v37, %v2769_v6  ;;  %3619 = vmatpush.bf16.msra.mxu1 %v4860_v63  ;;  %v5060_v24 = vor.u32 %v5445_v2, %v5059_v62  ;;  %v5121_v30 = vld [vmem:[%s8413_s3 + $0x2dc] sm:$0xf0]  ;;  %v5432_v48 = vld [vmem:[%s8413_s3 + $0x1fc] sm:$0xf] }
 0x253   : > { %v2557_v42 = vadd.f32 %v2556_v46, %v2544_v31  ;;  %v2805_v12 = vrot.slane %v7815_v36, 7  ;;  %v2778_v4 = vsub.f32 %v7563_v16, %v2770_v0 }
 0x255   : > { %v2570_v58 = vadd.f32 %v2569_v39, %v2557_v42  ;;  %v2813_v29 = vsub.f32 %v7506_v37, %v2805_v12  ;;  %v2782_v14 = vand.u32 2147483647, %v2778_v4  ;;  %v2613_v39 = vperm.slane %v7559_v57, 0  ;;  %v5448_v42 = vld [vmem:[%s8413_s3 + $0x278] sm:$0xf0]  ;;  %3579 = vmatpush.bf16.msrb.mxu2 %v4964_v19 }
 0x256   : > { %v2614_v57 = vperm.slane %v7584_v27, 0  ;;  %v2757_v4 = vperm.slane %v7799_v43, 4 }
 0x257   : > { %v7812_v25 = vmax.f32 %v2570_v58, 0.0  ;;  %v2817_v7 = vand.u32 2147483647, %v2813_v29  ;;  %vm2786_vm2 = vcmp.ge.f32.partialorder %v2782_v14, 0.1  ;;  %v2617_v50 = vsel %vm292_vm3, %v2613_v39, %v7506_v37 }
 0x258   : > { %v7858_v54 = vsel %vm2786_vm2, %v7563_v16, %v2770_v0  ;;  %v2686_v29 = vperm.slane %v7790_v9, 2  ;;  %v2653_v28 = vsel %vm320_vm4, %v2649_v38, %v2617_v50  ;;  %v4951_v9 = vld [vmem:[%s8413_s3 + $0x180] sm:$0xf]  ;;  %v2618_v43 = vsel %vm292_vm3, %v2614_v57, %v7563_v16  ;;  %v5438_v14 = vld [vmem:[%s8413_s3 + $0x22c] sm:$0xf] }
 0x259   : > { %v2600_v55 = vsub.f32 %v7812_v25, %v2592_v52  ;;  %vm2821_vm15 = vcmp.ge.f32.partialorder %v2817_v7, 0.1  ;;  %v2806_v40 = vrot.slane %v7858_v54, 7  ;;  %v2689_v63 = vsel %vm348_vm6, %v2685_v41, %v2653_v28  ;;  %v5013_v50 = vld [vmem:[%s8413_s3 + $0x204] sm:$0xf0] }
 0x25a   : > { %v2558_v44 = vpop.f32.mrf.mxu2  ;;  %v2571_v47 = vpop.f32.mrf.mxu3  ;;  %v7854_v1 = vsel %vm2821_vm15, %v7506_v37, %v2805_v12  ;;  %v2650_v12 = vperm.slane %v7751_v33, 1  ;;  %v5040_v10 = vor.u32 %v5438_v14, %v5037_v17  ;;  %v2758_v39 = vperm.slane %v7819_v59, 4  ;;  %v5459_v59 = vld [vmem:[%s8413_s3 + $0x2d4] sm:$0xf] }
 0x25b   : > { %v2604_v46 = vand.u32 2147483647, %v2600_v55  ;;  %v2841_v20 = vrot.slane %v7854_v1, 7  ;;  %v2814_v6 = vsub.f32 %v7563_v16, %v2806_v40  ;;  %v5072_v44 = vor.u32 %v5448_v42, %v5071_v51  ;;  %v5442_v55 = vld [vmem:[%s8413_s3 + $0x248] sm:$0xf0] }
 0x25c   : > { %v2654_v8 = vsel %vm320_vm4, %v2650_v12, %v2618_v43  ;;  %v5048_v3 = vor.u32 %v5442_v55, %v5047_v11  ;;  %v2794_v38 = vperm.slane %v7858_v54, 5  ;;  %v2725_v56 = vsel %vm376_vm7, %v2721_v35, %v2689_v63  ;;  %v5429_v43 = vld [vmem:[%s8413_s3 + $0x1e4] sm:$0xf]  ;;  %v5416_v11 = vld [vmem:[%s8413_s3 + $0x178] sm:$0xf0] }
 0x25d   : > { %v2849_v31 = vsub.f32 %v7506_v37, %v2841_v20  ;;  %vm2608_vm9 = vcmp.ge.f32.partialorder %v2604_v46, 0.1  ;;  %v2818_v58 = vand.u32 2147483647, %v2814_v6  ;;  %3591 = vmatpush.bf16.msrb.mxu3 %v5072_v44  ;;  %v2699_v46 = vrot.slane %v7925_v22, 7 }
 0x25e   : > { %v7900_v0 = vsel %vm2608_vm9, %v7812_v25, %v2592_v52  ;;  %v2690_v32 = vsel %vm348_vm6, %v2686_v29, %v2654_v8  ;;  %v2829_v54 = vperm.slane %v7854_v1, 6  ;;  %v3703_v44 = vld [vmem:[#allocation10] sm:$0x77]  ;;  %v5124_v1 = vor.u32 %v5459_v59, %v5121_v30  ;;  %v5001_v55 = vld [vmem:[%s8413_s3 + $0x1ec] sm:$0xf0] }
 0x25f   : > { %v2853_v27 = vand.u32 2147483647, %v2849_v31  ;;  %vm2822_vm14 = vcmp.ge.f32.partialorder %v2818_v58, 0.1  ;;  %v2628_v7 = vrot.slane %v7900_v0, 7  ;;  %v2726_v42 = vsel %vm376_vm7, %v2722_v18, %v2690_v32 }
 0x260   : > { %v7911_v33 = vsel %vm2822_vm14, %v7563_v16, %v2806_v40  ;;  %v5136_v40 = vor.u32 %v5462_v53, %v5133_v34  ;;  %v2761_v47 = vsel %vm404_vm8, %v2757_v4, %v2725_v56  ;;  %v5456_v58 = vld [vmem:[%s8413_s3 + $0x2bc] sm:$0xf]  ;;  %v8001_v19 = vsub.f32 %v7671_v13, %v2699_v46  ;;  %v5453_v63 = vld [vmem:[%s8413_s3 + $0x2a4] sm:$0xf]  ;;  %v4839_v34 = vld [vmem:[%s8413_s3 + $0x98] sm:$0xf] }
 0x261   : > { %vm2857_vm13 = vcmp.ge.f32.partialorder %v2853_v27, 0.1  ;;  %v2842_v52 = vrot.slane %v7911_v33, 7  ;;  %3592 = vmatpush.bf16.msrb.mxu3 %v5060_v24  ;;  %v2830_v41 = vperm.slane %v7911_v33, 6  ;;  %v2636_v51 = vsub.f32 %v7812_v25, %v2628_v7  ;;  %v5109_v24 = vld [vmem:[%s8413_s3 + $0x2c4] sm:$0xf0] }
 0x262   : > { %v7905_v26 = vsel %vm2857_vm13, %v7506_v37, %v2841_v20  ;;  %v5418_v37 = vld [vmem:[%s8413_s3 + $0x188] sm:$0xf0]  ;;  %v2793_v20 = vperm.slane %v7815_v36, 5  ;;  %v5025_v36 = vld [vmem:[%s8413_s3 + $0x21c] sm:$0xf0]  ;;  %v2762_v27 = vsel %vm404_vm8, %v2758_v39, %v2726_v42  ;;  %v5016_v12 = vor.u32 %v5432_v48, %v5013_v50 }
 0x263   : > { %2883 = vst [vmem:[#allocation1] sm:$0xff] %v7905_v26  ;;  %v4952_v5 = vor.u32 %v5418_v37, %v4951_v9  ;;  %v2850_v21 = vsub.f32 %v7563_v16, %v2842_v52  ;;  %v5028_v31 = vor.u32 %v5435_v45, %v5025_v36  ;;  %v2865_v6 = vperm.slane %v7905_v26, 7  ;;  %v4851_v9 = vld [vmem:[%s8413_s3 + $0xb0] sm:$0xf]  ;;  %v5392_v37 = vld [vmem:[%s8413_s3 + $0xb8] sm:$0xf0] }
 0x264   : > { %v2798_v62 = vsel %vm432_vm12, %v2794_v38, %v2762_v27  ;;  %v5112_v26 = vor.u32 %v5456_v58, %v5109_v24  ;;  %v2640_v28 = vand.u32 2147483647, %v2636_v51  ;;  %v5004_v8 = vor.u32 %v5429_v43, %v5001_v55  ;;  %v5389_v39 = vld [vmem:[%s8413_s3 + $0xa0] sm:$0xf0]  ;;  %v4989_v56 = vld [vmem:[%s8413_s3 + $0x1d4] sm:$0xf0] }
 0x265   : > { %3580 = vmatpush.bf16.msrb.mxu2 %v4952_v5  ;;  %v2854_v57 = vand.u32 2147483647, %v2850_v21  ;;  %3593 = vmatpush.bf16.msrb.mxu3 %v5048_v3  ;;  %v2834_v35 = vsel %vm460_vm1, %v2830_v41, %v2798_v62  ;;  %v4947_v5 = vld [vmem:[%s8413_s3 + $0x170] sm:$0xf]  ;;  %v2711_v18 = vand.u32 2147483647, %v8001_v19  ;;  %v4852_v21 = vor.u32 %v5392_v37, %v4851_v9 }
 0x266   : > { %v5097_v3 = vld [vmem:[%s8413_s3 + $0x2ac] sm:$0xf0]  ;;  %vm2644_vm15 = vcmp.ge.f32.partialorder %v2640_v28, 0.1  ;;  %v5413_v45 = vld [vmem:[%s8413_s3 + $0x160] sm:$0xf0]  ;;  %v4840_v30 = vor.u32 %v5389_v39, %v4839_v34 }
 0x267   : > { %vm2858_vm0 = vcmp.ge.f32.partialorder %v2854_v57, 0.1  ;;  %v8045_v53 = vsel %vm2644_vm15, %v7812_v25, %v2628_v7  ;;  %v5100_v32 = vor.u32 %v5453_v63, %v5097_v3  ;;  %v5450_v36 = vld [vmem:[%s8413_s3 + $0x28c] sm:$0xf]  ;;  %v5085_v59 = vld [vmem:[%s8413_s3 + $0x294] sm:$0xf0] }
 0x268   : > { %v2862_v60 = vsel %vm2858_vm0, %v7563_v16, %v2842_v52  ;;  %v2797_v16 = vsel %vm432_vm12, %v2793_v20, %v2761_v47  ;;  %v5426_v20 = vld [vmem:[%s8413_s3 + $0x1cc] sm:$0xf]  ;;  %v5423_v41 = vld [vmem:[%s8413_s3 + $0x1b4] sm:$0xf]  ;;  %v4827_v42 = vld [vmem:[%s8413_s3 + $0x80] sm:$0xf]  ;;  %v5088_v27 = vor.u32 %v5450_v36, %v5085_v59 }
 0x269   : > { %3625 = vmatpush.bf16.msra.mxu2 %v5040_v10  ;;  %3638 = vmatpush.bf16.msra.mxu3 %v5136_v40  ;;  %v2866_v2 = vperm.slane %v2862_v60, 7  ;;  %2884 = vst [vmem:[#allocation1 + $0x9] sm:$0xff] %v2862_v60  ;;  %v2833_v29 = vsel %vm460_vm1, %v2829_v54, %v2797_v16  ;;  %v4948_v10 = vor.u32 %v5416_v11, %v4947_v5  ;;  %v4935_v40 = vld [vmem:[%s8413_s3 + $0x158] sm:$0xf]  ;;  %v2664_v54 = vrot.slane %v8045_v53, 7 }
 0x26a   : > { %3707 = vst [vmem:[#allocation1] ss:$2 sm:$0xff] %v3703_v44  ;;  %v2869_v4 = vsel %vm488_vm5, %v2865_v6, %v2833_v29  ;;  %v4992_v57 = vor.u32 %v5426_v20, %v4989_v56  ;;  %v4936_v51 = vor.u32 %v5413_v45, %v4935_v40  ;;  %v5386_v6 = vld [vmem:[%s8413_s3 + $0x88] sm:$0xf0]  ;;  %vm2715_vm2 = vcmp.ge.f32.partialorder %v2711_v18, 0.1 }
 0x26b   : > { %v2870_v33 = vsel %vm488_vm5, %v2866_v2, %v2834_v35  ;;  %v2672_v44 = vsub.f32 %v7812_v25, %v2664_v54  ;;  %v5410_v47 = vld [vmem:[%s8413_s3 + $0x148] sm:$0xf0]  ;;  %v5447_v48 = vld [vmem:[%s8413_s3 + $0x274] sm:$0xf]  ;;  %v5073_v50 = vld [vmem:[%s8413_s3 + $0x27c] sm:$0xf0]  ;;  %v8107_v19 = vsel %vm2715_vm2, %v7671_v13, %v2699_v46 }
 0x26c   : > { %v2873_v52 = vpack.c.bf16 %v2870_v33, %v2869_v4  ;;  %v5420_v16 = vld [vmem:[%s8413_s3 + $0x19c] sm:$0xf]  ;;  %v4965_v62 = vld [vmem:[%s8413_s3 + $0x1a4] sm:$0xf0]  ;;  %v2735_v2 = vrot.slane %v8107_v19, 7  ;;  %v5076_v28 = vor.u32 %v5447_v48, %v5073_v50 }
 0x26d   : > { %3626 = vmatpush.bf16.msra.mxu2 %v5028_v31  ;;  %3639 = vmatpush.bf16.msra.mxu3 %v5124_v1  ;;  %v4977_v31 = vld [vmem:[%s8413_s3 + $0x1bc] sm:$0xf0]  ;;  %v2676_v58 = vand.u32 2147483647, %v2672_v44  ;;  %v4815_v29 = vld [vmem:[%s8413_s3 + $0x68] sm:$0xf]  ;;  %v4968_v9 = vor.u32 %v5420_v16, %v4965_v62 }
 0x26e   : > { %v3023_v14 = vunpack.c.l.b16 %v2873_v52  ;;  %v3024_v17 = vunpack.c.h.b16 %v2873_v52  ;;  %v4923_v1 = vld [vmem:[%s8413_s3 + $0x140] sm:$0xf]  ;;  %v4980_v60 = vor.u32 %v5423_v41, %v4977_v31  ;;  %v5383_v46 = vld [vmem:[%s8413_s3 + $0x70] sm:$0xf0]  ;;  %v4911_v35 = vld [vmem:[%s8413_s3 + $0x128] sm:$0xf]  ;;  %v2743_v33 = vsub.f32 %v7671_v13, %v2735_v2 }
 0x26f   : > { %v4924_v24 = vor.u32 %v5410_v47, %v4923_v1  ;;  %vm2680_vm9 = vcmp.ge.f32.partialorder %v2676_v58, 0.1  ;;  %v5444_v37 = vld [vmem:[%s8413_s3 + $0x25c] sm:$0xf]  ;;  %v5061_v43 = vld [vmem:[%s8413_s3 + $0x264] sm:$0xf0]  ;;  %v4816_v11 = vor.u32 %v5383_v46, %v4815_v29 }
 0x270   : > { %v8057_v38 = vpack.c.b16 %v3023_v14, %v3023_v14  ;;  %v8059_v7 = vpack.c.b16 %v3024_v17, %v3024_v17  ;;  %v8129_v4 = vsel %vm2680_vm9, %v7812_v25, %v2664_v54  ;;  %v2747_v5 = vand.u32 2147483647, %v2743_v33  ;;  %v5380_v63 = vld [vmem:[%s8413_s3 + $0x58] sm:$0xf0]  ;;  %v4899_v14 = vld [vmem:[%s8413_s3 + $0x110] sm:$0xf] }
 0x271   : > { %3627 = vmatpush.bf16.msra.mxu2 %v5016_v12  ;;  %3640 = vmatpush.bf16.msra.mxu3 %v5112_v26  ;;  %v4828_v12 = vor.u32 %v5386_v6, %v4827_v42  ;;  %v5407_v26 = vld [vmem:[%s8413_s3 + $0x130] sm:$0xf0]  ;;  %v2700_v52 = vrot.slane %v8129_v4, 7  ;;  %v5404_v17 = vld [vmem:[%s8413_s3 + $0x118] sm:$0xf0]  ;;  %v5064_v18 = vor.u32 %v5444_v37, %v5061_v43 }
 0x272   : > { %3555 = vmatmul.bf16.vlgmr.msrb.gmra.mxu0 %v8057_v38  ;;  %3568 = vmatmul.bf16.vlgmr.msrb.gmra.mxu1 %v8059_v7  ;;  %v4912_v55 = vor.u32 %v5407_v26, %v4911_v35  ;;  %vm2751_vm10 = vcmp.ge.f32.partialorder %v2747_v5, 0.1  ;;  %v4900_v20 = vor.u32 %v5404_v17, %v4899_v14  ;;  %v4791_v40 = vld [vmem:[%s8413_s3 + $0x38] sm:$0xf]  ;;  %v5377_v45 = vld [vmem:[%s8413_s3 + $0x40] sm:$0xf0] }
 0x273   : > { %3651 = vmatpush.bf16.msrb.mxu0 %v4852_v21  ;;  %3664 = vmatpush.bf16.msrb.mxu1 %v4948_v10  ;;  %v2708_v3 = vsub.f32 %v7812_v25, %v2700_v52  ;;  %v8153_v10 = vsel %vm2751_vm10, %v7671_v13, %v2735_v2  ;;  %v5401_v56 = vld [vmem:[%s8413_s3 + $0x100] sm:$0xf0]  ;;  %v4792_v41 = vor.u32 %v5377_v45, %v4791_v40  ;;  %v4875_v6 = vld [vmem:[%s8413_s3 + $0xe0] sm:$0xf]  ;;  %v5398_v44 = vld [vmem:[%s8413_s3 + $0xe8] sm:$0xf0] }
 0x274   : > { %v2771_v34 = vrot.slane %v8153_v10, 7  ;;  %v4876_v48 = vor.u32 %v5398_v44, %v4875_v6  ;;  %v4767_v50 = vld [vmem:[%s8413_s3 + $0x8] sm:$0xf]  ;;  %v5371_v58 = vld [vmem:[%s8413_s3 + $0x10] sm:$0xf0]  ;;  %v2687_v45 = vperm.slane %v7925_v22, 2 }
 0x275   : > { %3628 = vmatpush.bf16.msra.mxu2 %v5004_v8  ;;  %3641 = vmatpush.bf16.msra.mxu3 %v5100_v32  ;;  %v4803_v8 = vld [vmem:[%s8413_s3 + $0x50] sm:$0xf]  ;;  %v2712_v21 = vand.u32 2147483647, %v2708_v3  ;;  %v4887_v32 = vld [vmem:[%s8413_s3 + $0xf8] sm:$0xf]  ;;  %v4768_v35 = vor.u32 %v5371_v58, %v4767_v50 }
 0x276   : > { %v4804_v39 = vor.u32 %v5380_v63, %v4803_v8  ;;  %v2779_v36 = vsub.f32 %v7671_v13, %v2771_v34  ;;  %v4888_v31 = vor.u32 %v5401_v56, %v4887_v32  ;;  %v4863_v16 = vld [vmem:[%s8413_s3 + $0xc8] sm:$0xf]  ;;  %v5395_v62 = vld [vmem:[%s8413_s3 + $0xd0] sm:$0xf0]  ;;  %v5417_v46 = vld [vmem:[%s8413_s3 + $0x184] sm:$0xf] }
 0x277   : > { %3652 = vmatpush.bf16.msrb.mxu0 %v4840_v30  ;;  %3665 = vmatpush.bf16.msrb.mxu1 %v4936_v51  ;;  %vm2716_vm13 = vcmp.ge.f32.partialorder %v2712_v21, 0.1  ;;  %v4779_v30 = vld [vmem:[%s8413_s3 + $0x20] sm:$0xf]  ;;  %v5374_v51 = vld [vmem:[%s8413_s3 + $0x28] sm:$0xf0]  ;;  %v4864_v26 = vor.u32 %v5395_v62, %v4863_v16 }
 0x278   : > { %v2783_v54 = vand.u32 2147483647, %v2779_v36  ;;  %v4953_v33 = vld [vmem:[%s8413_s3 + $0x18c] sm:$0xf0]  ;;  %v2688_v32 = vperm.slane %v8129_v4, 2  ;;  %v2759_v22 = vperm.slane %v8153_v10, 4 }
 0x279   : > { %3629 = vmatpush.bf16.msra.mxu2 %v4992_v57  ;;  %3642 = vmatpush.bf16.msra.mxu3 %v5088_v27  ;;  %v8169_v57 = vsel %vm2716_vm13, %v7812_v25, %v2700_v52  ;;  %v5049_v37 = vld [vmem:[%s8413_s3 + $0x24c] sm:$0xf0]  ;;  %v4956_v43 = vor.u32 %v5417_v46, %v4953_v33  ;;  %v3704_v46 = vld [vmem:[#allocation10 + $0x8] sm:$0x7] }
 0x27a   : > { %v2736_v59 = vrot.slane %v8169_v57, 7  ;;  %vm2787_vm14 = vcmp.ge.f32.partialorder %v2783_v54, 0.1  ;;  %v2724_v36 = vperm.slane %v8169_v57, 3  ;;  %v5043_v16 = vld [vmem:[%s8413_s3 + $0x230] sm:$0xf] }
 0x27b   : > { %3653 = vmatpush.bf16.msrb.mxu0 %v4828_v12  ;;  %3666 = vmatpush.bf16.msrb.mxu1 %v4924_v24  ;;  %v8189_v47 = vsel %vm2787_vm14, %v7671_v13, %v2771_v34  ;;  %v2615_v34 = vperm.slane %v7767_v15, 0  ;;  %v2723_v15 = vperm.slane %v8107_v19, 3  ;;  %v5437_v33 = vld [vmem:[%s8413_s3 + $0x220] sm:$0xf0] }
 0x27c   : > { %v2744_v42 = vsub.f32 %v7812_v25, %v2736_v59  ;;  %v2807_v27 = vrot.slane %v8189_v47, 7  ;;  %v2795_v19 = vperm.slane %v8189_v47, 5 }
 0x27d   : > { %3630 = vmatpush.bf16.msra.mxu2 %v4980_v60  ;;  %3643 = vmatpush.bf16.msra.mxu3 %v5076_v28  ;;  %v4780_v60 = vor.u32 %v5374_v51, %v4779_v30  ;;  %v2619_v56 = vsel %vm292_vm3, %v2615_v34, %v7671_v13  ;;  %v5103_v34 = vld [vmem:[%s8413_s3 + $0x2a8] sm:$0xf] }
 0x27e   : > { %v2748_v1 = vand.u32 2147483647, %v2744_v42  ;;  %v2815_v12 = vsub.f32 %v7671_v13, %v2807_v27 }
 0x27f   : > { %3654 = vmatpush.bf16.msrb.mxu0 %v4816_v11  ;;  %3667 = vmatpush.bf16.msrb.mxu1 %v4912_v55 }
 0x280   : > { %vm2752_vm0 = vcmp.ge.f32.partialorder %v2748_v1, 0.1  ;;  %v2819_v29 = vand.u32 2147483647, %v2815_v12  ;;  %v5139_v12 = vld [vmem:[%s8413_s3 + $0x2f0] sm:$0xf] }
 0x281   : > { %3631 = vmatpush.bf16.msra.mxu2 %v4968_v9  ;;  %3644 = vmatpush.bf16.msra.mxu3 %v5064_v18  ;;  %v8205_v2 = vsel %vm2752_vm0, %v7812_v25, %v2736_v59  ;;  %v5441_v9 = vld [vmem:[%s8413_s3 + $0x244] sm:$0xf] }
 0x282   : > { %3607 = vmatmul.bf16.vlgmr.msra.gmra.mxu0 %v8057_v38  ;;  %3620 = vmatmul.bf16.vlgmr.msra.gmra.mxu1 %v8059_v7  ;;  %v2772_v24 = vrot.slane %v8205_v2, 7  ;;  %vm2823_vm15 = vcmp.ge.f32.partialorder %v2819_v29, 0.1  ;;  %v5052_v52 = vor.u32 %v5441_v9, %v5049_v37  ;;  %v2760_v4 = vperm.slane %v8205_v2, 4  ;;  %v5440_v2 = vld [vmem:[%s8413_s3 + $0x238] sm:$0xf0] }
 0x283   : > { %3655 = vmatpush.bf16.msrb.mxu0 %v4804_v39  ;;  %3668 = vmatpush.bf16.msrb.mxu1 %v4900_v20  ;;  %v2827_v11 = vsel %vm2823_vm15, %v7671_v13, %v2807_v27  ;;  %v2616_v39 = vperm.slane %v7900_v0, 0  ;;  %v2651_v20 = vperm.slane %v7807_v49, 1 }
 0x284   : > { %v2780_v28 = vsub.f32 %v7812_v25, %v2772_v24  ;;  %v2843_v55 = vrot.slane %v2827_v11, 7 }
 0x285   : > { %3632 = vmatpush.bf16.msra.mxu2 %v4956_v43  ;;  %3645 = vmatpush.bf16.msra.mxu3 %v5052_v52  ;;  %v2620_v49 = vsel %vm292_vm3, %v2616_v39, %v7812_v25  ;;  %v5127_v52 = vld [vmem:[%s8413_s3 + $0x2d8] sm:$0xf]  ;;  %v5455_v39 = vld [vmem:[%s8413_s3 + $0x2b0] sm:$0xf0] }
 0x286   : > { %v2784_v5 = vand.u32 2147483647, %v2780_v28  ;;  %v2851_v63 = vsub.f32 %v7671_v13, %v2843_v55  ;;  %v5031_v28 = vld [vmem:[%s8413_s3 + $0x218] sm:$0xf] }
 0x287   : > { %3656 = vmatpush.bf16.msrb.mxu0 %v4792_v41  ;;  %3669 = vmatpush.bf16.msrb.mxu1 %v4888_v31  ;;  %v2831_v31 = vperm.slane %v2827_v11, 6  ;;  %v5032_v11 = vor.u32 %v5437_v33, %v5031_v28 }
 0x288   : > { %vm2788_vm2 = vcmp.ge.f32.partialorder %v2784_v5, 0.1  ;;  %v2855_v14 = vand.u32 2147483647, %v2851_v63  ;;  %v5461_v5 = vld [vmem:[%s8413_s3 + $0x2e0] sm:$0xf0] }
 0x289   : > { %v2792_v8 = vsel %vm2788_vm2, %v7812_v25, %v2772_v24  ;;  %v5464_v24 = vld [vmem:[%s8413_s3 + $0x2f8] sm:$0xf0]  ;;  %v5434_v63 = vld [vmem:[%s8413_s3 + $0x208] sm:$0xf0] }
 0x28a   : > { %v2808_v3 = vrot.slane %v2792_v8, 7  ;;  %vm2859_vm9 = vcmp.ge.f32.partialorder %v2855_v14, 0.1  ;;  %v2796_v59 = vperm.slane %v2792_v8, 5  ;;  %v5019_v8 = vld [vmem:[%s8413_s3 + $0x200] sm:$0xf] }
 0x28b   : > { %3657 = vmatpush.bf16.msrb.mxu0 %v4780_v60  ;;  %3670 = vmatpush.bf16.msrb.mxu1 %v4876_v48  ;;  %v2863_v21 = vsel %vm2859_vm9, %v7671_v13, %v2843_v55  ;;  %v5128_v55 = vor.u32 %v5461_v5, %v5127_v52  ;;  %v5020_v14 = vor.u32 %v5434_v63, %v5019_v8 }
 0x28c   : > { %v2816_v17 = vsub.f32 %v7812_v25, %v2808_v3  ;;  %2885 = vst [vmem:[#allocation1 + $0x12] sm:$0xff] %v2863_v21  ;;  %v2867_v42 = vperm.slane %v2863_v21, 7  ;;  %v5431_v21 = vld [vmem:[%s8413_s3 + $0x1f0] sm:$0xf0] }
 0x28e   : > { %v2820_v18 = vand.u32 2147483647, %v2816_v17 }
 0x28f   : > { %3658 = vmatpush.bf16.msrb.mxu0 %v4768_v35  ;;  %3671 = vmatpush.bf16.msrb.mxu1 %v4864_v26  ;;  %v5044_v35 = vor.u32 %v5440_v2, %v5043_v16  ;;  %v5140_v26 = vor.u32 %v5464_v24, %v5139_v12 }
 0x290   : > { %vm2824_vm10 = vcmp.ge.f32.partialorder %v2820_v18, 0.1  ;;  %v5007_v18 = vld [vmem:[%s8413_s3 + $0x1e8] sm:$0xf] }
 0x291   : > { %v2828_v40 = vsel %vm2824_vm10, %v7812_v25, %v2808_v3  ;;  %v5458_v3 = vld [vmem:[%s8413_s3 + $0x2c8] sm:$0xf0] }
 0x292   : > { %3659 = vmatmul.bf16.vlgmr.msrb.gmra.mxu0 %v8057_v38  ;;  %3672 = vmatmul.bf16.vlgmr.msrb.gmra.mxu1 %v8059_v7  ;;  %v2652_v38 = vperm.slane %v8045_v53, 1  ;;  %v2844_v7 = vrot.slane %v2828_v40, 7  ;;  %v2655_v53 = vsel %vm320_vm4, %v2651_v20, %v2619_v56  ;;  %v2832_v30 = vperm.slane %v2828_v40, 6 }
 0x293   : > { %v2691_v54 = vsel %vm348_vm6, %v2687_v45, %v2655_v53  ;;  %v5116_v17 = vor.u32 %v5458_v3, %v5115_v61  ;;  %v5008_v20 = vor.u32 %v5431_v21, %v5007_v18  ;;  %v5104_v40 = vor.u32 %v5455_v39, %v5103_v34  ;;  %v5091_v45 = vld [vmem:[%s8413_s3 + $0x290] sm:$0xf]  ;;  %v5449_v53 = vld [vmem:[%s8413_s3 + $0x280] sm:$0xf0]  ;;  %v3730_v39 = vld [vmem:[%s5943_s26 + $0x8] sm:$0xff] }
 0x294   : > { %v2852_v0 = vsub.f32 %v7812_v25, %v2844_v7  ;;  %v2656_v13 = vsel %vm320_vm4, %v2652_v38, %v2620_v49  ;;  %v2727_v10 = vsel %vm376_vm7, %v2723_v15, %v2691_v54  ;;  %v4995_v38 = vld [vmem:[%s8413_s3 + $0x1d0] sm:$0xf]  ;;  %v5079_v49 = vld [vmem:[%s8413_s3 + $0x278] sm:$0xf]  ;;  %vm3725_vm4 = vcmask 1042432  }
 0x295   : > { %v2692_v41 = vsel %vm348_vm6, %v2688_v32, %v2656_v13  ;;  %v2763_v6 = vsel %vm404_vm8, %v2759_v22, %v2727_v10  ;;  %v5452_v32 = vld [vmem:[%s8413_s3 + $0x298] sm:$0xf0]  ;;  %v4971_v13 = vld [vmem:[%s8413_s3 + $0x1a0] sm:$0xf]  ;;  %v5055_v10 = vld [vmem:[%s8413_s3 + $0x248] sm:$0xf] }
 0x296   : > { %v2856_v57 = vand.u32 2147483647, %v2852_v0  ;;  %v2728_v51 = vsel %vm376_vm7, %v2724_v36, %v2692_v41  ;;  %v2799_v47 = vsel %vm432_vm12, %v2795_v19, %v2763_v6  ;;  %v5092_v15 = vor.u32 %v5452_v32, %v5091_v45  ;;  %v4983_v36 = vld [vmem:[%s8413_s3 + $0x1b8] sm:$0xf]  ;;  %v5425_v0 = vld [vmem:[%s8413_s3 + $0x1c0] sm:$0xf0] }
 0x297   : > { %v2764_v44 = vsel %vm404_vm8, %v2760_v4, %v2728_v51  ;;  %v2835_v48 = vsel %vm460_vm1, %v2831_v31, %v2799_v47  ;;  %v4984_v22 = vor.u32 %v5425_v0, %v4983_v36  ;;  %v5080_v4 = vor.u32 %v5449_v53, %v5079_v49  ;;  %v5422_v19 = vld [vmem:[%s8413_s3 + $0x1a8] sm:$0xf0]  ;;  %v4959_v31 = vld [vmem:[%s8413_s3 + $0x188] sm:$0xf]  ;;  %v5443_v51 = vld [vmem:[%s8413_s3 + $0x250] sm:$0xf0] }
 0x298   : > { %vm2860_vm3 = vcmp.ge.f32.partialorder %v2856_v57, 0.1  ;;  %v2800_v27 = vsel %vm432_vm12, %v2796_v59, %v2764_v44  ;;  %v2871_v58 = vsel %vm488_vm5, %v2867_v42, %v2835_v48  ;;  %v5067_v59 = vld [vmem:[%s8413_s3 + $0x260] sm:$0xf]  ;;  %v5446_v57 = vld [vmem:[%s8413_s3 + $0x268] sm:$0xf0]  ;;  %v4972_v54 = vor.u32 %v5422_v19, %v4971_v13 }
 0x299   : > { %v2864_v1 = vsel %vm2860_vm3, %v7812_v25, %v2844_v7  ;;  %v2836_v50 = vsel %vm460_vm1, %v2832_v30, %v2800_v27  ;;  %v5428_v7 = vld [vmem:[%s8413_s3 + $0x1d8] sm:$0xf0]  ;;  %v5068_v41 = vor.u32 %v5446_v57, %v5067_v59  ;;  %v5419_v30 = vld [vmem:[%s8413_s3 + $0x190] sm:$0xf0]  ;;  %v5056_v6 = vor.u32 %v5443_v51, %v5055_v10 }
 0x29a   : > { %v2868_v60 = vperm.slane %v2864_v1, 7  ;;  %2886 = vst [vmem:[#allocation1 + $0x1b] sm:$0xff] %v2864_v1  ;;  %v4996_v56 = vor.u32 %v5428_v7, %v4995_v38  ;;  %v4960_v42 = vor.u32 %v5419_v30, %v4959_v31  ;;  %v3711_v3 = vld.sshfl [vmem:[#allocation1 + $0x8] sm:$0xff pattern:$0x75316420]  ;;  %v3731_v19 = vld [vmem:[%s5943_s26 + $0x10] sm:$0xff] }
 0x29c   : > { %v2872_v25 = vsel %vm488_vm5, %v2868_v60, %v2836_v50 }
 0x29d   : > { %v2874_v62 = vpack.c.bf16 %v2872_v25, %v2871_v58 }
 0x29f   : > { %v3025_v29 = vunpack.c.l.b16 %v2874_v62  ;;  %v3026_v23 = vunpack.c.h.b16 %v2874_v62 }
 0x2a1   : > { %v2888_v9 = vld [vmem:[#allocation1 + $0x7] ss:$9 sm:$0xff]  ;;  %v8295_v37 = vpack.c.b16 %v3025_v29, %v3025_v29  ;;  %v8297_v43 = vpack.c.b16 %v3026_v23, %v3026_v23 }
 0x2a2   : > { %2890 = vst.msk [vmem:[#allocation9] sm:$0xf] %vm6383_vm11, %v2888_v9 }
 0x2a3   : > { %3581 = vmatmul.bf16.vlgmr.msrb.gmra.mxu2 %v8295_v37  ;;  %3709 = vst [vmem:[#allocation1 + $0x10] ss:$2 sm:$0xff] %v3704_v46  ;;  %3594 = vmatmul.bf16.vlgmr.msrb.gmra.mxu3 %v8297_v43 }
 0x2a4   : > { %3677 = vmatpush.bf16.msrb.mxu2 %v5044_v35  ;;  %3690 = vmatpush.bf16.msrb.mxu3 %v5140_v26  ;;  %v3710_v35 = vld.sshfl [vmem:[#allocation1] sm:$0xff pattern:$0x75316420] }
 0x2a8   : > { %3678 = vmatpush.bf16.msrb.mxu2 %v5032_v11  ;;  %3691 = vmatpush.bf16.msrb.mxu3 %v5128_v55 }
 0x2aa   : > { %v3712_v0 = vld.sshfl [vmem:[#allocation1 + $0x10] sm:$0xff pattern:$0x75316420] }
 0x2ac   : > { %3679 = vmatpush.bf16.msrb.mxu2 %v5020_v14  ;;  %3692 = vmatpush.bf16.msrb.mxu3 %v5116_v17 }
 0x2b0   : > { %3680 = vmatpush.bf16.msrb.mxu2 %v5008_v20  ;;  %3693 = vmatpush.bf16.msrb.mxu3 %v5104_v40 }
 0x2b3   : > { %3633 = vmatmul.bf16.vlgmr.msra.gmra.mxu2 %v8295_v37  ;;  %3646 = vmatmul.bf16.vlgmr.msra.gmra.mxu3 %v8297_v43 }
 0x2b4   : > { %3681 = vmatpush.bf16.msrb.mxu2 %v4996_v56  ;;  %3694 = vmatpush.bf16.msrb.mxu3 %v5092_v15 }
 0x2b8   : > { %3682 = vmatpush.bf16.msrb.mxu2 %v4984_v22  ;;  %3695 = vmatpush.bf16.msrb.mxu3 %v5080_v4 }
 0x2bc   : > { %3683 = vmatpush.bf16.msrb.mxu2 %v4972_v54  ;;  %3696 = vmatpush.bf16.msrb.mxu3 %v5068_v41 }
 0x2c0   : > { %3684 = vmatpush.bf16.msrb.mxu2 %v4960_v42  ;;  %3697 = vmatpush.bf16.msrb.mxu3 %v5056_v6 }
 0x2c3   : > { %3685 = vmatmul.bf16.vlgmr.msrb.gmra.mxu2 %v8295_v37  ;;  %3698 = vmatmul.bf16.vlgmr.msrb.gmra.mxu3 %v8297_v43  ;;  %v3729_v43 = vld [vmem:[%s5943_s26] sm:$0xff] }
 0x2ef   : > { %v3556_v44 = vpop.f32.mrf.mxu0  ;;  %v3569_v1 = vpop.f32.mrf.mxu1 }
 0x2f0   : > { %v3570_v12 = vadd.f32 %v3569_v1, %v3556_v44 }
 0x2f7   : > { %v3558_v47 = vpop.f32.mrf.mxu0  ;;  %v3571_v27 = vpop.f32.mrf.mxu1 }
 0x2ff   : > { %v3608_v60 = vpop.f32.mrf.mxu0  ;;  %v3621_v48 = vpop.f32.mrf.mxu1 }
 0x300   : > { %v3622_v11 = vadd.f32 %v3621_v48, %v3608_v60 }
 0x307   : > { %v3610_v50 = vpop.f32.mrf.mxu0  ;;  %v3623_v58 = vpop.f32.mrf.mxu1 }
 0x30f   : > { %v3660_v25 = vpop.f32.mrf.mxu0  ;;  %v3673_v16 = vpop.f32.mrf.mxu1 }
 0x310   : > { %v3674_v45 = vadd.f32 %v3673_v16, %v3660_v25 }
 0x317   : > { %v3662_v62 = vpop.f32.mrf.mxu0  ;;  %v3675_v2 = vpop.f32.mrf.mxu1 }
 0x326   : > { %v3582_v24 = vpop.f32.mrf.mxu2  ;;  %v3595_v29 = vpop.f32.mrf.mxu3 }
 0x327   : > { %v3583_v23 = vadd.f32 %v3582_v24, %v3570_v12 }
 0x329   : > { %v3596_v46 = vadd.f32 %v3595_v29, %v3583_v23 }
 0x32b   : > { %v3719_v26 = vrot.slane %v3596_v46, 5  ;;  %3744 = vst.sshfl [vmem:[#allocation1] sm:$0xff pattern:$0x75316420] %v3596_v46 }
 0x32d   : > { %v3726_v28 = vsel %vm3725_vm4, %v3710_v35, %v3719_v26 }
 0x32e   : > { %v3732_v33 = vadd.f32 1.0, %v3726_v28  ;;  %v3584_v9 = vpop.f32.mrf.mxu2  ;;  %v3597_v37 = vpop.f32.mrf.mxu3 }
 0x330   : > { %v3735_v52 = vmax.f32 %v3732_v33, 0.0 }
 0x332   : > { %v3738_v5 = vmul.f32 %v3735_v52, %v3729_v43 }
 0x334   : > { %3741 = vst [vmem:[%s8392_s24] sm:$0xff] %v3738_v5 }
 0x336   : > { %v3634_v55 = vpop.f32.mrf.mxu2  ;;  %v3647_v8 = vpop.f32.mrf.mxu3 }
 0x337   : > { %v3635_v63 = vadd.f32 %v3634_v55, %v3622_v11 }
 0x339   : > { %v3648_v61 = vadd.f32 %v3647_v8, %v3635_v63 }
 0x33b   : > { %v3720_v14 = vrot.slane %v3648_v61, 5  ;;  %3745 = vst.sshfl [vmem:[#allocation1 + $0x8] sm:$0xff pattern:$0x75316420] %v3648_v61 }
 0x33d   : > { %v3727_v17 = vsel %vm3725_vm4, %v3711_v3, %v3720_v14 }
 0x33e   : > { %v3733_v18 = vadd.f32 1.0, %v3727_v17  ;;  %v3636_v21 = vpop.f32.mrf.mxu2  ;;  %v3649_v34 = vpop.f32.mrf.mxu3 }
 0x340   : > { %v3736_v20 = vmax.f32 %v3733_v18, 0.0 }
 0x342   : > { %v3739_v40 = vmul.f32 %v3736_v20, %v3730_v39  ;;  %v3748_v38 = vld [vmem:[#allocation1 + $0x1] ss:$2 sm:$0xff] }
 0x343   : > { %v5141_v7 = vrot.slane %v3748_v38, 9 }
 0x344   : > { %3742 = vst [vmem:[%s8392_s24 + $0x8] sm:$0xff] %v3739_v40 }
 0x345   : > { %3757 = vst [vmem:[#allocation10] sm:$0x77] %v5141_v7 }
 0x346   : > { %v3686_v32 = vpop.f32.mrf.mxu2  ;;  %v3699_v56 = vpop.f32.mrf.mxu3 }
 0x347   : > { %v3687_v15 = vadd.f32 %v3686_v32, %v3674_v45 }
 0x349   : > { %v3700_v36 = vadd.f32 %v3699_v56, %v3687_v15 }
 0x34b   : > { %v3721_v49 = vrot.slane %v3700_v36, 5  ;;  %3746 = vst.sshfl [vmem:[#allocation1 + $0x10] sm:$0xff pattern:$0x75316420] %v3700_v36 }
 0x34d   : > { %v3728_v53 = vsel %vm3725_vm4, %v3712_v0, %v3721_v49 }
 0x34e   : > { %v3734_v22 = vadd.f32 1.0, %v3728_v53  ;;  %v3688_v4 = vpop.f32.mrf.mxu2  ;;  %v3701_v13 = vpop.f32.mrf.mxu3 }
 0x350   : > { %v3737_v59 = vmax.f32 %v3734_v22, 0.0 }
 0x352   : > { %v3740_v57 = vmul.f32 %v3737_v59, %v3731_v19  ;;  %v3750_v54 = vld [vmem:[#allocation1 + $0x11] ss:$2 sm:$0xff] }
 0x353   : > { %v5142_v41 = vrot.slane %v3750_v54, 9 }
 0x354   : > { %3743 = vst [vmem:[%s8392_s24 + $0x10] sm:$0xff] %v3740_v57 }
 0x355   : > { %3758 = vst [vmem:[#allocation10 + $0x8] sm:$0x7] %v5142_v41 }
 0x356 PF: > { %s14_s17 = sadd.s32 1, %s5537_s17   ;;  %s8427_s15 = smov %s5533_s16 }
 0x357   : > { %p11_p5 = scmp.ge.s32.totalorder %s14_s17, 4   ;;  %s8428_s16 = smov %s8430_s18 }
 0x359   :  { %13 = sbr.rel (!%p11_p5) target bundleno = 2 (0x2), region = 82 }

</bundles_post_ra>
